<compile_context>
chip_gen: v5e
topology: v5e:2x2
jax: 0.10.0
libtpu: 0.0.40
codegen_flags: <defaults>
</compile_context>

<pallas_src>
import jax
import jax.numpy as jnp
from jax import lax
from jax.experimental import pallas as pl
from jax.experimental.pallas import tpu as pltpu

# ---------------- synthetic "args" (small, deterministic) ----------------
NUM_NODES = 8
RNN_UNITS = 16
INPUT_DIM = 1
OUTPUT_DIM = 1
SEQ_LEN = 4
HORIZON = 3
NUM_RNN_LAYERS = 2
MAX_DIFFUSION_STEP = 2
REQUIRES_GRAPH = 2
BATCH_SIZE = 2
EMBEDDING_SIZE = 8

assert INPUT_DIM <= RNN_UNITS and OUTPUT_DIM <= RNN_UNITS
assert OUTPUT_DIM == 1  # lane-dense (B*N, HORIZON) output packing assumes it

_VMEM = pl.BlockSpec(memory_space=pltpu.MemorySpace.VMEM)
_SMEM = pl.BlockSpec(memory_space=pltpu.MemorySpace.SMEM)


# ----------------------------- fused kernel -----------------------------
def _crfnet_fused_kernel(scalars_ref, x_seq_ref, xif_ref, emb1_ref, emb2t_ref,
                         wbig_ref, wch_ref, bias_ref,
                         proj_w_ref, proj_b_ref, if_w_ref, if_b_ref,
                         out_ref, adj_ref):
    """Entire CRFNet forward; all weights/state stay resident in VMEM."""
    seq_len, bn, _ = x_seq_ref.shape
    n = NUM_NODES
    b = bn // n
    u = RNN_UNITS

    lam = scalars_ref[0]
    beta = scalars_ref[1]

    # ---- adjacency generation + lambdax/epis fusion (once, in VMEM) -------
    # TODO(synk): ShortAdj_generator / LongAdj_generator sources were not
    # provided; stood in with learned-embedding adaptive adjacencies
    # softmax(relu(E1 @ E2^T)); E2 is pre-transposed host-side.
    def gen_adj(g):
        logits = jnp.dot(emb1_ref[g], emb2t_ref[g],
                         preferred_element_type=jnp.float32)
        return jax.nn.softmax(jnp.maximum(logits, 0.0), axis=-1)

    adj = None
    for g in range(REQUIRES_GRAPH):
        short_g = gen_adj(g)
        long_g = gen_adj(REQUIRES_GRAPH + g)
        blend_g = (short_g + lam * long_g) / (1.0 + lam)
        if g == 0:
            adj = blend_g                 # torch: epis[0] is unused (loop from 1)
        else:
            adj = adj + scalars_ref[2 + g] * blend_g
    adj_ref[...] = adj
    # TODO(synk): torch returns the Instant_forecasting adjacency; the fused
    # adjacency is returned here because that head's source was not provided.

    # Block-diagonal (B*N, B*N) adjacency -> every hop is ONE 2-D matmul.
    zn = jnp.zeros((n, n), jnp.float32)
    adj_bd = jnp.concatenate(
        [jnp.concatenate([adj if bj == bi else zn for bj in range(b)], axis=1)
         for bi in range(b)], axis=0)

    # ---- FAGRU (diffusion-conv GRU stand-in) -------------------------------
    # TODO(synk): FAGRUCell source was not provided; DCGRU-style stand-in.
    def hops_concat(z):
        # z: (BN, F) -> [z | A z | A^2 z] : (BN, (K+1)*F)
        pieces = [z]
        cur = z
        for _ in range(MAX_DIFFUSION_STEP):
            cur = jnp.dot(adj_bd, cur, preferred_element_type=jnp.float32)
            pieces.append(cur)
        return jnp.concatenate(pieces, axis=1)

    def pad_to_units(x):
        # (BN, Din<=U) -> (BN, U).  Din==1 uses a lane-broadcast + iota mask
        # (VPU only) instead of a 1-lane concatenate.
        din = x.shape[1]
        if din == u:
            return x
        if din == 1:
            col = lax.broadcasted_iota(jnp.int32, (bn, u), 1)
            return jnp.where(col < 1, jnp.broadcast_to(x, (bn, u)), 0.0)
        return jnp.concatenate(
            [x, jnp.zeros((bn, u - din), jnp.float32)], axis=1)

    def fagru_step(x, h, cell):
        # One fused cell: hop chain on [x|h] -> single mix producing the gate
        # pre-activation (2U) and candidate-x (U); only hops(r*h) @ Wch stays
        # separate.  6 MXU matmuls total, all plain 2-D.
        xh = jnp.concatenate([pad_to_units(x), h], axis=1)          # (BN, 2U)
        pre = jnp.dot(hops_concat(xh), wbig_ref[cell],
                      preferred_element_type=jnp.float32) + bias_ref[cell]
        gates = jax.nn.sigmoid(pre[:, :2 * u])
        r = gates[:, :u]
        upd = gates[:, u:2 * u]
        c = jnp.tanh(pre[:, 2 * u:]
                     + jnp.dot(hops_concat(r * h), wch_ref[cell],
                               preferred_element_type=jnp.float32))
        return upd * h + (1.0 - upd) * c

    # ---- encoder: fori_loop over time (hidden as carry bounds live ranges) --
    def enc_body(t, hs):
        inp = x_seq_ref[t]                                     # (BN, INPUT_DIM)
        new_hs = []
        for l in range(NUM_RNN_LAYERS):
            hl = fagru_step(inp, hs[l], l)
            new_hs.append(hl)
            inp = hl
        return tuple(new_hs)

    h0 = tuple(jnp.zeros((bn, u), jnp.float32) for _ in range(NUM_RNN_LAYERS))
    hidden = lax.fori_loop(0, seq_len, enc_body, h0)

    # ---- decoder (unrolled so the outputs can be blended + stored ONCE) -----
    proj_w = proj_w_ref[...]
    proj_b = proj_b_ref[...]
    dec_h = list(hidden)
    dec_in = jnp.zeros((bn, OUTPUT_DIM), jnp.float32)          # go symbol
    horizon = out_ref.shape[1]
    col = lax.broadcasted_iota(jnp.int32, (bn, horizon), 1)
    proj_mat = jnp.zeros((bn, horizon), jnp.float32)
    for t in range(horizon):
        inp = dec_in
        for l in range(NUM_RNN_LAYERS):
            dec_h[l] = fagru_step(inp, dec_h[l], NUM_RNN_LAYERS + l)
            inp = dec_h[l]
        proj = jnp.dot(inp, proj_w, preferred_element_type=jnp.float32) + proj_b
        proj_mat = jnp.where(col == t, proj, proj_mat)         # column t <- proj
        dec_in = proj        # torch: autoregressive feedback is the UNBLENDED proj

    # ---- instant-forecasting head + final beta blend, one lane-dense store --
    # TODO(synk): Instant_forecasting source was not provided; per-node linear
    # head over the temporal axis as a stand-in.
    if_out = jnp.dot(xif_ref[...], if_w_ref[...],
                     preferred_element_type=jnp.float32) + if_b_ref[...]
    out_ref[...] = (proj_mat + beta * if_out) * (1.0 / (1.0 + beta))


# ----------------------------- parameters -----------------------------
def _normal(key, shape, scale=0.1):
    return scale * jax.random.normal(key, shape, dtype=jnp.float32)


def init_cell_params(key, in_dim):
    k = MAX_DIFFUSION_STEP + 1
    ks = jax.random.split(key, 4)
    wgx = _normal(ks[0], (k, in_dim, 2 * RNN_UNITS))
    wgh = _normal(ks[1], (k, RNN_UNITS, 2 * RNN_UNITS))
    bg = jnp.full((1, 2 * RNN_UNITS), 1.0, jnp.float32)   # torch DCGRU bias init
    wcx = _normal(ks[2], (k, in_dim, RNN_UNITS))
    wch = _normal(ks[3], (k, RNN_UNITS, RNN_UNITS))
    bc = jnp.zeros((1, RNN_UNITS), jnp.float32)
    return (wgx, wgh, bg, wcx, wch, bc)


def init_params(seed=0):
    key = jax.random.PRNGKey(seed)
    keys = jax.random.split(key, 16)
    enc, dec = [], []
    for l in range(NUM_RNN_LAYERS):
        enc_in = INPUT_DIM if l == 0 else RNN_UNITS
        dec_in = OUTPUT_DIM if l == 0 else RNN_UNITS
        enc.append(init_cell_params(keys[l], enc_in))
        dec.append(init_cell_params(keys[4 + l], dec_in))
    return {
        'enc': enc,
        'dec': dec,
        'proj_w': _normal(keys[8], (RNN_UNITS, OUTPUT_DIM)),
        'proj_b': jnp.zeros((OUTPUT_DIM,), jnp.float32),
        'short_e1': _normal(keys[9], (REQUIRES_GRAPH, NUM_NODES, EMBEDDING_SIZE), 1.0),
        'short_e2': _normal(keys[10], (REQUIRES_GRAPH, NUM_NODES, EMBEDDING_SIZE), 1.0),
        'long_e1': _normal(keys[11], (REQUIRES_GRAPH, NUM_NODES, EMBEDDING_SIZE), 1.0),
        'long_e2': _normal(keys[12], (REQUIRES_GRAPH, NUM_NODES, EMBEDDING_SIZE), 1.0),
        'if_w': _normal(keys[13], (SEQ_LEN * INPUT_DIM, HORIZON)),
        'if_b': jnp.zeros((HORIZON,), jnp.float32),
        'lambdax': jnp.full((1,), 0.3, jnp.float32),
        'beta': jnp.full((1,), 0.1, jnp.float32),
        'epis': jnp.full((REQUIRES_GRAPH,), 0.3, jnp.float32),
    }


def _pack_cell(cell):
    """Host-side repack of one FAGRU cell into the fused-kernel layout.

    wbig rows (hop-major), per hop k the (2U, 3U) block:
        [[Wgx_k | Wcx_k]   x rows, zero-padded from Din up to U rows
         [Wgh_k |   0  ]]  h rows
    wch rows (hop-major): per hop k the (U, U) block Wch_k.
    bias: [bg | bc]  ->  (1, 3U).
    """
    wgx, wgh, bg, wcx, wch, bc = cell
    k1, din, _ = wgx.shape
    u = RNN_UNITS
    blocks = []
    for k in range(k1):
        x_rows = jnp.concatenate([wgx[k], wcx[k]], axis=1)            # (din, 3U)
        pad_rows = jnp.zeros((u - din, 3 * u), jnp.float32)
        h_rows = jnp.concatenate(
            [wgh[k], jnp.zeros((u, u), jnp.float32)], axis=1)         # (U, 3U)
        blocks.append(jnp.concatenate([x_rows, pad_rows, h_rows], axis=0))
    wbig = jnp.concatenate(blocks, axis=0)                            # ((K+1)*2U, 3U)
    wch_flat = jnp.concatenate([wch[k] for k in range(k1)], axis=0)   # ((K+1)*U, U)
    bias = jnp.concatenate([bg, bc], axis=1)                          # (1, 3U)
    return wbig, wch_flat, bias


def prepare_params(params):
    """One-time host-side layout prep (outside the hot path):
       * per-cell weights packed into 3 lane-dense slabs (one DMA each),
       * E2 embeddings pre-transposed (no in-kernel transpose),
       * scalars packed for SMEM."""
    cells = [_pack_cell(c) for c in params['enc'] + params['dec']]
    t = lambda e: jnp.transpose(e, (0, 2, 1))
    return {
        'wbig': jnp.stack([c[0] for c in cells]),     # (2L, (K+1)*2U, 3U)
        'wch': jnp.stack([c[1] for c in cells]),      # (2L, (K+1)*U, U)
        'bias': jnp.stack([c[2] for c in cells]),     # (2L, 1, 3U)
        'emb1': jnp.concatenate([params['short_e1'], params['long_e1']], axis=0),
        'emb2t': jnp.concatenate([t(params['short_e2']), t(params['long_e2'])],
                                 axis=0),
        'proj_w': params['proj_w'],
        'proj_b': params['proj_b'].reshape(1, -1),
        'if_w': params['if_w'],
        'if_b': params['if_b'].reshape(1, -1),
        'scalars': jnp.concatenate(
            [params['lambdax'], params['beta'], params['epis']]
        ).astype(jnp.float32),
    }


def _cost_estimate(batch):
    """Advisory cost hint for XLA scheduling (all Python ints)."""
    bn = batch * NUM_NODES
    u, k = RNN_UNITS, MAX_DIFFUSION_STEP
    k1 = k + 1
    cells = (SEQ_LEN + HORIZON) * NUM_RNN_LAYERS
    per_cell = (2 * k * bn * bn * 2 * u            # hop chain on [x|h]
                + 2 * bn * (k1 * 2 * u) * 3 * u    # big mix
                + 2 * k * bn * bn * u              # hop chain on r*h
                + 2 * bn * (k1 * u) * u)           # candidate mix
    flops = (cells * per_cell
             + HORIZON * 2 * bn * u * OUTPUT_DIM
             + 2 * bn * SEQ_LEN * INPUT_DIM * HORIZON
             + 2 * REQUIRES_GRAPH * 2 * 2 * NUM_NODES * NUM_NODES * EMBEDDING_SIZE)
    transcendentals = (cells * bn * 3 * u
                       + 2 * REQUIRES_GRAPH * NUM_NODES * NUM_NODES)
    nbytes = 4 * (2 * SEQ_LEN * bn * INPUT_DIM
                  + 4 * REQUIRES_GRAPH * NUM_NODES * EMBEDDING_SIZE
                  + 2 * NUM_RNN_LAYERS * (k1 * 2 * u * 3 * u + k1 * u * u + 3 * u)
                  + u * OUTPUT_DIM + OUTPUT_DIM
                  + SEQ_LEN * INPUT_DIM * HORIZON + HORIZON
                  + bn * HORIZON + NUM_NODES * NUM_NODES)
    return pl.CostEstimate(flops=flops, transcendentals=transcendentals,
                           bytes_accessed=nbytes)


# ----------------------------- forward pass -----------------------------
@jax.jit
def crfnet_forward(inputs, fp):
    """inputs: (seq_len, batch, num_nodes * input_dim) — matches the torch API.

    Returns (outputs, adj) with outputs: (horizon, batch, num_nodes*output_dim).
    """
    s, bsz, _ = inputs.shape
    bn = bsz * NUM_NODES
    # Layout plumbing only (tiny, fused under jit).  (b, n) rows are batch-major
    # to match the block-diagonal adjacency used inside the kernel.
    x_seq = inputs.reshape(s, bn, INPUT_DIM)
    # TODO(synk): per-node [time] feature ordering assumes INPUT_DIM == 1.
    x_if = jnp.transpose(inputs, (1, 2, 0)).reshape(bn, INPUT_DIM * s)

    out_raw, adj = pl.pallas_call(
        _crfnet_fused_kernel,
        out_shape=(
            jax.ShapeDtypeStruct((bn, HORIZON), jnp.float32),
            jax.ShapeDtypeStruct((NUM_NODES, NUM_NODES), jnp.float32),
        ),
        in_specs=[_SMEM] + [_VMEM] * 11,
        out_specs=(_VMEM, _VMEM),
        cost_estimate=_cost_estimate(bsz),
        # NOTE(v7x): when batch grows, add a grid over the batch axis with
        # dimension_semantics=("parallel",) to use the second TensorCore, and
        # re-derive the batch tile against 64 MiB VMEM (vmem_limit_bytes).
    )(fp['scalars'], x_seq, x_if, fp['emb1'], fp['emb2t'],
      fp['wbig'], fp['wch'], fp['bias'],
      fp['proj_w'], fp['proj_b'], fp['if_w'], fp['if_b'])

    outputs = out_raw.T.reshape(HORIZON, bsz, NUM_NODES * OUTPUT_DIM)
    return outputs, adj


# ----------------------------- main -----------------------------
if __name__ == "__main__":
    fused_params = prepare_params(init_params(seed=0))
    key = jax.random.PRNGKey(0)
    inputs = jax.random.normal(
        key, (SEQ_LEN, BATCH_SIZE, NUM_NODES * INPUT_DIM), dtype=jnp.float32)

    outputs, adj = crfnet_forward(inputs, fused_params)
    outputs = jax.block_until_ready(outputs)
    adj = jax.block_until_ready(adj)

    assert outputs.shape == (HORIZON, BATCH_SIZE, NUM_NODES * OUTPUT_DIM)
    assert adj.shape == (NUM_NODES, NUM_NODES)
    assert bool(jnp.all(jnp.isfinite(outputs)))
    assert bool(jnp.all(jnp.isfinite(adj)))
    print("KERNEL_OK")
</pallas_src>

<mosaic_0001>
module attributes {stable_mosaic.version = 11 : i64} {
  func.func @_crfnet_fused_kernel(%arg0: memref<4xf32, #tpu.memory_space<smem>>, %arg1: memref<4x16x1xf32, #tpu.memory_space<vmem>>, %arg2: memref<16x4xf32, #tpu.memory_space<vmem>>, %arg3: memref<4x8x8xf32, #tpu.memory_space<vmem>>, %arg4: memref<4x8x8xf32, #tpu.memory_space<vmem>>, %arg5: memref<4x96x48xf32, #tpu.memory_space<vmem>>, %arg6: memref<4x48x16xf32, #tpu.memory_space<vmem>>, %arg7: memref<4x1x48xf32, #tpu.memory_space<vmem>>, %arg8: memref<16x1xf32, #tpu.memory_space<vmem>>, %arg9: memref<1x1xf32, #tpu.memory_space<vmem>>, %arg10: memref<4x3xf32, #tpu.memory_space<vmem>>, %arg11: memref<1x3xf32, #tpu.memory_space<vmem>>, %arg12: memref<16x3xf32, #tpu.memory_space<vmem>>, %arg13: memref<8x8xf32, #tpu.memory_space<vmem>>) attributes {dimension_semantics = [], scalar_prefetch = 0 : i64, scratch_operands = 0 : i64, tpu.core_type = #tpu.core_type<tc>} {
    %c0 = arith.constant 0 : index
    %0 = memref.load %arg0[%c0] : memref<4xf32, #tpu.memory_space<smem>>
    %c1 = arith.constant 1 : index
    %1 = memref.load %arg0[%c1] : memref<4xf32, #tpu.memory_space<smem>>
    %c0_0 = arith.constant 0 : index
    %c0_1 = arith.constant 0 : index
    %c0_2 = arith.constant 0 : index
    %2 = vector.load %arg3[%c0_0, %c0_1, %c0_2] : memref<4x8x8xf32, #tpu.memory_space<vmem>>, vector<1x8x8xf32>
    %3 = vector.shape_cast %2 : vector<1x8x8xf32> to vector<8x8xf32>
    %c0_3 = arith.constant 0 : index
    %c0_4 = arith.constant 0 : index
    %c0_5 = arith.constant 0 : index
    %4 = vector.load %arg4[%c0_3, %c0_4, %c0_5] : memref<4x8x8xf32, #tpu.memory_space<vmem>>, vector<1x8x8xf32>
    %5 = vector.shape_cast %4 : vector<1x8x8xf32> to vector<8x8xf32>
    %cst = arith.constant dense<0.000000e+00> : vector<8x8xf32>
    %6 = tpu.matmul %3, %5, %cst {dimension_numbers = #tpu.dot_dimension_numbers<[1], [0], [0], [1], [0, 0, 1, 1], [], []>} : vector<8x8xf32>, vector<8x8xf32>, vector<8x8xf32> -> vector<8x8xf32>
    %cst_6 = arith.constant 0.000000e+00 : f32
    %7 = vector.broadcast %cst_6 : f32 to vector<8x8xf32>
    %8 = arith.maximumf %6, %7 : vector<8x8xf32>
    %cst_7 = arith.constant dense<0xFF800000> : vector<8xf32>
    %9 = vector.multi_reduction <maximumf>, %8, %cst_7 [1] : vector<8x8xf32> to vector<8xf32>
    %cst_8 = arith.constant 0xFF800000 : f32
    %10 = vector.broadcast %cst_8 : f32 to vector<8xf32>
    %11 = arith.maximumf %10, %9 : vector<8xf32>
    %12 = vector.shape_cast %11 : vector<8xf32> to vector<8x1xf32>
    %13 = vector.broadcast %12 : vector<8x1xf32> to vector<8x8xf32>
    %14 = arith.subf %8, %13 : vector<8x8xf32>
    %15 = math.exp %14 : vector<8x8xf32>
    %cst_9 = arith.constant dense<0.000000e+00> : vector<8xf32>
    %16 = vector.multi_reduction <add>, %15, %cst_9 [1] : vector<8x8xf32> to vector<8xf32>
    %17 = vector.shape_cast %16 : vector<8xf32> to vector<8x1xf32>
    %18 = vector.broadcast %17 : vector<8x1xf32> to vector<8x8xf32>
    %19 = arith.divf %15, %18 : vector<8x8xf32>
    %c2 = arith.constant 2 : index
    %c0_10 = arith.constant 0 : index
    %c0_11 = arith.constant 0 : index
    %20 = vector.load %arg3[%c2, %c0_10, %c0_11] : memref<4x8x8xf32, #tpu.memory_space<vmem>>, vector<1x8x8xf32>
    %21 = vector.shape_cast %20 : vector<1x8x8xf32> to vector<8x8xf32>
    %c2_12 = arith.constant 2 : index
    %c0_13 = arith.constant 0 : index
    %c0_14 = arith.constant 0 : index
    %22 = vector.load %arg4[%c2_12, %c0_13, %c0_14] : memref<4x8x8xf32, #tpu.memory_space<vmem>>, vector<1x8x8xf32>
    %23 = vector.shape_cast %22 : vector<1x8x8xf32> to vector<8x8xf32>
    %cst_15 = arith.constant dense<0.000000e+00> : vector<8x8xf32>
    %24 = tpu.matmul %21, %23, %cst_15 {dimension_numbers = #tpu.dot_dimension_numbers<[1], [0], [0], [1], [0, 0, 1, 1], [], []>} : vector<8x8xf32>, vector<8x8xf32>, vector<8x8xf32> -> vector<8x8xf32>
    %cst_16 = arith.constant 0.000000e+00 : f32
    %25 = vector.broadcast %cst_16 : f32 to vector<8x8xf32>
    %26 = arith.maximumf %24, %25 : vector<8x8xf32>
    %cst_17 = arith.constant dense<0xFF800000> : vector<8xf32>
    %27 = vector.multi_reduction <maximumf>, %26, %cst_17 [1] : vector<8x8xf32> to vector<8xf32>
    %cst_18 = arith.constant 0xFF800000 : f32
    %28 = vector.broadcast %cst_18 : f32 to vector<8xf32>
    %29 = arith.maximumf %28, %27 : vector<8xf32>
    %30 = vector.shape_cast %29 : vector<8xf32> to vector<8x1xf32>
    %31 = vector.broadcast %30 : vector<8x1xf32> to vector<8x8xf32>
    %32 = arith.subf %26, %31 : vector<8x8xf32>
    %33 = math.exp %32 : vector<8x8xf32>
    %cst_19 = arith.constant dense<0.000000e+00> : vector<8xf32>
    %34 = vector.multi_reduction <add>, %33, %cst_19 [1] : vector<8x8xf32> to vector<8xf32>
    %35 = vector.shape_cast %34 : vector<8xf32> to vector<8x1xf32>
    %36 = vector.broadcast %35 : vector<8x1xf32> to vector<8x8xf32>
    %37 = arith.divf %33, %36 : vector<8x8xf32>
    %38 = vector.broadcast %0 : f32 to vector<8x8xf32>
    %39 = arith.mulf %38, %37 : vector<8x8xf32>
    %40 = arith.addf %19, %39 : vector<8x8xf32>
    %cst_20 = arith.constant 1.000000e+00 : f32
    %41 = arith.addf %cst_20, %0 : f32
    %42 = vector.broadcast %41 : f32 to vector<8x8xf32>
    %43 = arith.divf %40, %42 : vector<8x8xf32>
    %c1_21 = arith.constant 1 : index
    %c0_22 = arith.constant 0 : index
    %c0_23 = arith.constant 0 : index
    %44 = vector.load %arg3[%c1_21, %c0_22, %c0_23] : memref<4x8x8xf32, #tpu.memory_space<vmem>>, vector<1x8x8xf32>
    %45 = vector.shape_cast %44 : vector<1x8x8xf32> to vector<8x8xf32>
    %c1_24 = arith.constant 1 : index
    %c0_25 = arith.constant 0 : index
    %c0_26 = arith.constant 0 : index
    %46 = vector.load %arg4[%c1_24, %c0_25, %c0_26] : memref<4x8x8xf32, #tpu.memory_space<vmem>>, vector<1x8x8xf32>
    %47 = vector.shape_cast %46 : vector<1x8x8xf32> to vector<8x8xf32>
    %cst_27 = arith.constant dense<0.000000e+00> : vector<8x8xf32>
    %48 = tpu.matmul %45, %47, %cst_27 {dimension_numbers = #tpu.dot_dimension_numbers<[1], [0], [0], [1], [0, 0, 1, 1], [], []>} : vector<8x8xf32>, vector<8x8xf32>, vector<8x8xf32> -> vector<8x8xf32>
    %cst_28 = arith.constant 0.000000e+00 : f32
    %49 = vector.broadcast %cst_28 : f32 to vector<8x8xf32>
    %50 = arith.maximumf %48, %49 : vector<8x8xf32>
    %cst_29 = arith.constant dense<0xFF800000> : vector<8xf32>
    %51 = vector.multi_reduction <maximumf>, %50, %cst_29 [1] : vector<8x8xf32> to vector<8xf32>
    %cst_30 = arith.constant 0xFF800000 : f32
    %52 = vector.broadcast %cst_30 : f32 to vector<8xf32>
    %53 = arith.maximumf %52, %51 : vector<8xf32>
    %54 = vector.shape_cast %53 : vector<8xf32> to vector<8x1xf32>
    %55 = vector.broadcast %54 : vector<8x1xf32> to vector<8x8xf32>
    %56 = arith.subf %50, %55 : vector<8x8xf32>
    %57 = math.exp %56 : vector<8x8xf32>
    %cst_31 = arith.constant dense<0.000000e+00> : vector<8xf32>
    %58 = vector.multi_reduction <add>, %57, %cst_31 [1] : vector<8x8xf32> to vector<8xf32>
    %59 = vector.shape_cast %58 : vector<8xf32> to vector<8x1xf32>
    %60 = vector.broadcast %59 : vector<8x1xf32> to vector<8x8xf32>
    %61 = arith.divf %57, %60 : vector<8x8xf32>
    %c3 = arith.constant 3 : index
    %c0_32 = arith.constant 0 : index
    %c0_33 = arith.constant 0 : index
    %62 = vector.load %arg3[%c3, %c0_32, %c0_33] : memref<4x8x8xf32, #tpu.memory_space<vmem>>, vector<1x8x8xf32>
    %63 = vector.shape_cast %62 : vector<1x8x8xf32> to vector<8x8xf32>
    %c3_34 = arith.constant 3 : index
    %c0_35 = arith.constant 0 : index
    %c0_36 = arith.constant 0 : index
    %64 = vector.load %arg4[%c3_34, %c0_35, %c0_36] : memref<4x8x8xf32, #tpu.memory_space<vmem>>, vector<1x8x8xf32>
    %65 = vector.shape_cast %64 : vector<1x8x8xf32> to vector<8x8xf32>
    %cst_37 = arith.constant dense<0.000000e+00> : vector<8x8xf32>
    %66 = tpu.matmul %63, %65, %cst_37 {dimension_numbers = #tpu.dot_dimension_numbers<[1], [0], [0], [1], [0, 0, 1, 1], [], []>} : vector<8x8xf32>, vector<8x8xf32>, vector<8x8xf32> -> vector<8x8xf32>
    %cst_38 = arith.constant 0.000000e+00 : f32
    %67 = vector.broadcast %cst_38 : f32 to vector<8x8xf32>
    %68 = arith.maximumf %66, %67 : vector<8x8xf32>
    %cst_39 = arith.constant dense<0xFF800000> : vector<8xf32>
    %69 = vector.multi_reduction <maximumf>, %68, %cst_39 [1] : vector<8x8xf32> to vector<8xf32>
    %cst_40 = arith.constant 0xFF800000 : f32
    %70 = vector.broadcast %cst_40 : f32 to vector<8xf32>
    %71 = arith.maximumf %70, %69 : vector<8xf32>
    %72 = vector.shape_cast %71 : vector<8xf32> to vector<8x1xf32>
    %73 = vector.broadcast %72 : vector<8x1xf32> to vector<8x8xf32>
    %74 = arith.subf %68, %73 : vector<8x8xf32>
    %75 = math.exp %74 : vector<8x8xf32>
    %cst_41 = arith.constant dense<0.000000e+00> : vector<8xf32>
    %76 = vector.multi_reduction <add>, %75, %cst_41 [1] : vector<8x8xf32> to vector<8xf32>
    %77 = vector.shape_cast %76 : vector<8xf32> to vector<8x1xf32>
    %78 = vector.broadcast %77 : vector<8x1xf32> to vector<8x8xf32>
    %79 = arith.divf %75, %78 : vector<8x8xf32>
    %80 = vector.broadcast %0 : f32 to vector<8x8xf32>
    %81 = arith.mulf %80, %79 : vector<8x8xf32>
    %82 = arith.addf %61, %81 : vector<8x8xf32>
    %cst_42 = arith.constant 1.000000e+00 : f32
    %83 = arith.addf %cst_42, %0 : f32
    %84 = vector.broadcast %83 : f32 to vector<8x8xf32>
    %85 = arith.divf %82, %84 : vector<8x8xf32>
    %c3_43 = arith.constant 3 : index
    %86 = memref.load %arg0[%c3_43] : memref<4xf32, #tpu.memory_space<smem>>
    %87 = vector.broadcast %86 : f32 to vector<8x8xf32>
    %88 = arith.mulf %87, %85 : vector<8x8xf32>
    %89 = arith.addf %43, %88 : vector<8x8xf32>
    %c0_44 = arith.constant 0 : index
    %c0_45 = arith.constant 0 : index
    %90 = vector.load %arg13[%c0_44, %c0_45] : memref<8x8xf32, #tpu.memory_space<vmem>>, vector<8x8xf32>
    tpu.vector_store %arg13[%c0_44, %c0_45], %89 {strides = array<i32>} : memref<8x8xf32, #tpu.memory_space<vmem>>, vector<8x8xf32>,
    %cst_46 = arith.constant 0.000000e+00 : f32
    %91 = vector.broadcast %cst_46 : f32 to vector<8x8xf32>
    %92 = tpu.concatenate %89, %91 in 1 : vector<8x8xf32>, vector<8x8xf32> -> vector<8x16xf32>
    %93 = tpu.concatenate %91, %89 in 1 : vector<8x8xf32>, vector<8x8xf32> -> vector<8x16xf32>
    %94 = tpu.concatenate %92, %93 in 0 : vector<8x16xf32>, vector<8x16xf32> -> vector<16x16xf32>
    %cst_47 = arith.constant 0.000000e+00 : f32
    %95 = vector.broadcast %cst_47 : f32 to vector<16x16xf32>
    %cst_48 = arith.constant 0.000000e+00 : f32
    %96 = vector.broadcast %cst_48 : f32 to vector<16x16xf32>
    %c0_i32 = arith.constant 0 : i32
    %c4_i32 = arith.constant 4 : i32
    %97 = arith.addi %c0_i32, %c4_i32 : i32
    %c1_i32 = arith.constant 1 : i32
    %98:2 = scf.for %arg14 = %c0_i32 to %97 step %c1_i32 iter_args(%arg15 = %95, %arg16 = %96) -> (vector<16x16xf32>, vector<16x16xf32>)  : i32 {
      %367 = arith.index_cast %arg14 : i32 to index
      %c0_180 = arith.constant 0 : index
      %c0_181 = arith.constant 0 : index
      %368 = vector.load %arg1[%367, %c0_180, %c0_181] : memref<4x16x1xf32, #tpu.memory_space<vmem>>, vector<1x16x1xf32>
      %369 = vector.shape_cast %368 : vector<1x16x1xf32> to vector<16x1xf32>
      %370 = tpu.iota {dimensions = array<i32: 1>} : vector<16x16xi32>
      %c1_i32_182 = arith.constant 1 : i32
      %371 = vector.broadcast %c1_i32_182 : i32 to vector<16x16xi32>
      %372 = arith.cmpi slt, %370, %371 : vector<16x16xi32>
      %373 = vector.shape_cast %369 : vector<16x1xf32> to vector<16x1xf32>
      %374 = vector.broadcast %373 : vector<16x1xf32> to vector<16x16xf32>
      %cst_183 = arith.constant 0.000000e+00 : f32
      %375 = vector.broadcast %cst_183 : f32 to vector<16x16xf32>
      %376 = arith.select %372, %374, %375 : vector<16x16xi1>, vector<16x16xf32>
      %377 = tpu.concatenate %376, %arg15 in 1 : vector<16x16xf32>, vector<16x16xf32> -> vector<16x32xf32>
      %cst_184 = arith.constant dense<0.000000e+00> : vector<16x32xf32>
      %378 = tpu.matmul %94, %377, %cst_184 {dimension_numbers = #tpu.dot_dimension_numbers<[1], [0], [0], [1], [0, 0, 1, 1], [], []>} : vector<16x16xf32>, vector<16x32xf32>, vector<16x32xf32> -> vector<16x32xf32>
      %cst_185 = arith.constant dense<0.000000e+00> : vector<16x32xf32>
      %379 = tpu.matmul %94, %378, %cst_185 {dimension_numbers = #tpu.dot_dimension_numbers<[1], [0], [0], [1], [0, 0, 1, 1], [], []>} : vector<16x16xf32>, vector<16x32xf32>, vector<16x32xf32> -> vector<16x32xf32>
      %380 = tpu.concatenate %377, %378, %379 in 1 : vector<16x32xf32>, vector<16x32xf32>, vector<16x32xf32> -> vector<16x96xf32>
      %c0_186 = arith.constant 0 : index
      %c0_187 = arith.constant 0 : index
      %c0_188 = arith.constant 0 : index
      %381 = vector.load %arg5[%c0_186, %c0_187, %c0_188] : memref<4x96x48xf32, #tpu.memory_space<vmem>>, vector<1x96x48xf32>
      %382 = vector.shape_cast %381 : vector<1x96x48xf32> to vector<96x48xf32>
      %cst_189 = arith.constant dense<0.000000e+00> : vector<16x48xf32>
      %383 = tpu.matmul %380, %382, %cst_189 {dimension_numbers = #tpu.dot_dimension_numbers<[1], [0], [0], [1], [0, 0, 1, 1], [], []>} : vector<16x96xf32>, vector<96x48xf32>, vector<16x48xf32> -> vector<16x48xf32>
      %c0_190 = arith.constant 0 : index
      %c0_191 = arith.constant 0 : index
      %c0_192 = arith.constant 0 : index
      %384 = vector.load %arg7[%c0_190, %c0_191, %c0_192] : memref<4x1x48xf32, #tpu.memory_space<vmem>>, vector<1x1x48xf32>
      %385 = vector.shape_cast %384 : vector<1x1x48xf32> to vector<1x48xf32>
      %386 = vector.broadcast %385 : vector<1x48xf32> to vector<16x48xf32>
      %387 = arith.addf %383, %386 : vector<16x48xf32>
      %388 = vector.extract_strided_slice %387 {offsets = [0, 0], sizes = [16, 32], strides = [1, 1]} : vector<16x48xf32> to vector<16x32xf32>
      %389 = arith.negf %388 : vector<16x32xf32>
      %390 = math.exp %389 : vector<16x32xf32>
      %cst_193 = arith.constant 1.000000e+00 : f32
      %391 = vector.broadcast %cst_193 : f32 to vector<16x32xf32>
      %392 = arith.addf %391, %390 : vector<16x32xf32>
      %393 = arith.divf %391, %392 : vector<16x32xf32>
      %394 = vector.extract_strided_slice %393 {offsets = [0, 0], sizes = [16, 16], strides = [1, 1]} : vector<16x32xf32> to vector<16x16xf32>
      %395 = vector.extract_strided_slice %393 {offsets = [0, 16], sizes = [16, 16], strides = [1, 1]} : vector<16x32xf32> to vector<16x16xf32>
      %396 = vector.extract_strided_slice %387 {offsets = [0, 32], sizes = [16, 16], strides = [1, 1]} : vector<16x48xf32> to vector<16x16xf32>
      %397 = arith.mulf %394, %arg15 : vector<16x16xf32>
      %cst_194 = arith.constant dense<0.000000e+00> : vector<16x16xf32>
      %398 = tpu.matmul %94, %397, %cst_194 {dimension_numbers = #tpu.dot_dimension_numbers<[1], [0], [0], [1], [0, 0, 1, 1], [], []>} : vector<16x16xf32>, vector<16x16xf32>, vector<16x16xf32> -> vector<16x16xf32>
      %cst_195 = arith.constant dense<0.000000e+00> : vector<16x16xf32>
      %399 = tpu.matmul %94, %398, %cst_195 {dimension_numbers = #tpu.dot_dimension_numbers<[1], [0], [0], [1], [0, 0, 1, 1], [], []>} : vector<16x16xf32>, vector<16x16xf32>, vector<16x16xf32> -> vector<16x16xf32>
      %400 = tpu.concatenate %397, %398, %399 in 1 : vector<16x16xf32>, vector<16x16xf32>, vector<16x16xf32> -> vector<16x48xf32>
      %c0_196 = arith.constant 0 : index
      %c0_197 = arith.constant 0 : index
      %c0_198 = arith.constant 0 : index
      %401 = vector.load %arg6[%c0_196, %c0_197, %c0_198] : memref<4x48x16xf32, #tpu.memory_space<vmem>>, vector<1x48x16xf32>
      %402 = vector.shape_cast %401 : vector<1x48x16xf32> to vector<48x16xf32>
      %cst_199 = arith.constant dense<0.000000e+00> : vector<16x16xf32>
      %403 = tpu.matmul %400, %402, %cst_199 {dimension_numbers = #tpu.dot_dimension_numbers<[1], [0], [0], [1], [0, 0, 1, 1], [], []>} : vector<16x48xf32>, vector<48x16xf32>, vector<16x16xf32> -> vector<16x16xf32>
      %404 = arith.addf %396, %403 : vector<16x16xf32>
      %405 = math.tanh %404 : vector<16x16xf32>
      %406 = arith.mulf %395, %arg15 : vector<16x16xf32>
      %cst_200 = arith.constant 1.000000e+00 : f32
      %407 = vector.broadcast %cst_200 : f32 to vector<16x16xf32>
      %408 = arith.subf %407, %395 : vector<16x16xf32>
      %409 = arith.mulf %408, %405 : vector<16x16xf32>
      %410 = arith.addf %406, %409 : vector<16x16xf32>
      %411 = tpu.concatenate %410, %arg16 in 1 : vector<16x16xf32>, vector<16x16xf32> -> vector<16x32xf32>
      %cst_201 = arith.constant dense<0.000000e+00> : vector<16x32xf32>
      %412 = tpu.matmul %94, %411, %cst_201 {dimension_numbers = #tpu.dot_dimension_numbers<[1], [0], [0], [1], [0, 0, 1, 1], [], []>} : vector<16x16xf32>, vector<16x32xf32>, vector<16x32xf32> -> vector<16x32xf32>
      %cst_202 = arith.constant dense<0.000000e+00> : vector<16x32xf32>
      %413 = tpu.matmul %94, %412, %cst_202 {dimension_numbers = #tpu.dot_dimension_numbers<[1], [0], [0], [1], [0, 0, 1, 1], [], []>} : vector<16x16xf32>, vector<16x32xf32>, vector<16x32xf32> -> vector<16x32xf32>
      %414 = tpu.concatenate %411, %412, %413 in 1 : vector<16x32xf32>, vector<16x32xf32>, vector<16x32xf32> -> vector<16x96xf32>
      %c1_203 = arith.constant 1 : index
      %c0_204 = arith.constant 0 : index
      %c0_205 = arith.constant 0 : index
      %415 = vector.load %arg5[%c1_203, %c0_204, %c0_205] : memref<4x96x48xf32, #tpu.memory_space<vmem>>, vector<1x96x48xf32>
      %416 = vector.shape_cast %415 : vector<1x96x48xf32> to vector<96x48xf32>
      %cst_206 = arith.constant dense<0.000000e+00> : vector<16x48xf32>
      %417 = tpu.matmul %414, %416, %cst_206 {dimension_numbers = #tpu.dot_dimension_numbers<[1], [0], [0], [1], [0, 0, 1, 1], [], []>} : vector<16x96xf32>, vector<96x48xf32>, vector<16x48xf32> -> vector<16x48xf32>
      %c1_207 = arith.constant 1 : index
      %c0_208 = arith.constant 0 : index
      %c0_209 = arith.constant 0 : index
      %418 = vector.load %arg7[%c1_207, %c0_208, %c0_209] : memref<4x1x48xf32, #tpu.memory_space<vmem>>, vector<1x1x48xf32>
      %419 = vector.shape_cast %418 : vector<1x1x48xf32> to vector<1x48xf32>
      %420 = vector.broadcast %419 : vector<1x48xf32> to vector<16x48xf32>
      %421 = arith.addf %417, %420 : vector<16x48xf32>
      %422 = vector.extract_strided_slice %421 {offsets = [0, 0], sizes = [16, 32], strides = [1, 1]} : vector<16x48xf32> to vector<16x32xf32>
      %423 = arith.negf %422 : vector<16x32xf32>
      %424 = math.exp %423 : vector<16x32xf32>
      %cst_210 = arith.constant 1.000000e+00 : f32
      %425 = vector.broadcast %cst_210 : f32 to vector<16x32xf32>
      %426 = arith.addf %425, %424 : vector<16x32xf32>
      %427 = arith.divf %425, %426 : vector<16x32xf32>
      %428 = vector.extract_strided_slice %427 {offsets = [0, 0], sizes = [16, 16], strides = [1, 1]} : vector<16x32xf32> to vector<16x16xf32>
      %429 = vector.extract_strided_slice %427 {offsets = [0, 16], sizes = [16, 16], strides = [1, 1]} : vector<16x32xf32> to vector<16x16xf32>
      %430 = vector.extract_strided_slice %421 {offsets = [0, 32], sizes = [16, 16], strides = [1, 1]} : vector<16x48xf32> to vector<16x16xf32>
      %431 = arith.mulf %428, %arg16 : vector<16x16xf32>
      %cst_211 = arith.constant dense<0.000000e+00> : vector<16x16xf32>
      %432 = tpu.matmul %94, %431, %cst_211 {dimension_numbers = #tpu.dot_dimension_numbers<[1], [0], [0], [1], [0, 0, 1, 1], [], []>} : vector<16x16xf32>, vector<16x16xf32>, vector<16x16xf32> -> vector<16x16xf32>
      %cst_212 = arith.constant dense<0.000000e+00> : vector<16x16xf32>
      %433 = tpu.matmul %94, %432, %cst_212 {dimension_numbers = #tpu.dot_dimension_numbers<[1], [0], [0], [1], [0, 0, 1, 1], [], []>} : vector<16x16xf32>, vector<16x16xf32>, vector<16x16xf32> -> vector<16x16xf32>
      %434 = tpu.concatenate %431, %432, %433 in 1 : vector<16x16xf32>, vector<16x16xf32>, vector<16x16xf32> -> vector<16x48xf32>
      %c1_213 = arith.constant 1 : index
      %c0_214 = arith.constant 0 : index
      %c0_215 = arith.constant 0 : index
      %435 = vector.load %arg6[%c1_213, %c0_214, %c0_215] : memref<4x48x16xf32, #tpu.memory_space<vmem>>, vector<1x48x16xf32>
      %436 = vector.shape_cast %435 : vector<1x48x16xf32> to vector<48x16xf32>
      %cst_216 = arith.constant dense<0.000000e+00> : vector<16x16xf32>
      %437 = tpu.matmul %434, %436, %cst_216 {dimension_numbers = #tpu.dot_dimension_numbers<[1], [0], [0], [1], [0, 0, 1, 1], [], []>} : vector<16x48xf32>, vector<48x16xf32>, vector<16x16xf32> -> vector<16x16xf32>
      %438 = arith.addf %430, %437 : vector<16x16xf32>
      %439 = math.tanh %438 : vector<16x16xf32>
      %440 = arith.mulf %429, %arg16 : vector<16x16xf32>
      %cst_217 = arith.constant 1.000000e+00 : f32
      %441 = vector.broadcast %cst_217 : f32 to vector<16x16xf32>
      %442 = arith.subf %441, %429 : vector<16x16xf32>
      %443 = arith.mulf %442, %439 : vector<16x16xf32>
      %444 = arith.addf %440, %443 : vector<16x16xf32>
      scf.yield %410, %444 : vector<16x16xf32>, vector<16x16xf32>
    }
    %c4_i32_49 = arith.constant 4 : i32
    %c0_50 = arith.constant 0 : index
    %c0_51 = arith.constant 0 : index
    %99 = vector.load %arg8[%c0_50, %c0_51] : memref<16x1xf32, #tpu.memory_space<vmem>>, vector<16x1xf32>
    %c0_52 = arith.constant 0 : index
    %c0_53 = arith.constant 0 : index
    %100 = vector.load %arg9[%c0_52, %c0_53] : memref<1x1xf32, #tpu.memory_space<vmem>>, vector<1x1xf32>
    %cst_54 = arith.constant 0.000000e+00 : f32
    %101 = vector.broadcast %cst_54 : f32 to vector<16x1xf32>
    %102 = tpu.iota {dimensions = array<i32: 1>} : vector<16x3xi32>
    %cst_55 = arith.constant 0.000000e+00 : f32
    %103 = vector.broadcast %cst_55 : f32 to vector<16x3xf32>
    %104 = tpu.iota {dimensions = array<i32: 1>} : vector<16x16xi32>
    %c1_i32_56 = arith.constant 1 : i32
    %105 = vector.broadcast %c1_i32_56 : i32 to vector<16x16xi32>
    %106 = arith.cmpi slt, %104, %105 : vector<16x16xi32>
    %107 = vector.shape_cast %101 : vector<16x1xf32> to vector<16x1xf32>
    %108 = vector.broadcast %107 : vector<16x1xf32> to vector<16x16xf32>
    %cst_57 = arith.constant 0.000000e+00 : f32
    %109 = vector.broadcast %cst_57 : f32 to vector<16x16xf32>
    %110 = arith.select %106, %108, %109 : vector<16x16xi1>, vector<16x16xf32>
    %111 = tpu.concatenate %110, %98#0 in 1 : vector<16x16xf32>, vector<16x16xf32> -> vector<16x32xf32>
    %cst_58 = arith.constant dense<0.000000e+00> : vector<16x32xf32>
    %112 = tpu.matmul %94, %111, %cst_58 {dimension_numbers = #tpu.dot_dimension_numbers<[1], [0], [0], [1], [0, 0, 1, 1], [], []>} : vector<16x16xf32>, vector<16x32xf32>, vector<16x32xf32> -> vector<16x32xf32>
    %cst_59 = arith.constant dense<0.000000e+00> : vector<16x32xf32>
    %113 = tpu.matmul %94, %112, %cst_59 {dimension_numbers = #tpu.dot_dimension_numbers<[1], [0], [0], [1], [0, 0, 1, 1], [], []>} : vector<16x16xf32>, vector<16x32xf32>, vector<16x32xf32> -> vector<16x32xf32>
    %114 = tpu.concatenate %111, %112, %113 in 1 : vector<16x32xf32>, vector<16x32xf32>, vector<16x32xf32> -> vector<16x96xf32>
    %c2_60 = arith.constant 2 : index
    %c0_61 = arith.constant 0 : index
    %c0_62 = arith.constant 0 : index
    %115 = vector.load %arg5[%c2_60, %c0_61, %c0_62] : memref<4x96x48xf32, #tpu.memory_space<vmem>>, vector<1x96x48xf32>
    %116 = vector.shape_cast %115 : vector<1x96x48xf32> to vector<96x48xf32>
    %cst_63 = arith.constant dense<0.000000e+00> : vector<16x48xf32>
    %117 = tpu.matmul %114, %116, %cst_63 {dimension_numbers = #tpu.dot_dimension_numbers<[1], [0], [0], [1], [0, 0, 1, 1], [], []>} : vector<16x96xf32>, vector<96x48xf32>, vector<16x48xf32> -> vector<16x48xf32>
    %c2_64 = arith.constant 2 : index
    %c0_65 = arith.constant 0 : index
    %c0_66 = arith.constant 0 : index
    %118 = vector.load %arg7[%c2_64, %c0_65, %c0_66] : memref<4x1x48xf32, #tpu.memory_space<vmem>>, vector<1x1x48xf32>
    %119 = vector.shape_cast %118 : vector<1x1x48xf32> to vector<1x48xf32>
    %120 = vector.broadcast %119 : vector<1x48xf32> to vector<16x48xf32>
    %121 = arith.addf %117, %120 : vector<16x48xf32>
    %122 = vector.extract_strided_slice %121 {offsets = [0, 0], sizes = [16, 32], strides = [1, 1]} : vector<16x48xf32> to vector<16x32xf32>
    %123 = arith.negf %122 : vector<16x32xf32>
    %124 = math.exp %123 : vector<16x32xf32>
    %cst_67 = arith.constant 1.000000e+00 : f32
    %125 = vector.broadcast %cst_67 : f32 to vector<16x32xf32>
    %126 = arith.addf %125, %124 : vector<16x32xf32>
    %127 = arith.divf %125, %126 : vector<16x32xf32>
    %128 = vector.extract_strided_slice %127 {offsets = [0, 0], sizes = [16, 16], strides = [1, 1]} : vector<16x32xf32> to vector<16x16xf32>
    %129 = vector.extract_strided_slice %127 {offsets = [0, 16], sizes = [16, 16], strides = [1, 1]} : vector<16x32xf32> to vector<16x16xf32>
    %130 = vector.extract_strided_slice %121 {offsets = [0, 32], sizes = [16, 16], strides = [1, 1]} : vector<16x48xf32> to vector<16x16xf32>
    %131 = arith.mulf %128, %98#0 : vector<16x16xf32>
    %cst_68 = arith.constant dense<0.000000e+00> : vector<16x16xf32>
    %132 = tpu.matmul %94, %131, %cst_68 {dimension_numbers = #tpu.dot_dimension_numbers<[1], [0], [0], [1], [0, 0, 1, 1], [], []>} : vector<16x16xf32>, vector<16x16xf32>, vector<16x16xf32> -> vector<16x16xf32>
    %cst_69 = arith.constant dense<0.000000e+00> : vector<16x16xf32>
    %133 = tpu.matmul %94, %132, %cst_69 {dimension_numbers = #tpu.dot_dimension_numbers<[1], [0], [0], [1], [0, 0, 1, 1], [], []>} : vector<16x16xf32>, vector<16x16xf32>, vector<16x16xf32> -> vector<16x16xf32>
    %134 = tpu.concatenate %131, %132, %133 in 1 : vector<16x16xf32>, vector<16x16xf32>, vector<16x16xf32> -> vector<16x48xf32>
    %c2_70 = arith.constant 2 : index
    %c0_71 = arith.constant 0 : index
    %c0_72 = arith.constant 0 : index
    %135 = vector.load %arg6[%c2_70, %c0_71, %c0_72] : memref<4x48x16xf32, #tpu.memory_space<vmem>>, vector<1x48x16xf32>
    %136 = vector.shape_cast %135 : vector<1x48x16xf32> to vector<48x16xf32>
    %cst_73 = arith.constant dense<0.000000e+00> : vector<16x16xf32>
    %137 = tpu.matmul %134, %136, %cst_73 {dimension_numbers = #tpu.dot_dimension_numbers<[1], [0], [0], [1], [0, 0, 1, 1], [], []>} : vector<16x48xf32>, vector<48x16xf32>, vector<16x16xf32> -> vector<16x16xf32>
    %138 = arith.addf %130, %137 : vector<16x16xf32>
    %139 = math.tanh %138 : vector<16x16xf32>
    %140 = arith.mulf %129, %98#0 : vector<16x16xf32>
    %cst_74 = arith.constant 1.000000e+00 : f32
    %141 = vector.broadcast %cst_74 : f32 to vector<16x16xf32>
    %142 = arith.subf %141, %129 : vector<16x16xf32>
    %143 = arith.mulf %142, %139 : vector<16x16xf32>
    %144 = arith.addf %140, %143 : vector<16x16xf32>
    %145 = tpu.concatenate %144, %98#1 in 1 : vector<16x16xf32>, vector<16x16xf32> -> vector<16x32xf32>
    %cst_75 = arith.constant dense<0.000000e+00> : vector<16x32xf32>
    %146 = tpu.matmul %94, %145, %cst_75 {dimension_numbers = #tpu.dot_dimension_numbers<[1], [0], [0], [1], [0, 0, 1, 1], [], []>} : vector<16x16xf32>, vector<16x32xf32>, vector<16x32xf32> -> vector<16x32xf32>
    %cst_76 = arith.constant dense<0.000000e+00> : vector<16x32xf32>
    %147 = tpu.matmul %94, %146, %cst_76 {dimension_numbers = #tpu.dot_dimension_numbers<[1], [0], [0], [1], [0, 0, 1, 1], [], []>} : vector<16x16xf32>, vector<16x32xf32>, vector<16x32xf32> -> vector<16x32xf32>
    %148 = tpu.concatenate %145, %146, %147 in 1 : vector<16x32xf32>, vector<16x32xf32>, vector<16x32xf32> -> vector<16x96xf32>
    %c3_77 = arith.constant 3 : index
    %c0_78 = arith.constant 0 : index
    %c0_79 = arith.constant 0 : index
    %149 = vector.load %arg5[%c3_77, %c0_78, %c0_79] : memref<4x96x48xf32, #tpu.memory_space<vmem>>, vector<1x96x48xf32>
    %150 = vector.shape_cast %149 : vector<1x96x48xf32> to vector<96x48xf32>
    %cst_80 = arith.constant dense<0.000000e+00> : vector<16x48xf32>
    %151 = tpu.matmul %148, %150, %cst_80 {dimension_numbers = #tpu.dot_dimension_numbers<[1], [0], [0], [1], [0, 0, 1, 1], [], []>} : vector<16x96xf32>, vector<96x48xf32>, vector<16x48xf32> -> vector<16x48xf32>
    %c3_81 = arith.constant 3 : index
    %c0_82 = arith.constant 0 : index
    %c0_83 = arith.constant 0 : index
    %152 = vector.load %arg7[%c3_81, %c0_82, %c0_83] : memref<4x1x48xf32, #tpu.memory_space<vmem>>, vector<1x1x48xf32>
    %153 = vector.shape_cast %152 : vector<1x1x48xf32> to vector<1x48xf32>
    %154 = vector.broadcast %153 : vector<1x48xf32> to vector<16x48xf32>
    %155 = arith.addf %151, %154 : vector<16x48xf32>
    %156 = vector.extract_strided_slice %155 {offsets = [0, 0], sizes = [16, 32], strides = [1, 1]} : vector<16x48xf32> to vector<16x32xf32>
    %157 = arith.negf %156 : vector<16x32xf32>
    %158 = math.exp %157 : vector<16x32xf32>
    %cst_84 = arith.constant 1.000000e+00 : f32
    %159 = vector.broadcast %cst_84 : f32 to vector<16x32xf32>
    %160 = arith.addf %159, %158 : vector<16x32xf32>
    %161 = arith.divf %159, %160 : vector<16x32xf32>
    %162 = vector.extract_strided_slice %161 {offsets = [0, 0], sizes = [16, 16], strides = [1, 1]} : vector<16x32xf32> to vector<16x16xf32>
    %163 = vector.extract_strided_slice %161 {offsets = [0, 16], sizes = [16, 16], strides = [1, 1]} : vector<16x32xf32> to vector<16x16xf32>
    %164 = vector.extract_strided_slice %155 {offsets = [0, 32], sizes = [16, 16], strides = [1, 1]} : vector<16x48xf32> to vector<16x16xf32>
    %165 = arith.mulf %162, %98#1 : vector<16x16xf32>
    %cst_85 = arith.constant dense<0.000000e+00> : vector<16x16xf32>
    %166 = tpu.matmul %94, %165, %cst_85 {dimension_numbers = #tpu.dot_dimension_numbers<[1], [0], [0], [1], [0, 0, 1, 1], [], []>} : vector<16x16xf32>, vector<16x16xf32>, vector<16x16xf32> -> vector<16x16xf32>
    %cst_86 = arith.constant dense<0.000000e+00> : vector<16x16xf32>
    %167 = tpu.matmul %94, %166, %cst_86 {dimension_numbers = #tpu.dot_dimension_numbers<[1], [0], [0], [1], [0, 0, 1, 1], [], []>} : vector<16x16xf32>, vector<16x16xf32>, vector<16x16xf32> -> vector<16x16xf32>
    %168 = tpu.concatenate %165, %166, %167 in 1 : vector<16x16xf32>, vector<16x16xf32>, vector<16x16xf32> -> vector<16x48xf32>
    %c3_87 = arith.constant 3 : index
    %c0_88 = arith.constant 0 : index
    %c0_89 = arith.constant 0 : index
    %169 = vector.load %arg6[%c3_87, %c0_88, %c0_89] : memref<4x48x16xf32, #tpu.memory_space<vmem>>, vector<1x48x16xf32>
    %170 = vector.shape_cast %169 : vector<1x48x16xf32> to vector<48x16xf32>
    %cst_90 = arith.constant dense<0.000000e+00> : vector<16x16xf32>
    %171 = tpu.matmul %168, %170, %cst_90 {dimension_numbers = #tpu.dot_dimension_numbers<[1], [0], [0], [1], [0, 0, 1, 1], [], []>} : vector<16x48xf32>, vector<48x16xf32>, vector<16x16xf32> -> vector<16x16xf32>
    %172 = arith.addf %164, %171 : vector<16x16xf32>
    %173 = math.tanh %172 : vector<16x16xf32>
    %174 = arith.mulf %163, %98#1 : vector<16x16xf32>
    %cst_91 = arith.constant 1.000000e+00 : f32
    %175 = vector.broadcast %cst_91 : f32 to vector<16x16xf32>
    %176 = arith.subf %175, %163 : vector<16x16xf32>
    %177 = arith.mulf %176, %173 : vector<16x16xf32>
    %178 = arith.addf %174, %177 : vector<16x16xf32>
    %cst_92 = arith.constant dense<0.000000e+00> : vector<16x1xf32>
    %179 = tpu.matmul %178, %99, %cst_92 {dimension_numbers = #tpu.dot_dimension_numbers<[1], [0], [0], [1], [0, 0, 1, 1], [], []>} : vector<16x16xf32>, vector<16x1xf32>, vector<16x1xf32> -> vector<16x1xf32>
    %180 = vector.broadcast %100 : vector<1x1xf32> to vector<16x1xf32>
    %181 = arith.addf %179, %180 : vector<16x1xf32>
    %c0_i32_93 = arith.constant 0 : i32
    %182 = vector.broadcast %c0_i32_93 : i32 to vector<16x3xi32>
    %183 = arith.cmpi eq, %102, %182 : vector<16x3xi32>
    %184 = vector.shape_cast %181 : vector<16x1xf32> to vector<16x1xf32>
    %185 = vector.broadcast %184 : vector<16x1xf32> to vector<16x3xf32>
    %186 = arith.select %183, %185, %103 : vector<16x3xi1>, vector<16x3xf32>
    %187 = tpu.iota {dimensions = array<i32: 1>} : vector<16x16xi32>
    %c1_i32_94 = arith.constant 1 : i32
    %188 = vector.broadcast %c1_i32_94 : i32 to vector<16x16xi32>
    %189 = arith.cmpi slt, %187, %188 : vector<16x16xi32>
    %190 = vector.shape_cast %181 : vector<16x1xf32> to vector<16x1xf32>
    %191 = vector.broadcast %190 : vector<16x1xf32> to vector<16x16xf32>
    %cst_95 = arith.constant 0.000000e+00 : f32
    %192 = vector.broadcast %cst_95 : f32 to vector<16x16xf32>
    %193 = arith.select %189, %191, %192 : vector<16x16xi1>, vector<16x16xf32>
    %194 = tpu.concatenate %193, %144 in 1 : vector<16x16xf32>, vector<16x16xf32> -> vector<16x32xf32>
    %cst_96 = arith.constant dense<0.000000e+00> : vector<16x32xf32>
    %195 = tpu.matmul %94, %194, %cst_96 {dimension_numbers = #tpu.dot_dimension_numbers<[1], [0], [0], [1], [0, 0, 1, 1], [], []>} : vector<16x16xf32>, vector<16x32xf32>, vector<16x32xf32> -> vector<16x32xf32>
    %cst_97 = arith.constant dense<0.000000e+00> : vector<16x32xf32>
    %196 = tpu.matmul %94, %195, %cst_97 {dimension_numbers = #tpu.dot_dimension_numbers<[1], [0], [0], [1], [0, 0, 1, 1], [], []>} : vector<16x16xf32>, vector<16x32xf32>, vector<16x32xf32> -> vector<16x32xf32>
    %197 = tpu.concatenate %194, %195, %196 in 1 : vector<16x32xf32>, vector<16x32xf32>, vector<16x32xf32> -> vector<16x96xf32>
    %c2_98 = arith.constant 2 : index
    %c0_99 = arith.constant 0 : index
    %c0_100 = arith.constant 0 : index
    %198 = vector.load %arg5[%c2_98, %c0_99, %c0_100] : memref<4x96x48xf32, #tpu.memory_space<vmem>>, vector<1x96x48xf32>
    %199 = vector.shape_cast %198 : vector<1x96x48xf32> to vector<96x48xf32>
    %cst_101 = arith.constant dense<0.000000e+00> : vector<16x48xf32>
    %200 = tpu.matmul %197, %199, %cst_101 {dimension_numbers = #tpu.dot_dimension_numbers<[1], [0], [0], [1], [0, 0, 1, 1], [], []>} : vector<16x96xf32>, vector<96x48xf32>, vector<16x48xf32> -> vector<16x48xf32>
    %c2_102 = arith.constant 2 : index
    %c0_103 = arith.constant 0 : index
    %c0_104 = arith.constant 0 : index
    %201 = vector.load %arg7[%c2_102, %c0_103, %c0_104] : memref<4x1x48xf32, #tpu.memory_space<vmem>>, vector<1x1x48xf32>
    %202 = vector.shape_cast %201 : vector<1x1x48xf32> to vector<1x48xf32>
    %203 = vector.broadcast %202 : vector<1x48xf32> to vector<16x48xf32>
    %204 = arith.addf %200, %203 : vector<16x48xf32>
    %205 = vector.extract_strided_slice %204 {offsets = [0, 0], sizes = [16, 32], strides = [1, 1]} : vector<16x48xf32> to vector<16x32xf32>
    %206 = arith.negf %205 : vector<16x32xf32>
    %207 = math.exp %206 : vector<16x32xf32>
    %cst_105 = arith.constant 1.000000e+00 : f32
    %208 = vector.broadcast %cst_105 : f32 to vector<16x32xf32>
    %209 = arith.addf %208, %207 : vector<16x32xf32>
    %210 = arith.divf %208, %209 : vector<16x32xf32>
    %211 = vector.extract_strided_slice %210 {offsets = [0, 0], sizes = [16, 16], strides = [1, 1]} : vector<16x32xf32> to vector<16x16xf32>
    %212 = vector.extract_strided_slice %210 {offsets = [0, 16], sizes = [16, 16], strides = [1, 1]} : vector<16x32xf32> to vector<16x16xf32>
    %213 = vector.extract_strided_slice %204 {offsets = [0, 32], sizes = [16, 16], strides = [1, 1]} : vector<16x48xf32> to vector<16x16xf32>
    %214 = arith.mulf %211, %144 : vector<16x16xf32>
    %cst_106 = arith.constant dense<0.000000e+00> : vector<16x16xf32>
    %215 = tpu.matmul %94, %214, %cst_106 {dimension_numbers = #tpu.dot_dimension_numbers<[1], [0], [0], [1], [0, 0, 1, 1], [], []>} : vector<16x16xf32>, vector<16x16xf32>, vector<16x16xf32> -> vector<16x16xf32>
    %cst_107 = arith.constant dense<0.000000e+00> : vector<16x16xf32>
    %216 = tpu.matmul %94, %215, %cst_107 {dimension_numbers = #tpu.dot_dimension_numbers<[1], [0], [0], [1], [0, 0, 1, 1], [], []>} : vector<16x16xf32>, vector<16x16xf32>, vector<16x16xf32> -> vector<16x16xf32>
    %217 = tpu.concatenate %214, %215, %216 in 1 : vector<16x16xf32>, vector<16x16xf32>, vector<16x16xf32> -> vector<16x48xf32>
    %c2_108 = arith.constant 2 : index
    %c0_109 = arith.constant 0 : index
    %c0_110 = arith.constant 0 : index
    %218 = vector.load %arg6[%c2_108, %c0_109, %c0_110] : memref<4x48x16xf32, #tpu.memory_space<vmem>>, vector<1x48x16xf32>
    %219 = vector.shape_cast %218 : vector<1x48x16xf32> to vector<48x16xf32>
    %cst_111 = arith.constant dense<0.000000e+00> : vector<16x16xf32>
    %220 = tpu.matmul %217, %219, %cst_111 {dimension_numbers = #tpu.dot_dimension_numbers<[1], [0], [0], [1], [0, 0, 1, 1], [], []>} : vector<16x48xf32>, vector<48x16xf32>, vector<16x16xf32> -> vector<16x16xf32>
    %221 = arith.addf %213, %220 : vector<16x16xf32>
    %222 = math.tanh %221 : vector<16x16xf32>
    %223 = arith.mulf %212, %144 : vector<16x16xf32>
    %cst_112 = arith.constant 1.000000e+00 : f32
    %224 = vector.broadcast %cst_112 : f32 to vector<16x16xf32>
    %225 = arith.subf %224, %212 : vector<16x16xf32>
    %226 = arith.mulf %225, %222 : vector<16x16xf32>
    %227 = arith.addf %223, %226 : vector<16x16xf32>
    %228 = tpu.concatenate %227, %178 in 1 : vector<16x16xf32>, vector<16x16xf32> -> vector<16x32xf32>
    %cst_113 = arith.constant dense<0.000000e+00> : vector<16x32xf32>
    %229 = tpu.matmul %94, %228, %cst_113 {dimension_numbers = #tpu.dot_dimension_numbers<[1], [0], [0], [1], [0, 0, 1, 1], [], []>} : vector<16x16xf32>, vector<16x32xf32>, vector<16x32xf32> -> vector<16x32xf32>
    %cst_114 = arith.constant dense<0.000000e+00> : vector<16x32xf32>
    %230 = tpu.matmul %94, %229, %cst_114 {dimension_numbers = #tpu.dot_dimension_numbers<[1], [0], [0], [1], [0, 0, 1, 1], [], []>} : vector<16x16xf32>, vector<16x32xf32>, vector<16x32xf32> -> vector<16x32xf32>
    %231 = tpu.concatenate %228, %229, %230 in 1 : vector<16x32xf32>, vector<16x32xf32>, vector<16x32xf32> -> vector<16x96xf32>
    %c3_115 = arith.constant 3 : index
    %c0_116 = arith.constant 0 : index
    %c0_117 = arith.constant 0 : index
    %232 = vector.load %arg5[%c3_115, %c0_116, %c0_117] : memref<4x96x48xf32, #tpu.memory_space<vmem>>, vector<1x96x48xf32>
    %233 = vector.shape_cast %232 : vector<1x96x48xf32> to vector<96x48xf32>
    %cst_118 = arith.constant dense<0.000000e+00> : vector<16x48xf32>
    %234 = tpu.matmul %231, %233, %cst_118 {dimension_numbers = #tpu.dot_dimension_numbers<[1], [0], [0], [1], [0, 0, 1, 1], [], []>} : vector<16x96xf32>, vector<96x48xf32>, vector<16x48xf32> -> vector<16x48xf32>
    %c3_119 = arith.constant 3 : index
    %c0_120 = arith.constant 0 : index
    %c0_121 = arith.constant 0 : index
    %235 = vector.load %arg7[%c3_119, %c0_120, %c0_121] : memref<4x1x48xf32, #tpu.memory_space<vmem>>, vector<1x1x48xf32>
    %236 = vector.shape_cast %235 : vector<1x1x48xf32> to vector<1x48xf32>
    %237 = vector.broadcast %236 : vector<1x48xf32> to vector<16x48xf32>
    %238 = arith.addf %234, %237 : vector<16x48xf32>
    %239 = vector.extract_strided_slice %238 {offsets = [0, 0], sizes = [16, 32], strides = [1, 1]} : vector<16x48xf32> to vector<16x32xf32>
    %240 = arith.negf %239 : vector<16x32xf32>
    %241 = math.exp %240 : vector<16x32xf32>
    %cst_122 = arith.constant 1.000000e+00 : f32
    %242 = vector.broadcast %cst_122 : f32 to vector<16x32xf32>
    %243 = arith.addf %242, %241 : vector<16x32xf32>
    %244 = arith.divf %242, %243 : vector<16x32xf32>
    %245 = vector.extract_strided_slice %244 {offsets = [0, 0], sizes = [16, 16], strides = [1, 1]} : vector<16x32xf32> to vector<16x16xf32>
    %246 = vector.extract_strided_slice %244 {offsets = [0, 16], sizes = [16, 16], strides = [1, 1]} : vector<16x32xf32> to vector<16x16xf32>
    %247 = vector.extract_strided_slice %238 {offsets = [0, 32], sizes = [16, 16], strides = [1, 1]} : vector<16x48xf32> to vector<16x16xf32>
    %248 = arith.mulf %245, %178 : vector<16x16xf32>
    %cst_123 = arith.constant dense<0.000000e+00> : vector<16x16xf32>
    %249 = tpu.matmul %94, %248, %cst_123 {dimension_numbers = #tpu.dot_dimension_numbers<[1], [0], [0], [1], [0, 0, 1, 1], [], []>} : vector<16x16xf32>, vector<16x16xf32>, vector<16x16xf32> -> vector<16x16xf32>
    %cst_124 = arith.constant dense<0.000000e+00> : vector<16x16xf32>
    %250 = tpu.matmul %94, %249, %cst_124 {dimension_numbers = #tpu.dot_dimension_numbers<[1], [0], [0], [1], [0, 0, 1, 1], [], []>} : vector<16x16xf32>, vector<16x16xf32>, vector<16x16xf32> -> vector<16x16xf32>
    %251 = tpu.concatenate %248, %249, %250 in 1 : vector<16x16xf32>, vector<16x16xf32>, vector<16x16xf32> -> vector<16x48xf32>
    %c3_125 = arith.constant 3 : index
    %c0_126 = arith.constant 0 : index
    %c0_127 = arith.constant 0 : index
    %252 = vector.load %arg6[%c3_125, %c0_126, %c0_127] : memref<4x48x16xf32, #tpu.memory_space<vmem>>, vector<1x48x16xf32>
    %253 = vector.shape_cast %252 : vector<1x48x16xf32> to vector<48x16xf32>
    %cst_128 = arith.constant dense<0.000000e+00> : vector<16x16xf32>
    %254 = tpu.matmul %251, %253, %cst_128 {dimension_numbers = #tpu.dot_dimension_numbers<[1], [0], [0], [1], [0, 0, 1, 1], [], []>} : vector<16x48xf32>, vector<48x16xf32>, vector<16x16xf32> -> vector<16x16xf32>
    %255 = arith.addf %247, %254 : vector<16x16xf32>
    %256 = math.tanh %255 : vector<16x16xf32>
    %257 = arith.mulf %246, %178 : vector<16x16xf32>
    %cst_129 = arith.constant 1.000000e+00 : f32
    %258 = vector.broadcast %cst_129 : f32 to vector<16x16xf32>
    %259 = arith.subf %258, %246 : vector<16x16xf32>
    %260 = arith.mulf %259, %256 : vector<16x16xf32>
    %261 = arith.addf %257, %260 : vector<16x16xf32>
    %cst_130 = arith.constant dense<0.000000e+00> : vector<16x1xf32>
    %262 = tpu.matmul %261, %99, %cst_130 {dimension_numbers = #tpu.dot_dimension_numbers<[1], [0], [0], [1], [0, 0, 1, 1], [], []>} : vector<16x16xf32>, vector<16x1xf32>, vector<16x1xf32> -> vector<16x1xf32>
    %263 = vector.broadcast %100 : vector<1x1xf32> to vector<16x1xf32>
    %264 = arith.addf %262, %263 : vector<16x1xf32>
    %c1_i32_131 = arith.constant 1 : i32
    %265 = vector.broadcast %c1_i32_131 : i32 to vector<16x3xi32>
    %266 = arith.cmpi eq, %102, %265 : vector<16x3xi32>
    %267 = vector.shape_cast %264 : vector<16x1xf32> to vector<16x1xf32>
    %268 = vector.broadcast %267 : vector<16x1xf32> to vector<16x3xf32>
    %269 = arith.select %266, %268, %186 : vector<16x3xi1>, vector<16x3xf32>
    %270 = tpu.iota {dimensions = array<i32: 1>} : vector<16x16xi32>
    %c1_i32_132 = arith.constant 1 : i32
    %271 = vector.broadcast %c1_i32_132 : i32 to vector<16x16xi32>
    %272 = arith.cmpi slt, %270, %271 : vector<16x16xi32>
    %273 = vector.shape_cast %264 : vector<16x1xf32> to vector<16x1xf32>
    %274 = vector.broadcast %273 : vector<16x1xf32> to vector<16x16xf32>
    %cst_133 = arith.constant 0.000000e+00 : f32
    %275 = vector.broadcast %cst_133 : f32 to vector<16x16xf32>
    %276 = arith.select %272, %274, %275 : vector<16x16xi1>, vector<16x16xf32>
    %277 = tpu.concatenate %276, %227 in 1 : vector<16x16xf32>, vector<16x16xf32> -> vector<16x32xf32>
    %cst_134 = arith.constant dense<0.000000e+00> : vector<16x32xf32>
    %278 = tpu.matmul %94, %277, %cst_134 {dimension_numbers = #tpu.dot_dimension_numbers<[1], [0], [0], [1], [0, 0, 1, 1], [], []>} : vector<16x16xf32>, vector<16x32xf32>, vector<16x32xf32> -> vector<16x32xf32>
    %cst_135 = arith.constant dense<0.000000e+00> : vector<16x32xf32>
    %279 = tpu.matmul %94, %278, %cst_135 {dimension_numbers = #tpu.dot_dimension_numbers<[1], [0], [0], [1], [0, 0, 1, 1], [], []>} : vector<16x16xf32>, vector<16x32xf32>, vector<16x32xf32> -> vector<16x32xf32>
    %280 = tpu.concatenate %277, %278, %279 in 1 : vector<16x32xf32>, vector<16x32xf32>, vector<16x32xf32> -> vector<16x96xf32>
    %c2_136 = arith.constant 2 : index
    %c0_137 = arith.constant 0 : index
    %c0_138 = arith.constant 0 : index
    %281 = vector.load %arg5[%c2_136, %c0_137, %c0_138] : memref<4x96x48xf32, #tpu.memory_space<vmem>>, vector<1x96x48xf32>
    %282 = vector.shape_cast %281 : vector<1x96x48xf32> to vector<96x48xf32>
    %cst_139 = arith.constant dense<0.000000e+00> : vector<16x48xf32>
    %283 = tpu.matmul %280, %282, %cst_139 {dimension_numbers = #tpu.dot_dimension_numbers<[1], [0], [0], [1], [0, 0, 1, 1], [], []>} : vector<16x96xf32>, vector<96x48xf32>, vector<16x48xf32> -> vector<16x48xf32>
    %c2_140 = arith.constant 2 : index
    %c0_141 = arith.constant 0 : index
    %c0_142 = arith.constant 0 : index
    %284 = vector.load %arg7[%c2_140, %c0_141, %c0_142] : memref<4x1x48xf32, #tpu.memory_space<vmem>>, vector<1x1x48xf32>
    %285 = vector.shape_cast %284 : vector<1x1x48xf32> to vector<1x48xf32>
    %286 = vector.broadcast %285 : vector<1x48xf32> to vector<16x48xf32>
    %287 = arith.addf %283, %286 : vector<16x48xf32>
    %288 = vector.extract_strided_slice %287 {offsets = [0, 0], sizes = [16, 32], strides = [1, 1]} : vector<16x48xf32> to vector<16x32xf32>
    %289 = arith.negf %288 : vector<16x32xf32>
    %290 = math.exp %289 : vector<16x32xf32>
    %cst_143 = arith.constant 1.000000e+00 : f32
    %291 = vector.broadcast %cst_143 : f32 to vector<16x32xf32>
    %292 = arith.addf %291, %290 : vector<16x32xf32>
    %293 = arith.divf %291, %292 : vector<16x32xf32>
    %294 = vector.extract_strided_slice %293 {offsets = [0, 0], sizes = [16, 16], strides = [1, 1]} : vector<16x32xf32> to vector<16x16xf32>
    %295 = vector.extract_strided_slice %293 {offsets = [0, 16], sizes = [16, 16], strides = [1, 1]} : vector<16x32xf32> to vector<16x16xf32>
    %296 = vector.extract_strided_slice %287 {offsets = [0, 32], sizes = [16, 16], strides = [1, 1]} : vector<16x48xf32> to vector<16x16xf32>
    %297 = arith.mulf %294, %227 : vector<16x16xf32>
    %cst_144 = arith.constant dense<0.000000e+00> : vector<16x16xf32>
    %298 = tpu.matmul %94, %297, %cst_144 {dimension_numbers = #tpu.dot_dimension_numbers<[1], [0], [0], [1], [0, 0, 1, 1], [], []>} : vector<16x16xf32>, vector<16x16xf32>, vector<16x16xf32> -> vector<16x16xf32>
    %cst_145 = arith.constant dense<0.000000e+00> : vector<16x16xf32>
    %299 = tpu.matmul %94, %298, %cst_145 {dimension_numbers = #tpu.dot_dimension_numbers<[1], [0], [0], [1], [0, 0, 1, 1], [], []>} : vector<16x16xf32>, vector<16x16xf32>, vector<16x16xf32> -> vector<16x16xf32>
    %300 = tpu.concatenate %297, %298, %299 in 1 : vector<16x16xf32>, vector<16x16xf32>, vector<16x16xf32> -> vector<16x48xf32>
    %c2_146 = arith.constant 2 : index
    %c0_147 = arith.constant 0 : index
    %c0_148 = arith.constant 0 : index
    %301 = vector.load %arg6[%c2_146, %c0_147, %c0_148] : memref<4x48x16xf32, #tpu.memory_space<vmem>>, vector<1x48x16xf32>
    %302 = vector.shape_cast %301 : vector<1x48x16xf32> to vector<48x16xf32>
    %cst_149 = arith.constant dense<0.000000e+00> : vector<16x16xf32>
    %303 = tpu.matmul %300, %302, %cst_149 {dimension_numbers = #tpu.dot_dimension_numbers<[1], [0], [0], [1], [0, 0, 1, 1], [], []>} : vector<16x48xf32>, vector<48x16xf32>, vector<16x16xf32> -> vector<16x16xf32>
    %304 = arith.addf %296, %303 : vector<16x16xf32>
    %305 = math.tanh %304 : vector<16x16xf32>
    %306 = arith.mulf %295, %227 : vector<16x16xf32>
    %cst_150 = arith.constant 1.000000e+00 : f32
    %307 = vector.broadcast %cst_150 : f32 to vector<16x16xf32>
    %308 = arith.subf %307, %295 : vector<16x16xf32>
    %309 = arith.mulf %308, %305 : vector<16x16xf32>
    %310 = arith.addf %306, %309 : vector<16x16xf32>
    %311 = tpu.concatenate %310, %261 in 1 : vector<16x16xf32>, vector<16x16xf32> -> vector<16x32xf32>
    %cst_151 = arith.constant dense<0.000000e+00> : vector<16x32xf32>
    %312 = tpu.matmul %94, %311, %cst_151 {dimension_numbers = #tpu.dot_dimension_numbers<[1], [0], [0], [1], [0, 0, 1, 1], [], []>} : vector<16x16xf32>, vector<16x32xf32>, vector<16x32xf32> -> vector<16x32xf32>
    %cst_152 = arith.constant dense<0.000000e+00> : vector<16x32xf32>
    %313 = tpu.matmul %94, %312, %cst_152 {dimension_numbers = #tpu.dot_dimension_numbers<[1], [0], [0], [1], [0, 0, 1, 1], [], []>} : vector<16x16xf32>, vector<16x32xf32>, vector<16x32xf32> -> vector<16x32xf32>
    %314 = tpu.concatenate %311, %312, %313 in 1 : vector<16x32xf32>, vector<16x32xf32>, vector<16x32xf32> -> vector<16x96xf32>
    %c3_153 = arith.constant 3 : index
    %c0_154 = arith.constant 0 : index
    %c0_155 = arith.constant 0 : index
    %315 = vector.load %arg5[%c3_153, %c0_154, %c0_155] : memref<4x96x48xf32, #tpu.memory_space<vmem>>, vector<1x96x48xf32>
    %316 = vector.shape_cast %315 : vector<1x96x48xf32> to vector<96x48xf32>
    %cst_156 = arith.constant dense<0.000000e+00> : vector<16x48xf32>
    %317 = tpu.matmul %314, %316, %cst_156 {dimension_numbers = #tpu.dot_dimension_numbers<[1], [0], [0], [1], [0, 0, 1, 1], [], []>} : vector<16x96xf32>, vector<96x48xf32>, vector<16x48xf32> -> vector<16x48xf32>
    %c3_157 = arith.constant 3 : index
    %c0_158 = arith.constant 0 : index
    %c0_159 = arith.constant 0 : index
    %318 = vector.load %arg7[%c3_157, %c0_158, %c0_159] : memref<4x1x48xf32, #tpu.memory_space<vmem>>, vector<1x1x48xf32>
    %319 = vector.shape_cast %318 : vector<1x1x48xf32> to vector<1x48xf32>
    %320 = vector.broadcast %319 : vector<1x48xf32> to vector<16x48xf32>
    %321 = arith.addf %317, %320 : vector<16x48xf32>
    %322 = vector.extract_strided_slice %321 {offsets = [0, 0], sizes = [16, 32], strides = [1, 1]} : vector<16x48xf32> to vector<16x32xf32>
    %323 = arith.negf %322 : vector<16x32xf32>
    %324 = math.exp %323 : vector<16x32xf32>
    %cst_160 = arith.constant 1.000000e+00 : f32
    %325 = vector.broadcast %cst_160 : f32 to vector<16x32xf32>
    %326 = arith.addf %325, %324 : vector<16x32xf32>
    %327 = arith.divf %325, %326 : vector<16x32xf32>
    %328 = vector.extract_strided_slice %327 {offsets = [0, 0], sizes = [16, 16], strides = [1, 1]} : vector<16x32xf32> to vector<16x16xf32>
    %329 = vector.extract_strided_slice %327 {offsets = [0, 16], sizes = [16, 16], strides = [1, 1]} : vector<16x32xf32> to vector<16x16xf32>
    %330 = vector.extract_strided_slice %321 {offsets = [0, 32], sizes = [16, 16], strides = [1, 1]} : vector<16x48xf32> to vector<16x16xf32>
    %331 = arith.mulf %328, %261 : vector<16x16xf32>
    %cst_161 = arith.constant dense<0.000000e+00> : vector<16x16xf32>
    %332 = tpu.matmul %94, %331, %cst_161 {dimension_numbers = #tpu.dot_dimension_numbers<[1], [0], [0], [1], [0, 0, 1, 1], [], []>} : vector<16x16xf32>, vector<16x16xf32>, vector<16x16xf32> -> vector<16x16xf32>
    %cst_162 = arith.constant dense<0.000000e+00> : vector<16x16xf32>
    %333 = tpu.matmul %94, %332, %cst_162 {dimension_numbers = #tpu.dot_dimension_numbers<[1], [0], [0], [1], [0, 0, 1, 1], [], []>} : vector<16x16xf32>, vector<16x16xf32>, vector<16x16xf32> -> vector<16x16xf32>
    %334 = tpu.concatenate %331, %332, %333 in 1 : vector<16x16xf32>, vector<16x16xf32>, vector<16x16xf32> -> vector<16x48xf32>
    %c3_163 = arith.constant 3 : index
    %c0_164 = arith.constant 0 : index
    %c0_165 = arith.constant 0 : index
    %335 = vector.load %arg6[%c3_163, %c0_164, %c0_165] : memref<4x48x16xf32, #tpu.memory_space<vmem>>, vector<1x48x16xf32>
    %336 = vector.shape_cast %335 : vector<1x48x16xf32> to vector<48x16xf32>
    %cst_166 = arith.constant dense<0.000000e+00> : vector<16x16xf32>
    %337 = tpu.matmul %334, %336, %cst_166 {dimension_numbers = #tpu.dot_dimension_numbers<[1], [0], [0], [1], [0, 0, 1, 1], [], []>} : vector<16x48xf32>, vector<48x16xf32>, vector<16x16xf32> -> vector<16x16xf32>
    %338 = arith.addf %330, %337 : vector<16x16xf32>
    %339 = math.tanh %338 : vector<16x16xf32>
    %340 = arith.mulf %329, %261 : vector<16x16xf32>
    %cst_167 = arith.constant 1.000000e+00 : f32
    %341 = vector.broadcast %cst_167 : f32 to vector<16x16xf32>
    %342 = arith.subf %341, %329 : vector<16x16xf32>
    %343 = arith.mulf %342, %339 : vector<16x16xf32>
    %344 = arith.addf %340, %343 : vector<16x16xf32>
    %cst_168 = arith.constant dense<0.000000e+00> : vector<16x1xf32>
    %345 = tpu.matmul %344, %99, %cst_168 {dimension_numbers = #tpu.dot_dimension_numbers<[1], [0], [0], [1], [0, 0, 1, 1], [], []>} : vector<16x16xf32>, vector<16x1xf32>, vector<16x1xf32> -> vector<16x1xf32>
    %346 = vector.broadcast %100 : vector<1x1xf32> to vector<16x1xf32>
    %347 = arith.addf %345, %346 : vector<16x1xf32>
    %c2_i32 = arith.constant 2 : i32
    %348 = vector.broadcast %c2_i32 : i32 to vector<16x3xi32>
    %349 = arith.cmpi eq, %102, %348 : vector<16x3xi32>
    %350 = vector.shape_cast %347 : vector<16x1xf32> to vector<16x1xf32>
    %351 = vector.broadcast %350 : vector<16x1xf32> to vector<16x3xf32>
    %352 = arith.select %349, %351, %269 : vector<16x3xi1>, vector<16x3xf32>
    %c0_169 = arith.constant 0 : index
    %c0_170 = arith.constant 0 : index
    %353 = vector.load %arg2[%c0_169, %c0_170] : memref<16x4xf32, #tpu.memory_space<vmem>>, vector<16x4xf32>
    %c0_171 = arith.constant 0 : index
    %c0_172 = arith.constant 0 : index
    %354 = vector.load %arg10[%c0_171, %c0_172] : memref<4x3xf32, #tpu.memory_space<vmem>>, vector<4x3xf32>
    %cst_173 = arith.constant dense<0.000000e+00> : vector<16x3xf32>
    %355 = tpu.matmul %353, %354, %cst_173 {dimension_numbers = #tpu.dot_dimension_numbers<[1], [0], [0], [1], [0, 0, 1, 1], [], []>} : vector<16x4xf32>, vector<4x3xf32>, vector<16x3xf32> -> vector<16x3xf32>
    %c0_174 = arith.constant 0 : index
    %c0_175 = arith.constant 0 : index
    %356 = vector.load %arg11[%c0_174, %c0_175] : memref<1x3xf32, #tpu.memory_space<vmem>>, vector<1x3xf32>
    %357 = vector.broadcast %356 : vector<1x3xf32> to vector<16x3xf32>
    %358 = arith.addf %355, %357 : vector<16x3xf32>
    %359 = vector.broadcast %1 : f32 to vector<16x3xf32>
    %360 = arith.mulf %359, %358 : vector<16x3xf32>
    %361 = arith.addf %352, %360 : vector<16x3xf32>
    %cst_176 = arith.constant 1.000000e+00 : f32
    %362 = arith.addf %cst_176, %1 : f32
    %cst_177 = arith.constant 1.000000e+00 : f32
    %363 = arith.divf %cst_177, %362 : f32
    %364 = vector.broadcast %363 : f32 to vector<16x3xf32>
    %365 = arith.mulf %361, %364 : vector<16x3xf32>
    %c0_178 = arith.constant 0 : index
    %c0_179 = arith.constant 0 : index
    %366 = vector.load %arg12[%c0_178, %c0_179] : memref<16x3xf32, #tpu.memory_space<vmem>>, vector<16x3xf32>
    tpu.vector_store %arg12[%c0_178, %c0_179], %365 {strides = array<i32>} : memref<16x3xf32, #tpu.memory_space<vmem>>, vector<16x3xf32>,
    return
  }
}

</mosaic_0001>

<bundles_post_ra>
// kernel: crfnet_forward.1
= control target key start
LH: loop header
LB: loop body
LE: loop exit
PB: predicated region body
PF: predicated region fallthrough
CT: control target
= control target key end

     0   :  { %s4762_s0 = inlined_call_operand.vmem [shape: f32[4], index: 0, kind: input, shape index: {}]   ;;  %s4763_s1 = inlined_call_operand.vmem [shape: f32[4,16,1], index: 1, kind: input, shape index: {}]   ;;  %s4764_s2 = inlined_call_operand.vmem [shape: f32[16,4], index: 2, kind: input, shape index: {}]   ;;  %s4765_s3 = inlined_call_operand.vmem [shape: f32[4,8,8], index: 3, kind: input, shape index: {}]   ;;  %s4766_s4 = inlined_call_operand.vmem [shape: f32[4,8,8], index: 4, kind: input, shape index: {}]   ;;  %s4767_s5 = inlined_call_operand.vmem [shape: f32[4,96,48], index: 5, kind: input, shape index: {}]   ;;  %s4768_s6 = inlined_call_operand.vmem [shape: f32[4,48,16], index: 6, kind: input, shape index: {}]   ;;  %s4769_s7 = inlined_call_operand.vmem [shape: f32[4,1,48], index: 7, kind: input, shape index: {}]   ;;  %s4770_s8 = inlined_call_operand.vmem [shape: f32[16,1], index: 8, kind: input, shape index: {}]   ;;  %s4771_s9 = inlined_call_operand.<no memory space> [shape: f32[1,1], index: 9, kind: input, shape index: {}]   ;;  %s4772_s10 = inlined_call_operand.vmem [shape: f32[4,3], index: 10, kind: input, shape index: {}]   ;;  %s4773_s11 = inlined_call_operand.vmem [shape: f32[1,3], index: 11, kind: input, shape index: {}]   ;;  %s4774_s12 = inlined_call_operand.vmem [shape: f32[16,3], index: 12, kind: output, shape index: {0}]   ;;  %s4775_s13 = inlined_call_operand.hbm [shape: f32[8,8], index: 13, kind: output, shape index: {1}]  }
   0x1   :  { %v19_v0 = vstv %s4771_s9 }
   0x2   :  { %20 = vst [vmem:[#allocation2] sm:$0x1] %v19_v0 }
   0x3   :  { %21 = vsyncpa [#allocation5], 0 }
   0x4   :  { %22 = vsyncpa [#allocation4], 0  ;;  %s28_s29 = sshll.u32 %s4762_s0, 4  ;;  %s3358_s30 = smov [#allocation3]   ;;  %s29_s29 = int_to_ptr.vmem [resolvable:$true] %s28_s29 }
   0x5   :  { %31 = dma.vmem_to_smem %s29_s29, 16, %s3358_s30, [#allocation5]  }
   0x6   :  { %3334 = dma.done.wait [#allocation5], 16  }
   0x7   :  { %3335 = vsyncadd [#allocation5], 4294967280 }
   0x8   :  { %58 = sfence }
   0x9   :  { %v2864_v1 = vld [vmem:[%s4766_s4 + $0x8] sm:$0xff]  ;;  %v2867_v2 = vld [vmem:[%s4766_s4 + $0x18] sm:$0xff]  ;;  %vm63_vm0 = vcmask 64512   ;;  %s3456_s0 = sld [smem:[#allocation3 + $0x1]]  ;;  %v62_v5 = vld [vmem:[%s4766_s4] sm:$0xff]  ;;  %s3359_s30 = smov 8  }
   0xa   :  { %v2863_v3 = vld [vmem:[%s4765_s3 + $0x8] sm:$0xff]  ;;  %206 = vmatpush.msra.mxu2 %v2864_v1  ;;  %258 = vmatpush.msra.mxu3 %v2867_v2  ;;  %v2866_v4 = vld [vmem:[%s4765_s3 + $0x18] sm:$0xff]  ;;  %v2861_v6 = vld [vmem:[%s4766_s4 + $0x10] sm:$0xff]  ;;  %s2869_s29 = sld [smem:[#allocation3 + $0x3]]  ;;  %s3561_s14 = smov 0  }
   0xb   :  { %2865 = vmatmul.msk.f32.vlgmr.msra.gmra.mxu2 %vm63_vm0, %v2863_v3  ;;  %2868 = vmatmul.msk.f32.vlgmr.msra.gmra.mxu3 %vm63_vm0, %v2866_v4  ;;  %v61_v7 = vld [vmem:[%s4765_s3] sm:$0xff]  ;;  %v2860_v8 = vld [vmem:[%s4765_s3 + $0x10] sm:$0xff]  ;;  %s3497_s3 = sld [smem:[#allocation3]] }
   0xc   :  { %82 = vmatpush.msra.mxu0 %v62_v5  ;;  %134 = vmatpush.msra.mxu1 %v2861_v6 }
   0xd   :  { %2859 = vmatmul.msk.f32.vlgmr.msra.gmra.mxu0 %vm63_vm0, %v61_v7  ;;  %2862 = vmatmul.msk.f32.vlgmr.msra.gmra.mxu1 %vm63_vm0, %v2860_v8 }
  0x11   :  { %s167_s4 = sadd.f32 1.0, %s3497_s3  ;;  %v164_v57 = vstv %s3497_s3 }
  0x13   :  { %v3500_v41 = vstv %s167_s4 }
  0x14   :  { %v180_v60 = vand.u32 2147483648, %v3500_v41  ;;  %vm174_vm4 = vweird.f32 %v3500_v41  ;;  %v178_v8 = vand.u32 2147483647, %v3500_v41 }
  0x16   :  { %vm179_vm15 = vcmp.eq.f32.partialorder %v178_v8, 8.507059e+37 }
  0x8a   :  { %v84_v13 = vpop.f32.mrf.mxu0  ;;  %v136_v14 = vpop.f32.mrf.mxu1 }
  0x8b   :  { %v87_v17 = vmax.f32 %v84_v13, 0.0  ;;  %v139_v18 = vmax.f32 %v136_v14, 0.0 }
  0x8d   :  { %v140_v19 = vsel %vm63_vm0, %v139_v18, -inf  ;;  %v88_v20 = vsel %vm63_vm0, %v87_v17, -inf }
  0x8e   :  { %v208_v9 = vpop.f32.mrf.mxu2  ;;  %v260_v10 = vpop.f32.mrf.mxu3 }
  0x8f   :  { %v211_v11 = vmax.f32 %v208_v9, 0.0  ;;  %v263_v12 = vmax.f32 %v260_v10, 0.0 }
  0x91   :  { %v264_v15 = vsel %vm63_vm0, %v263_v12, -inf  ;;  %v212_v16 = vsel %vm63_vm0, %v211_v11, -inf }
  0x92   :  { %265 = vmax.xlane.f32.xlu0 %v264_v15  ;;  %213 = vmax.xlane.f32.xlu1 %v212_v16  ;;  %v181_v16 = vor.u32 1.1754944e-38, %v180_v60 }
  0x9a   :  { %141 = vmax.xlane.f32.xlu0 %v140_v19  ;;  %89 = vmax.xlane.f32.xlu1 %v88_v20 }
 0x105   :  { %v266_v21 = vpop.xlane.xlu0 %265  ;;  %v214_v22 = vpop.xlane.xlu1 %213 }
 0x106   :  { %v267_v23 = vsub.f32 %v263_v12, %v266_v21  ;;  %v215_v24 = vsub.f32 %v211_v11, %v214_v22 }
 0x108   :  { %v268_v25 = vmul.f32 1.442695, %v267_v23  ;;  %v216_v26 = vmul.f32 1.442695, %v215_v24 }
 0x10a   :  { %3112 = vpow2.f32 %v268_v25 }
 0x10b   :  { %3114 = vpow2.f32 %v216_v26 }
 0x10d   :  { %v142_v27 = vpop.xlane.xlu0 %141  ;;  %v90_v28 = vpop.xlane.xlu1 %89 }
 0x10e   :  { %v143_v29 = vsub.f32 %v139_v18, %v142_v27  ;;  %v91_v30 = vsub.f32 %v87_v17, %v90_v28 }
 0x110   :  { %v3481_v31 = vpop.eup %3112  ;;  %v144_v32 = vmul.f32 1.442695, %v143_v29  ;;  %v92_v33 = vmul.f32 1.442695, %v91_v30 }
 0x111   :  { %v3483_v34 = vpop.eup %3114  ;;  %v270_v35 = vsel %vm63_vm0, %v3481_v31, 0.0 }
 0x112   :  { %3116 = vpow2.f32 %v144_v32  ;;  %271 = vadd.xlane.f32.xlu2 %v270_v35  ;;  %v218_v36 = vsel %vm63_vm0, %v3483_v34, 0.0 }
 0x113   :  { %3118 = vpow2.f32 %v92_v33  ;;  %219 = vadd.xlane.f32.xlu0 %v218_v36 }
 0x114   :  { %3120 = vrcp.f32 %v3500_v41 }
 0x118   :  { %v3489_v37 = vpop.eup %3116 }
 0x119   :  { %v3491_v38 = vpop.eup %3118  ;;  %v146_v39 = vsel %vm63_vm0, %v3489_v37, 0.0 }
 0x11a   :  { %147 = vadd.xlane.f32.xlu2 %v146_v39  ;;  %v94_v40 = vsel %vm63_vm0, %v3491_v38, 0.0  ;;  %v3503_v42 = vpop.eup %3120 }
 0x11b   :  { %95 = vadd.xlane.f32.xlu1 %v94_v40  ;;  %v170_v45 = vmul.f32 %v3503_v42, %v3500_v41  ;;  %vm175_vm7 = vweird.f32 %v3503_v42 }
 0x11c   :  { %vm3526_vm11 = vmor %vm174_vm4, %vm175_vm7 }
 0x11d   :  { %v171_v46 = vsub.f32 1.0, %v170_v45 }
 0x11f   :  { %v172_v53 = vmul.f32 %v3503_v42, %v171_v46 }
 0x121   :  { %v173_v63 = vadd.f32 %v3503_v42, %v172_v53  ;;  %v3559_v53 = vmov 0.0  }
 0x123   :  { %v177_v26 = vsel %vm3526_vm11, %v3503_v42, %v173_v63 }
 0x124   :  { %v182_v39 = vsel %vm179_vm15, %v181_v16, %v177_v26 }
 0x185   :  { %v272_v43 = vpop.xlane.xlu2 %271 }
 0x186   :  { %3122 = vrcp.f32 %v272_v43  ;;  %v220_v44 = vpop.xlane.xlu0 %219  ;;  %v284_v55 = vand.u32 2147483648, %v272_v43  ;;  %v282_v59 = vand.u32 2147483647, %v272_v43  ;;  %vm278_vm3 = vweird.f32 %v272_v43 }
 0x187   :  { %3124 = vrcp.f32 %v220_v44  ;;  %v232_v62 = vand.u32 2147483648, %v220_v44  ;;  %v230_v1 = vand.u32 2147483647, %v220_v44  ;;  %vm226_vm6 = vweird.f32 %v220_v44 }
 0x188   :  { %v285_v3 = vor.u32 1.1754944e-38, %v284_v55  ;;  %vm283_vm8 = vcmp.eq.f32.partialorder %v282_v59, 8.507059e+37 }
 0x189   :  { %v233_v11 = vor.u32 1.1754944e-38, %v232_v62  ;;  %vm231_vm10 = vcmp.eq.f32.partialorder %v230_v1, 8.507059e+37 }
 0x18c   :  { %v3123_v47 = vpop.eup %3122 }
 0x18d   :  { %v3125_v48 = vpop.eup %3124  ;;  %v274_v49 = vmul.f32 %v3123_v47, %v272_v43  ;;  %v3507_v50 = vpop.xlane.xlu2 %147  ;;  %vm279_vm1 = vweird.f32 %v3123_v47 }
 0x18e   :  { %v222_v51 = vmul.f32 %v3125_v48, %v220_v44  ;;  %3126 = vrcp.f32 %v3507_v50  ;;  %v3510_v52 = vpop.xlane.xlu1 %95  ;;  %vm227_vm2 = vweird.f32 %v3125_v48  ;;  %vm280_vm5 = vmor %vm278_vm3, %vm279_vm1  ;;  %v158_v18 = vand.u32 2147483647, %v3507_v50 }
 0x18f   :  { %v275_v54 = vsub.f32 1.0, %v274_v49  ;;  %3128 = vrcp.f32 %v3510_v52  ;;  %vm228_vm9 = vmor %vm226_vm6, %vm227_vm2  ;;  %v160_v19 = vand.u32 2147483648, %v3507_v50  ;;  %v108_v22 = vand.u32 2147483648, %v3510_v52 }
 0x190   :  { %v223_v56 = vsub.f32 1.0, %v222_v51  ;;  %v106_v25 = vand.u32 2147483647, %v3510_v52  ;;  %vm154_vm14 = vweird.f32 %v3507_v50  ;;  %vm102_vm2 = vweird.f32 %v3510_v52 }
 0x191   :  { %v276_v58 = vmul.f32 %v3123_v47, %v275_v54  ;;  %v161_v29 = vor.u32 1.1754944e-38, %v160_v19  ;;  %vm159_vm3 = vcmp.eq.f32.partialorder %v158_v18, 8.507059e+37  ;;  %v109_v32 = vor.u32 1.1754944e-38, %v108_v22 }
 0x192   :  { %v224_v61 = vmul.f32 %v3125_v48, %v223_v56  ;;  %v292_v44 = vstv %s2869_s29  ;;  %v3555_v51 = vmov 0.0  }
 0x193   :  { %v277_v0 = vadd.f32 %v3123_v47, %v276_v58 }
 0x194   :  { %v3127_v2 = vpop.eup %3126  ;;  %v225_v4 = vadd.f32 %v3125_v48, %v224_v61 }
 0x195   :  { %v3129_v5 = vpop.eup %3128  ;;  %v281_v6 = vsel %vm280_vm5, %v3123_v47, %v277_v0  ;;  %v150_v7 = vmul.f32 %v3127_v2, %v3507_v50  ;;  %vm155_vm12 = vweird.f32 %v3127_v2  ;;  %vm107_vm5 = vcmp.eq.f32.partialorder %v106_v25, 8.507059e+37 }
 0x196   :  { %v286_v9 = vsel %vm283_vm8, %v285_v3, %v281_v6  ;;  %v229_v10 = vsel %vm228_vm9, %v3125_v48, %v225_v4  ;;  %v98_v12 = vmul.f32 %v3129_v5, %v3510_v52  ;;  %vm103_vm13 = vweird.f32 %v3129_v5  ;;  %vm156_vm1 = vmor %vm154_vm14, %vm155_vm12 }
 0x197   :  { %v287_v13 = vmul.f32 %v3481_v31, %v286_v9  ;;  %v151_v14 = vsub.f32 1.0, %v150_v7  ;;  %v234_v17 = vsel %vm231_vm10, %v233_v11, %v229_v10  ;;  %vm104_vm4 = vmor %vm102_vm2, %vm103_vm13  ;;  %v3557_v52 = vmov 0.0  }
 0x198   :  { %v99_v20 = vsub.f32 1.0, %v98_v12  ;;  %v235_v27 = vmul.f32 %v3483_v34, %v234_v17 }
 0x199   :  { %v152_v21 = vmul.f32 %v3127_v2, %v151_v14  ;;  %v288_v23 = vmul.f32 %v287_v13, %v164_v57 }
 0x19a   :  { %v100_v24 = vmul.f32 %v3129_v5, %v99_v20 }
 0x19b   :  { %v153_v28 = vadd.f32 %v3127_v2, %v152_v21  ;;  %v289_v33 = vadd.f32 %v288_v23, %v235_v27 }
 0x19c   :  { %v101_v30 = vadd.f32 %v3129_v5, %v100_v24 }
 0x19d   :  { %v157_v31 = vsel %vm156_vm1, %v3127_v2, %v153_v28  ;;  %v290_v43 = vmul.f32 %v289_v33, %v182_v39 }
 0x19e   :  { %v162_v35 = vsel %vm159_vm3, %v161_v29, %v157_v31  ;;  %v105_v36 = vsel %vm104_vm4, %v3129_v5, %v101_v30 }
 0x19f   :  { %v110_v34 = vsel %vm107_vm5, %v109_v32, %v105_v36  ;;  %v163_v40 = vmul.f32 %v3489_v37, %v162_v35  ;;  %v293_v47 = vmul.f32 %v292_v44, %v290_v43 }
 0x1a0   :  { %v111_v41 = vmul.f32 %v3491_v38, %v110_v34  ;;  %v3553_v38 = vmov 0.0  }
 0x1a1   :  { %v165_v42 = vmul.f32 %v164_v57, %v163_v40 }
 0x1a3   :  { %v166_v45 = vadd.f32 %v165_v42, %v111_v41 }
 0x1a5   :  { %v183_v46 = vmul.f32 %v182_v39, %v166_v45 }
 0x1a7   :  { %v294_v48 = vadd.f32 %v293_v47, %v183_v46 }
 0x1a9   :  { %298 = vrot.lane.b32.xlu2 %v294_v48, %s3359_s30  ;;  %295 = vst.msk [vmem:[#allocation6] sm:$0xff] %vm63_vm0, %v294_v48  ;;  %v3548_v49 = vsel %vm63_vm0, %v294_v48, 0.0 }
 0x203   :  { %v299_v50 = vpop.permute.xlu2 %298 }
 0x204   :  { %v3551_v37 = vsel %vm63_vm0, 0.0, %v299_v50 }
 0x205 LB: > { %v3360_v54 = vmov 0   ;;  %s2870_s15 = sshll.u32 %s3356_s14, 4  ;;  %v316_v57 = vlaneseq  ;;  %vm331_vm6 = vcmask 130048   ;;  %s3361_s18 = smov 32   ;;  %v419_v3 = vld [vmem:[%s4767_s5 + $0x58] sm:$0xff]  ;;  %v418_v4 = vld [vmem:[%s4767_s5 + $0x50] sm:$0xff]  ;;  %s3356_s14 = sphi %s3561_s14, %s307_s14   ;;  %v3352_v53 = vphi %v3559_v53, %v4785_v53   ;;  %v3348_v52 = vphi %v3557_v52, %v4784_v52   ;;  %v3344_v51 = vphi %v3555_v51, %v4783_v51   ;;  %v3340_v38 = vphi %v3553_v38, %v4782_v38  }
 0x206   : > { %3130 = vset.pattern.permute.xlu0 %v3360_v54  ;;  %s313_s9 = scalar_lea.vmem %s4763_s1, %s2870_s15  ;;  %435 = vmatpush.msra.mxu2 %v419_v3  ;;  %v417_v5 = vld [vmem:[%s4767_s5 + $0x48] sm:$0xff]  ;;  %s3362_s25 = smov 112   ;;  %v416_v8 = vld [vmem:[%s4767_s5 + $0x40] sm:$0xff]  ;;  %v415_v9 = vld [vmem:[%s4767_s5 + $0x38] sm:$0xff]  ;;  %vm402_vm7 = vcmask 261120   ;;  %vm424_vm8 = vcmask 785408  }
 0x207   : > { %v315_v55 = vld [vmem:[%s313_s9 + $0x8] sm:$0xff]  ;;  %v314_v56 = vld [vmem:[%s313_s9] sm:$0xff]  ;;  %v3582_v58 = vand.u32 127, %v316_v57  ;;  %s3363_s26 = smov 64   ;;  %v414_v10 = vld [vmem:[%s4767_s5 + $0x30] sm:$0xff]  ;;  %vm405_vm9 = vcmask 523264  }
 0x208   : > { %326 = vperm.xlu0 %3130, %v315_v55   ;;  %436 = vmatpush.msra.mxu2 %v418_v4  ;;  %v413_v11 = vld [vmem:[%s4767_s5 + $0x28] sm:$0xff]  ;;  %v412_v12 = vld [vmem:[%s4767_s5 + $0x20] sm:$0xff]  ;;  %v411_v13 = vld [vmem:[%s4767_s5 + $0x18] sm:$0xff]  ;;  %s3364_s29 = smov 16   ;;  %vm574_vm3 = vcmask 392192   ;;  %s307_s14 = sadd.s32 1, %s3356_s14  }
 0x209   : > { %vm318_vm0 = vcmp.lt.s32.totalorder %v3582_v58, 1  ;;  %v410_v14 = vld [vmem:[%s4767_s5 + $0x10] sm:$0xff]  ;;  %v409_v15 = vld [vmem:[%s4767_s5 + $0x8] sm:$0xff]  ;;  %v408_v16 = vld [vmem:[%s4767_s5] sm:$0xff]  ;;  %p304_p0 = scmp.ge.s32.totalorder %s307_s14, 4  }
 0x20a   : > { %437 = vmatpush.msra.mxu2 %v417_v5  ;;  %v3131_v25 = vld [vmem:[%s4769_s7] ss:$0 sm:$0xff]  ;;  %s3365_s14 = smov (%p304_p0), 32   ;;  %s3367_s17 = smov (%p304_p0), 64  }
 0x20b   :  { %s3368_s21 = smov (%p304_p0), 16   ;;  %s2827_s9 = sshll.u32 (%p304_p0), %s4775_s13, 4  ;;  %s2828_s9 = int_to_ptr.hbm [resolvable:$true] %s2827_s9 }
 0x20c   : > { %438 = vmatpush.msra.mxu2 %v416_v8  ;;  %v572_v8 = vld [vmem:[%s4768_s6 + $0x20] sm:$0xff] }
 0x20e   : > { %439 = vmatpush.msra.mxu2 %v415_v9  ;;  %v571_v9 = vld [vmem:[%s4768_s6 + $0x18] sm:$0xff] }
 0x210   : > { %321 = vperm.xlu0 %3130, %v314_v56   ;;  %440 = vmatpush.msra.mxu2 %v414_v10  ;;  %v570_v10 = vld [vmem:[%s4768_s6 + $0x10] sm:$0xff] }
 0x212   : > { %441 = vmatpush.msra.mxu2 %v413_v11  ;;  %v569_v11 = vld [vmem:[%s4768_s6 + $0x8] sm:$0xff] }
 0x214   : > { %442 = vmatpush.msra.mxu2 %v412_v12  ;;  %v568_v12 = vld [vmem:[%s4768_s6] sm:$0xff] }
 0x216   : > { %443 = vmatpush.msra.mxu2 %v411_v13 }
 0x218   : > { %496 = vrot.lane.b32.xlu0 %v3348_v52, %s3362_s25  ;;  %444 = vmatpush.msra.mxu2 %v410_v14 }
 0x21a   : > { %445 = vmatpush.msra.mxu2 %v409_v15 }
 0x21c   : > { %446 = vmatpush.msra.mxu2 %v408_v16 }
 0x27a   : > { %v327_v59 = vpop.permute.xlu0 %326 }
 0x27b   : > { %v330_v60 = vsel %vm318_vm0, %v327_v59, 0.0 }
 0x27c   : > { %v333_v61 = vsel %vm331_vm6, %v330_v60, %v3348_v52 }
 0x27d   : > { %354 = vmatpush.msra.mxu0 %v333_v61  ;;  %3053 = vmatpush.msra.mxu3 %v333_v61 }
 0x282   : > { %v322_v62 = vpop.permute.xlu0 %321 }
 0x283   : > { %v329_v63 = vsel %vm318_vm0, %v322_v62, 0.0 }
 0x284   : > { %v332_v0 = vsel %vm331_vm6, %v329_v63, %v3352_v53 }
 0x285   : > { %355 = vmatpush.msra.mxu0 %v332_v0  ;;  %3054 = vmatpush.msra.mxu3 %v332_v0 }
 0x286   : > { %2871 = vmatmul.msk.f32.vlgmr.msra.gmra.mxu0 %vm331_vm6, %v3548_v49  ;;  %2872 = vmatmul.msk.f32.vlgmr.msra.gmra.mxu3 %vm331_vm6, %v3551_v37 }
 0x28a   : > { %v497_v59 = vpop.permute.xlu0 %496 }
 0x303   : > { %v357_v1 = vpop.f32.mrf.mxu0 }
 0x304   : > { %388 = vrot.lane.b32.xlu1 %v357_v1, %s3361_s18 }
 0x309   : > { %v360_v2 = vpop.f32.mrf.mxu3 }
 0x30a   : > { %390 = vrot.lane.b32.xlu2 %v360_v2, %s3361_s18  ;;  %377 = vmatpush.msra.mxu1 %v360_v2 }
 0x30c   : > { %378 = vmatpush.msra.mxu1 %v357_v1 }
 0x30d   : > { %2873 = vmatmul.msk.f32.vlgmr.msra.gmra.mxu1 %vm331_vm6, %v3548_v49 }
 0x315   : > { %2874 = vmatmul.msk.f32.gmra.mxu1 %vm331_vm6, %v3551_v37 }
 0x364   : > { %v391_v18 = vpop.permute.xlu2 %390 }
 0x365   : > { %v404_v23 = vsel %vm402_vm7, %v333_v61, %v391_v18 }
 0x376   : > { %v389_v17 = vpop.permute.xlu1 %388 }
 0x377   : > { %v403_v19 = vsel %vm402_vm7, %v332_v0, %v389_v17 }
 0x38a   : > { %v380_v6 = vpop.f32.mrf.mxu1 }
 0x38b   : > { %396 = vrot.lane.b32.xlu1 %v380_v6, %s3363_s26 }
 0x392   : > { %v383_v7 = vpop.f32.mrf.mxu1 }
 0x393   : > { %398 = vrot.lane.b32.xlu2 %v383_v7, %s3363_s26  ;;  %494 = vrot.lane.b32.xlu1 %v3352_v53, %s3362_s25  ;;  %v573_v7 = vld [vmem:[%s4768_s6 + $0x28] sm:$0xff] }
 0x394   : > { %591 = vmatpush.msrb.mxu1 %v573_v7 }
 0x396   : > { %592 = vmatpush.msrb.mxu1 %v572_v8  ;;  %v3132_v8 = vld [vmem:[%s4769_s7 + $0x1] ss:$0 sm:$0xff] }
 0x398   : > { %593 = vmatpush.msrb.mxu1 %v571_v9 }
 0x39a   : > { %594 = vmatpush.msrb.mxu1 %v570_v10 }
 0x39c   : > { %595 = vmatpush.msrb.mxu1 %v569_v11 }
 0x39e   : > { %596 = vmatpush.msrb.mxu1 %v568_v12 }
 0x3ed   : > { %v399_v22 = vpop.permute.xlu2 %398 }
 0x3ee   : > { %v407_v24 = vsel %vm405_vm9, %v404_v23, %v399_v22 }
 0x3fd   : > { %v397_v20 = vpop.permute.xlu1 %396 }
 0x3fe   : > { %v406_v21 = vsel %vm405_vm9, %v403_v19, %v397_v20 }
 0x3ff   : > { %2875 = vmatmul.msk.f32.vlgmr.msra.gmra.mxu2 %vm424_vm8, %v406_v21 }
 0x405   : > { %v495_v63 = vpop.permute.xlu1 %494 }
 0x407   : > { %2876 = vmatmul.msk.f32.gmra.mxu2 %vm424_vm8, %v407_v24 }
 0x482   : > { %v448_v26 = vpop.f32.mrf.mxu2 }
 0x483   : > { %v3654_v27 = vadd.f32 %v3131_v25, %v448_v26 }
 0x485   : > { %v2877_v28 = vmul.f32 -1.442695, %v3654_v27 }
 0x487   : > { %3133 = vpow2.f32 %v2877_v28 }
 0x48a   : > { %v451_v29 = vpop.f32.mrf.mxu2 }
 0x48b   : > { %v3657_v30 = vadd.f32 %v3131_v25, %v451_v29 }
 0x48d   : > { %v3134_v31 = vpop.eup %3133  ;;  %v2878_v32 = vmul.f32 -1.442695, %v3657_v30 }
 0x48e   : > { %v460_v33 = vadd.f32 1.0, %v3134_v31 }
 0x48f   : > { %3135 = vpow2.f32 %v2878_v32 }
 0x490   : > { %3137 = vrcp.f32 %v460_v33  ;;  %vm467_vm11 = vweird.f32 %v460_v33  ;;  %v473_v46 = vand.u32 2147483648, %v460_v33  ;;  %v471_v48 = vand.u32 2147483647, %v460_v33 }
 0x492   : > { %v474_v57 = vor.u32 1.1754944e-38, %v473_v46  ;;  %vm472_vm1 = vcmp.eq.f32.partialorder %v471_v48, 8.507059e+37  ;;  %v2899_v46 = vld [vmem:[%s4767_s5 + $0xb0] sm:$0xff]  ;;  %v2897_v48 = vld [vmem:[%s4767_s5 + $0xa0] sm:$0xff] }
 0x495   : > { %v3136_v35 = vpop.eup %3135 }
 0x496   : > { %v3138_v36 = vpop.eup %3137  ;;  %v461_v39 = vadd.f32 1.0, %v3136_v35 }
 0x497   : > { %v463_v34 = vmul.f32 %v3138_v36, %v460_v33  ;;  %vm468_vm10 = vweird.f32 %v3138_v36 }
 0x498   : > { %3139 = vrcp.f32 %v461_v39  ;;  %v488_v47 = vand.u32 2147483648, %v461_v39  ;;  %v486_v54 = vand.u32 2147483647, %v461_v39  ;;  %vm469_vm13 = vmor %vm467_vm11, %vm468_vm10  ;;  %vm482_vm14 = vweird.f32 %v461_v39 }
 0x499   : > { %v464_v40 = vsub.f32 1.0, %v463_v34 }
 0x49a   : > { %v489_v60 = vor.u32 1.1754944e-38, %v488_v47  ;;  %vm487_vm2 = vcmp.eq.f32.partialorder %v486_v54, 8.507059e+37  ;;  %v2898_v47 = vld [vmem:[%s4767_s5 + $0xa8] sm:$0xff]  ;;  %v2895_v54 = vld [vmem:[%s4767_s5 + $0x90] sm:$0xff] }
 0x49b   : > { %v465_v41 = vmul.f32 %v3138_v36, %v464_v40 }
 0x49d   : > { %v466_v44 = vadd.f32 %v3138_v36, %v465_v41 }
 0x49e   : > { %v3140_v42 = vpop.eup %3139 }
 0x49f   : > { %v478_v43 = vmul.f32 %v3140_v42, %v461_v39  ;;  %vm483_vm12 = vweird.f32 %v3140_v42  ;;  %v470_v55 = vsel %vm469_vm13, %v3138_v36, %v466_v44 }
 0x4a0   : > { %vm484_vm15 = vmor %vm482_vm14, %vm483_vm12  ;;  %v3660_v62 = vsel %vm472_vm1, %v474_v57, %v470_v55  ;;  %v2894_v55 = vld [vmem:[%s4767_s5 + $0x88] sm:$0xff]  ;;  %v2892_v57 = vld [vmem:[%s4767_s5 + $0x78] sm:$0xff] }
 0x4a1   : > { %v479_v45 = vsub.f32 1.0, %v478_v43  ;;  %v500_v2 = vmul.f32 %v495_v63, %v3660_v62  ;;  %v2889_v63 = vld [vmem:[%s4767_s5 + $0x60] sm:$0xff]  ;;  %vm2918_vm1 = vmneg (%p304_p0), %vm331_vm6 }
 0x4a3   : > { %v480_v50 = vmul.f32 %v3140_v42, %v479_v45  ;;  %v2900_v45 = vld [vmem:[%s4767_s5 + $0xb8] sm:$0xff] }
 0x4a4   : > { %736 = vmatpush.msra.mxu1 %v2900_v45 }
 0x4a5   : > { %v481_v56 = vadd.f32 %v3140_v42, %v480_v50  ;;  %v2896_v50 = vld [vmem:[%s4767_s5 + $0x98] sm:$0xff] }
 0x4a6   : > { %737 = vmatpush.msra.mxu1 %v2899_v46 }
 0x4a7   : > { %v485_v61 = vsel %vm484_vm15, %v3140_v42, %v481_v56  ;;  %v2893_v56 = vld [vmem:[%s4767_s5 + $0x80] sm:$0xff] }
 0x4a8   : > { %v490_v0 = vsel %vm487_vm2, %v489_v60, %v485_v61  ;;  %738 = vmatpush.msra.mxu1 %v2898_v47  ;;  %v2890_v60 = vld [vmem:[%s4767_s5 + $0x68] sm:$0xff]  ;;  %v2915_v47 = vld [vmem:[%s4768_s6 + $0x58] sm:$0xff] }
 0x4a9   : > { %v501_v1 = vmul.f32 %v497_v59, %v490_v0  ;;  %v619_v31 = vsub.f32 1.0, %v490_v0  ;;  %v617_v33 = vmul.f32 %v3348_v52, %v490_v0  ;;  %v2891_v59 = vld [vmem:[%s4767_s5 + $0x70] sm:$0xff] }
 0x4aa   : > { %739 = vmatpush.msra.mxu1 %v2897_v48  ;;  %v2914_v48 = vld [vmem:[%s4768_s6 + $0x50] sm:$0xff] }
 0x4ab   : > { %516 = vmatpush.msrb.mxu3 %v501_v1 }
 0x4ac   : > { %740 = vmatpush.msra.mxu1 %v2896_v50  ;;  %v2913_v50 = vld [vmem:[%s4768_s6 + $0x48] sm:$0xff] }
 0x4ad   : > { %517 = vmatpush.msrb.mxu3 %v500_v2 }
 0x4ae   : > { %2879 = vmatmul.msk.f32.vlgmr.msrb.gmra.mxu3 %vm331_vm6, %v3548_v49  ;;  %741 = vmatpush.msra.mxu1 %v2895_v54  ;;  %v2912_v54 = vld [vmem:[%s4768_s6 + $0x40] sm:$0xff] }
 0x4b0   : > { %742 = vmatpush.msra.mxu1 %v2894_v55  ;;  %v2911_v55 = vld [vmem:[%s4768_s6 + $0x38] sm:$0xff] }
 0x4b2   : > { %743 = vmatpush.msra.mxu1 %v2893_v56 }
 0x4b4   : > { %744 = vmatpush.msra.mxu1 %v2892_v57 }
 0x4b6   : > { %2880 = vmatmul.msk.f32.gmra.mxu3 %vm331_vm6, %v3551_v37  ;;  %745 = vmatpush.msra.mxu1 %v2891_v59  ;;  %v2910_v59 = vld [vmem:[%s4768_s6 + $0x30] sm:$0xff] }
 0x4b8   : > { %746 = vmatpush.msra.mxu1 %v2890_v60 }
 0x4ba   : > { %747 = vmatpush.msra.mxu1 %v2889_v63 }
 0x531   : > { %v519_v3 = vpop.f32.mrf.mxu3 }
 0x532   : > { %550 = vrot.lane.b32.xlu2 %v519_v3, %s3364_s29 }
 0x539   : > { %v522_v4 = vpop.f32.mrf.mxu3 }
 0x53a   : > { %552 = vrot.lane.b32.xlu1 %v522_v4, %s3364_s29  ;;  %539 = vmatpush.msrb.mxu0 %v522_v4 }
 0x53c   : > { %540 = vmatpush.msrb.mxu0 %v519_v3 }
 0x53d   : > { %2881 = vmatmul.msk.f32.vlgmr.msrb.gmra.mxu0 %vm331_vm6, %v3548_v49 }
 0x545   : > { %2882 = vmatmul.msk.f32.gmra.mxu0 %vm331_vm6, %v3551_v37 }
 0x58c   : > { %v551_v13 = vpop.permute.xlu2 %550 }
 0x58d   : > { %v564_v14 = vsel %vm331_vm6, %v500_v2, %v551_v13 }
 0x5ac   : > { %v553_v17 = vpop.permute.xlu1 %552 }
 0x5ad   : > { %v565_v19 = vsel %vm331_vm6, %v501_v1, %v553_v17 }
 0x5ba   : > { %v542_v5 = vpop.f32.mrf.mxu0 }
 0x5bb   : > { %558 = vrot.lane.b32.xlu0 %v542_v5, %s3361_s18 }
 0x5c2   : > { %v545_v6 = vpop.f32.mrf.mxu0 }
 0x5c3   : > { %560 = vrot.lane.b32.xlu2 %v545_v6, %s3361_s18 }
 0x61d   : > { %v561_v18 = vpop.permute.xlu2 %560 }
 0x61e   : > { %v567_v20 = vsel %vm402_vm7, %v565_v19, %v561_v18 }
 0x62d   : > { %v559_v15 = vpop.permute.xlu0 %558 }
 0x62e   : > { %v566_v16 = vsel %vm402_vm7, %v564_v14, %v559_v15 }
 0x62f   : > { %2883 = vmatmul.msk.f32.vlgmr.msrb.gmra.mxu1 %vm574_vm3, %v566_v16 }
 0x637   : > { %2884 = vmatmul.msk.f32.gmra.mxu1 %vm574_vm3, %v567_v20 }
 0x6ac   : > { %v598_v21 = vpop.f32.mrf.mxu1 }
 0x6ad   : > { %606 = vrot.lane.b32.xlu1 %v598_v21, %s3361_s18 }
 0x6b4   : > { %v601_v22 = vpop.f32.mrf.mxu1 }
 0x6b5   : > { %608 = vrot.lane.b32.xlu0 %v601_v22, %s3361_s18 }
 0x71f   : > { %v607_v23 = vpop.permute.xlu1 %606 }
 0x720   : > { %v612_v24 = vadd.f32 %v607_v23, %v3654_v27  ;;  %v618_v27 = vsub.f32 1.0, %v3660_v62 }
 0x722   : > { %3141 = vtanh.f32 %v612_v24 }
 0x727   : > { %v609_v25 = vpop.permute.xlu0 %608 }
 0x728   : > { %v3142_v26 = vpop.eup %3141  ;;  %v613_v28 = vadd.f32 %v609_v25, %v3657_v30  ;;  %v616_v30 = vmul.f32 %v3352_v53, %v3660_v62 }
 0x729   : > { %622 = vrot.lane.b32.xlu0 %v3142_v26, %s3362_s25 }
 0x72a   : > { %3143 = vtanh.f32 %v613_v28 }
 0x730   : > { %v3144_v29 = vpop.eup %3143 }
 0x731   : > { %624 = vrot.lane.b32.xlu2 %v3144_v29, %s3362_s25 }
 0x78b   : > { %v625_v32 = vpop.permute.xlu2 %624 }
 0x78c   : > { %v629_v35 = vmul.f32 %v625_v32, %v619_v31 }
 0x78e   : > { %v3706_v52 = vadd.f32 %v629_v35, %v617_v33  }
 0x790   : > { %v4778_v36 = vmov %v3706_v52 }
 0x791   : > { %636 = vrot.lane.b32.xlu1 %v4778_v36, %s3362_s25 }
 0x79b   : > { %v623_v39 = vpop.permute.xlu0 %622 }
 0x79c   : > { %v628_v34 = vmul.f32 %v623_v39, %v618_v27 }
 0x79e   : > { %v3713_v53 = vadd.f32 %v628_v34, %v616_v30  }
 0x7a0   : > { %v4779_v40 = vmov %v3713_v53 }
 0x7a1   : > { %634 = vrot.lane.b32.xlu2 %v4779_v40, %s3362_s25 }
 0x7fb   : > { %v635_v41 = vpop.permute.xlu2 %634 }
 0x7fc   : > { %v640_v43 = vsel %vm331_vm6, %v635_v41, %v3344_v51 }
 0x803   : > { %v637_v42 = vpop.permute.xlu1 %636 }
 0x804   : > { %v641_v52 = vsel %vm331_vm6, %v637_v42, %v3340_v38 }
 0x805   : > { %656 = vmatpush.msra.mxu3 %v641_v52 }
 0x807   : > { %657 = vmatpush.msra.mxu3 %v640_v43 }
 0x808   : > { %2885 = vmatmul.msk.f32.vlgmr.msra.gmra.mxu3 %vm331_vm6, %v3548_v49 }
 0x810   : > { %2886 = vmatmul.msk.f32.gmra.mxu3 %vm331_vm6, %v3551_v37 }
 0x88b   : > { %v659_v53 = vpop.f32.mrf.mxu3 }
 0x88c   : > { %690 = vrot.lane.b32.xlu0 %v659_v53, %s3361_s18 }
 0x893   : > { %v662_v44 = vpop.f32.mrf.mxu3 }
 0x894   : > { %692 = vrot.lane.b32.xlu2 %v662_v44, %s3361_s18  ;;  %679 = vmatpush.msra.mxu0 %v662_v44 }
 0x896   : > { %680 = vmatpush.msra.mxu0 %v659_v53 }
 0x897   : > { %2887 = vmatmul.msk.f32.vlgmr.msra.gmra.mxu0 %vm331_vm6, %v3548_v49 }
 0x898   : > { %892 = vmatpush.msrb.mxu0 %v2915_v47 }
 0x89a   : > { %893 = vmatpush.msrb.mxu0 %v2914_v48  ;;  %v3962_v48 = vld [vmem:[%s4769_s7 + $0x2] ss:$0 sm:$0xff] (%p304_p0) }
 0x89c   : > { %795 = vrot.lane.b32.xlu2 %v3344_v51, %s3362_s25  ;;  %894 = vmatpush.msrb.mxu0 %v2913_v50 }
 0x89e   : > { %895 = vmatpush.msrb.mxu0 %v2912_v54 }
 0x89f   : > { %2888 = vmatmul.msk.f32.gmra.mxu0 %vm331_vm6, %v3551_v37 }
 0x8a0   : > { %896 = vmatpush.msrb.mxu0 %v2911_v55 }
 0x8a2   : > { %897 = vmatpush.msrb.mxu0 %v2910_v59 }
 0x8a4   :  { %2919 = vmatpush.msk.msra.mxu0 (%p304_p0), %vm2918_vm1, %v4778_v36 }
 0x8a6   :  { %2921 = vmatpush.msk.msra.mxu0 (%p304_p0), %vm2918_vm1, %v4779_v40 }
 0x8ee   : > { %v693_v4 = vpop.permute.xlu2 %692 }
 0x8ef   : > { %v705_v5 = vsel %vm402_vm7, %v641_v52, %v693_v4 }
 0x8f6   : > { %v796_v42 = vpop.permute.xlu2 %795 }
 0x8fe   : > { %v691_v0 = vpop.permute.xlu0 %690 }
 0x8ff   : > { %v704_v1 = vsel %vm402_vm7, %v640_v43, %v691_v0 }
 0x914   : > { %v682_v61 = vpop.f32.mrf.mxu0 }
 0x915   : > { %698 = vrot.lane.b32.xlu1 %v682_v61, %s3363_s26 }
 0x91c   : > { %v685_v62 = vpop.f32.mrf.mxu0 }
 0x91d   : > { %700 = vrot.lane.b32.xlu0 %v685_v62, %s3363_s26  ;;  %797 = vrot.lane.b32.xlu1 %v3340_v38, %s3362_s25 }
 0x987   : > { %v699_v2 = vpop.permute.xlu1 %698 }
 0x988   : > { %v706_v3 = vsel %vm405_vm9, %v704_v1, %v699_v2 }
 0x989   : > { %2902 = vmatmul.msk.f32.vlgmr.msra.gmra.mxu1 %vm424_vm8, %v706_v3 }
 0x98a   :  { %3055 = vmatpush.msk.msra.mxu1 (%p304_p0), %vm2918_vm1, %v4778_v36 }
 0x98c   :  { %3056 = vmatpush.msk.msra.mxu1 (%p304_p0), %vm2918_vm1, %v4779_v40 }
 0x98f   : > { %v701_v6 = vpop.permute.xlu0 %700  ;;  %v798_v30 = vpop.permute.xlu1 %797 }
 0x990   : > { %v707_v7 = vsel %vm405_vm9, %v705_v5, %v701_v6 }
 0x991   : > { %2903 = vmatmul.msk.f32.gmra.mxu1 %vm424_vm8, %v707_v7 }
 0x999   :  { %2923 = vmatmul.msk.f32.vlgmr.msra.gmra.mxu1 (%p304_p0), %vm331_vm6, %v3551_v37 }
 0xa06   : > { %v749_v9 = vpop.f32.mrf.mxu1 }
 0xa07   : > { %v3782_v10 = vadd.f32 %v3132_v8, %v749_v9 }
 0xa09   : > { %v2904_v11 = vmul.f32 -1.442695, %v3782_v10 }
 0xa0b   : > { %3145 = vpow2.f32 %v2904_v11 }
 0xa0e   : > { %v752_v12 = vpop.f32.mrf.mxu1 }
 0xa0f   : > { %v3785_v13 = vadd.f32 %v3132_v8, %v752_v12 }
 0xa11   : > { %v3146_v14 = vpop.eup %3145  ;;  %v2905_v15 = vmul.f32 -1.442695, %v3785_v13 }
 0xa12   : > { %v761_v16 = vadd.f32 1.0, %v3146_v14 }
 0xa13   : > { %3147 = vpow2.f32 %v2905_v15 }
 0xa14   : > { %3149 = vrcp.f32 %v761_v16  ;;  %vm768_vm5 = vweird.f32 %v761_v16  ;;  %v774_v28 = vand.u32 2147483648, %v761_v16  ;;  %v772_v31 = vand.u32 2147483647, %v761_v16 }
 0xa16   : > { %v775_v39 = vor.u32 1.1754944e-38, %v774_v28  ;;  %vm773_vm14 = vcmp.eq.f32.partialorder %v772_v31, 8.507059e+37  ;;  %v3903_v28 = vld [vmem:[%s4767_s5 + $0xf0] sm:$0xff] (%p304_p0)  ;;  %v3915_v31 = vld [vmem:[%s4767_s5 + $0xe0] sm:$0xff] (%p304_p0) }
 0xa19   : > { %v3148_v17 = vpop.eup %3147 }
 0xa1a   : > { %v3150_v18 = vpop.eup %3149  ;;  %v762_v19 = vadd.f32 1.0, %v3148_v17 }
 0xa1b   : > { %v764_v20 = vmul.f32 %v3150_v18, %v761_v16  ;;  %vm769_vm4 = vweird.f32 %v3150_v18 }
 0xa1c   : > { %3151 = vrcp.f32 %v762_v19  ;;  %v789_v29 = vand.u32 2147483648, %v762_v19  ;;  %v787_v33 = vand.u32 2147483647, %v762_v19  ;;  %vm770_vm11 = vmor %vm768_vm5, %vm769_vm4  ;;  %vm783_vm12 = vweird.f32 %v762_v19 }
 0xa1d   : > { %v765_v21 = vsub.f32 1.0, %v764_v20 }
 0xa1e   : > { %v790_v34 = vor.u32 1.1754944e-38, %v789_v29  ;;  %vm788_vm15 = vcmp.eq.f32.partialorder %v787_v33, 8.507059e+37  ;;  %v3909_v29 = vld [vmem:[%s4767_s5 + $0xe8] sm:$0xff] (%p304_p0)  ;;  %v3927_v33 = vld [vmem:[%s4767_s5 + $0xd0] sm:$0xff] (%p304_p0) }
 0xa1f   : > { %v766_v22 = vmul.f32 %v3150_v18, %v765_v21 }
 0xa21   : > { %v767_v25 = vadd.f32 %v3150_v18, %v766_v22  ;;  %v967_v22 = vpop.f32.mrf.mxu1 (%p304_p0) }
 0xa22   : > { %v3152_v23 = vpop.eup %3151  ;;  %984 = vmatpush.msrb.mxu1 (%p304_p0), %v967_v22 }
 0xa23   : > { %v779_v24 = vmul.f32 %v3152_v23, %v762_v19  ;;  %vm784_vm10 = vweird.f32 %v3152_v23  ;;  %v771_v35 = vsel %vm770_vm11, %v3150_v18, %v767_v25  ;;  %v3891_v25 = vld [vmem:[%s4767_s5 + $0x100] sm:$0xff] (%p304_p0) }
 0xa24   : > { %vm785_vm13 = vmor %vm783_vm12, %vm784_vm10  ;;  %v3788_v52 = vsel %vm773_vm14, %v775_v39, %v771_v35  ;;  %v3933_v35 = vld [vmem:[%s4767_s5 + $0xc8] sm:$0xff] (%p304_p0) }
 0xa25   : > { %v780_v26 = vsub.f32 1.0, %v779_v24  ;;  %v801_v44 = vmul.f32 %v796_v42, %v3788_v52  ;;  %v917_v20 = vmul.f32 %v3344_v51, %v3788_v52  ;;  %v3885_v24 = vld [vmem:[%s4767_s5 + $0x108] sm:$0xff] (%p304_p0) }
 0xa27   : > { %v781_v32 = vmul.f32 %v3152_v23, %v780_v26  ;;  %v3897_v26 = vld [vmem:[%s4767_s5 + $0xf8] sm:$0xff] (%p304_p0) }
 0xa29   : > { %v782_v27 = vadd.f32 %v3152_v23, %v781_v32  ;;  %v3921_v32 = vld [vmem:[%s4767_s5 + $0xd8] sm:$0xff] (%p304_p0) }
 0xa2b   : > { %v786_v41 = vsel %vm785_vm13, %v3152_v23, %v782_v27 }
 0xa2c   : > { %v791_v43 = vsel %vm788_vm15, %v790_v34, %v786_v41  ;;  %v939_v41 = vsel (%p304_p0), %vm331_vm6, 0.0, %v4779_v40 }
 0xa2d   : > { %v802_v53 = vmul.f32 %v798_v30, %v791_v43  ;;  %v920_v14 = vsub.f32 1.0, %v791_v43  ;;  %v918_v16 = vmul.f32 %v3340_v38, %v791_v43  ;;  %v3946_v30 = vld [vmem:[%s4767_s5 + $0xc0] sm:$0xff] (%p304_p0) }
 0xa2f   : > { %817 = vmatpush.msrb.mxu3 %v802_v53 }
 0xa31   : > { %818 = vmatpush.msrb.mxu3 %v801_v44 }
 0xa32   : > { %2906 = vmatmul.msk.f32.vlgmr.msrb.gmra.mxu3 %vm331_vm6, %v3548_v49 }
 0xa3a   : > { %2907 = vmatmul.msk.f32.gmra.mxu3 %vm331_vm6, %v3551_v37 }
 0xab5   : > { %v820_v45 = vpop.f32.mrf.mxu3 }
 0xab6   : > { %851 = vrot.lane.b32.xlu0 %v820_v45, %s3364_s29 }
 0xabd   : > { %v823_v46 = vpop.f32.mrf.mxu3 }
 0xabe   : > { %853 = vrot.lane.b32.xlu2 %v823_v46, %s3364_s29  ;;  %840 = vmatpush.msrb.mxu2 %v823_v46 }
 0xac0   : > { %841 = vmatpush.msrb.mxu2 %v820_v45 }
 0xac1   : > { %2908 = vmatmul.msk.f32.vlgmr.msrb.gmra.mxu2 %vm331_vm6, %v3548_v49 }
 0xac9   : > { %2909 = vmatmul.msk.f32.gmra.mxu2 %vm331_vm6, %v3551_v37 }
 0xb18   : > { %v854_v0 = vpop.permute.xlu2 %853 }
 0xb19   : > { %v866_v1 = vsel %vm331_vm6, %v802_v53, %v854_v0  ;;  %v4785_v53 = vmov %v4779_v40 }
 0xb28   : > { %v852_v60 = vpop.permute.xlu0 %851 }
 0xb29   : > { %v865_v61 = vsel %vm331_vm6, %v801_v44, %v852_v60  ;;  %v940_v44 = vsel (%p304_p0), %vm331_vm6, 0.0, %v4778_v36 }
 0xb44   : > { %v843_v56 = vpop.f32.mrf.mxu2 }
 0xb45   : > { %859 = vrot.lane.b32.xlu1 %v843_v56, %s3361_s18 }
 0xb4c   : > { %v846_v57 = vpop.f32.mrf.mxu2 }
 0xb4d   : > { %861 = vrot.lane.b32.xlu0 %v846_v57, %s3361_s18 }
 0xbb7   : > { %v860_v62 = vpop.permute.xlu1 %859 }
 0xbb8   : > { %v867_v63 = vsel %vm402_vm7, %v865_v61, %v860_v62 }
 0xbb9   : > { %2916 = vmatmul.msk.f32.vlgmr.msrb.gmra.mxu0 %vm574_vm3, %v867_v63 }
 0xbbf   : > { %v862_v2 = vpop.permute.xlu0 %861 }
 0xbc0   : > { %v868_v3 = vsel %vm402_vm7, %v866_v1, %v862_v2 }
 0xbc1   : > { %2917 = vmatmul.msk.f32.gmra.mxu0 %vm574_vm3, %v868_v3 }
 0xbc9   :  { %2922 = vmatmul.msk.f32.vlgmr.msra.gmra.mxu0 (%p304_p0), %vm331_vm6, %v3548_v49 }
 0xc36   : > { %v899_v4 = vpop.f32.mrf.mxu0 }
 0xc37   : > { %907 = vrot.lane.b32.xlu1 %v899_v4, %s3361_s18 }
 0xc3e   : > { %v902_v5 = vpop.f32.mrf.mxu0 }
 0xc3f   : > { %909 = vrot.lane.b32.xlu2 %v902_v5, %s3361_s18 }
 0xc46   :  { %v964_v23 = vpop.f32.mrf.mxu0 (%p304_p0) }
 0xc47   :  { %985 = vmatpush.msrb.mxu1 (%p304_p0), %v964_v23 }
 0xc48   :  { %2924 = vmatmul.msk.f32.vlgmr.msrb.gmra.mxu1 (%p304_p0), %vm331_vm6, %v3548_v49 }
 0xc50   :  { %2925 = vmatmul.msk.f32.gmra.mxu1 (%p304_p0), %vm331_vm6, %v3551_v37 }
 0xc99   : > { %v910_v6 = vpop.permute.xlu2 %909 }
 0xc9a   : > { %v914_v7 = vadd.f32 %v910_v6, %v3785_v13  ;;  %v919_v13 = vsub.f32 1.0, %v3788_v52  ;;  %v4784_v52 = vmov %v4778_v36 }
 0xc9c   : > { %3153 = vtanh.f32 %v914_v7 }
 0xca2   : > { %v3154_v8 = vpop.eup %3153 }
 0xca3   : > { %925 = vrot.lane.b32.xlu1 %v3154_v8, %s3362_s25 }
 0xca9   : > { %v908_v9 = vpop.permute.xlu1 %907 }
 0xcaa   : > { %v913_v11 = vadd.f32 %v908_v9, %v3782_v10 }
 0xcab   :  { %997 = vrot.lane.b32.xlu1 (%p304_p0), %v967_v22, %s3365_s14 }
 0xcac   : > { %3155 = vtanh.f32 %v913_v11 }
 0xcb2   : > { %v3156_v12 = vpop.eup %3155 }
 0xcb3   : > { %923 = vrot.lane.b32.xlu0 %v3156_v12, %s3362_s25  ;;  %s3366_s25 = smov (%p304_p0), 112  }
 0xcb4   :  { %1105 = vrot.lane.b32.xlu2 (%p304_p0), %v4778_v36, %s3366_s25 }
 0xcbb   :  { %995 = vrot.lane.b32.xlu0 (%p304_p0), %v964_v23, %s3365_s14 }
 0xcbc   :  { %1103 = vrot.lane.b32.xlu2 (%p304_p0), %v4779_v40, %s3366_s25 }
 0xcc5   :  { %v987_v27 = vpop.f32.mrf.mxu1 (%p304_p0) }
 0xcc6   :  { %1003 = vrot.lane.b32.xlu0 (%p304_p0), %v987_v27, %s3367_s17 }
 0xccd   :  { %v990_v39 = vpop.f32.mrf.mxu1 (%p304_p0) }
 0xcce   :  { %1005 = vrot.lane.b32.xlu1 (%p304_p0), %v990_v39, %s3367_s17 }
 0xd0e   :  { %v1106_v5 = vpop.permute.xlu2 (%p304_p0), %1105 }
 0xd15   : > { %v926_v15 = vpop.permute.xlu1 %925 }
 0xd16   : > { %v930_v17 = vmul.f32 %v926_v15, %v920_v14  ;;  %v1104_v22 = vpop.permute.xlu2 (%p304_p0), %1103 }
 0xd18   : > { %v3834_v38 = vadd.f32 %v930_v17, %v918_v16  }
 0xd1a   : > { %v4780_v18 = vmov %v3834_v38 }
 0xd1b   : > { %v4782_v38 = vmov %v4780_v18 }
 0xd1c   :  { %v3874_v38 = vld [vmem:[%s4767_s5 + $0x118] sm:$0xff] (%p304_p0) }
 0xd1d   :  { %1044 = vmatpush.msra.mxu2 (%p304_p0), %v3874_v38  ;;  %v998_v42 = vpop.permute.xlu1 (%p304_p0), %997 }
 0xd1e   :  { %v1011_v45 = vsel (%p304_p0), %vm402_vm7, %v940_v44, %v998_v42  ;;  %v3988_v42 = vld [vmem:[%s4768_s6 + $0x88] sm:$0xff] (%p304_p0) }
 0xd1f   :  { %1201 = vmatpush.msra.mxu1 (%p304_p0), %v3988_v42  ;;  %v4011_v44 = vld [vmem:[%s4768_s6 + $0x68] sm:$0xff] (%p304_p0) }
 0xd25   : > { %v924_v19 = vpop.permute.xlu0 %923 }
 0xd26   : > { %v929_v21 = vmul.f32 %v924_v19, %v919_v13 }
 0xd27   :  { %306 = sbr.rel (!%p304_p0) target bundleno = 517 (0x205), region = 103 }
 0xd28   : > { %v3839_v51 = vadd.f32 %v929_v21, %v917_v20  }
 0xd2a   : > { %v4781_v10 = vmov %v3839_v51 }
 0xd2b   : > { %v4783_v51 = vmov %v4781_v10 }
 0xd2c   :  { %v3879_v51 = vld [vmem:[%s4767_s5 + $0x110] sm:$0xff] }
 0xd2d   :  { %1045 = vmatpush.msra.mxu2 %v3879_v51  ;;  %v996_v34 = vpop.permute.xlu0 %995 }
 0xd2e   :  { %v1010_v52 = vsel %vm402_vm7, %v939_v41, %v996_v34 }
 0xd2f   :  { %1046 = vmatpush.msra.mxu2 %v3885_v24 }
 0xd31   :  { %1047 = vmatpush.msra.mxu2 %v3891_v25 }
 0xd33   :  { %1048 = vmatpush.msra.mxu2 %v3897_v26 }
 0xd35   :  { %1049 = vmatpush.msra.mxu2 %v3903_v28 }
 0xd37   :  { %1050 = vmatpush.msra.mxu2 %v3909_v29 }
 0xd38   :  { %v1004_v43 = vpop.permute.xlu0 %1003 }
 0xd39   :  { %1051 = vmatpush.msra.mxu2 %v3915_v31  ;;  %v1013_v53 = vsel %vm405_vm9, %v1010_v52, %v1004_v43  ;;  %v3993_v52 = vld [vmem:[%s4768_s6 + $0x80] sm:$0xff]  ;;  %v3999_v43 = vld [vmem:[%s4768_s6 + $0x78] sm:$0xff] }
 0xd3a   :  { %1202 = vmatpush.msra.mxu1 %v3993_v52 }
 0xd3b   :  { %1052 = vmatpush.msra.mxu2 %v3921_v32 }
 0xd3c   :  { %1203 = vmatpush.msra.mxu1 %v3999_v43 }
 0xd3d   :  { %1053 = vmatpush.msra.mxu2 %v3927_v33 }
 0xd3f   :  { %1054 = vmatpush.msra.mxu2 %v3933_v35 }
 0xd40   :  { %v1006_v46 = vpop.permute.xlu1 %1005 }
 0xd41   :  { %1055 = vmatpush.msra.mxu2 %v3946_v30  ;;  %v1014_v47 = vsel %vm405_vm9, %v1011_v45, %v1006_v46 }
 0xd42   :  { %2939 = vmatmul.msk.f32.vlgmr.msra.gmra.mxu2 %vm424_vm8, %v1013_v53  ;;  %v4005_v53 = vld [vmem:[%s4768_s6 + $0x70] sm:$0xff] }
 0xd43   :  { %1204 = vmatpush.msra.mxu1 %v4005_v53 }
 0xd45   :  { %1205 = vmatpush.msra.mxu1 %v4011_v44 }
 0xd4a   :  { %2940 = vmatmul.msk.f32.gmra.mxu2 %vm424_vm8, %v1014_v47  ;;  %v4020_v47 = vld [vmem:[%s4768_s6 + $0x60] sm:$0xff] }
 0xd4b   :  { %1206 = vmatpush.msra.mxu1 %v4020_v47 }
 0xdc5   :  { %v1057_v50 = vpop.f32.mrf.mxu2 }
 0xdc6   :  { %v3965_v54 = vadd.f32 %v3962_v48, %v1057_v50 }
 0xdc8   :  { %v2941_v55 = vmul.f32 -1.442695, %v3965_v54 }
 0xdca   :  { %3164 = vpow2.f32 %v2941_v55 }
 0xdcd   :  { %v1060_v56 = vpop.f32.mrf.mxu2 }
 0xdce   :  { %v3969_v57 = vadd.f32 %v3962_v48, %v1060_v56 }
 0xdd0   :  { %v3165_v59 = vpop.eup %3164  ;;  %v2942_v60 = vmul.f32 -1.442695, %v3969_v57 }
 0xdd1   :  { %v1069_v61 = vadd.f32 1.0, %v3165_v59 }
 0xdd2   :  { %3166 = vpow2.f32 %v2942_v60 }
 0xdd3   :  { %3168 = vrcp.f32 %v1069_v61  ;;  %vm1076_vm4 = vweird.f32 %v1069_v61  ;;  %v1082_v11 = vand.u32 2147483648, %v1069_v61  ;;  %v1080_v15 = vand.u32 2147483647, %v1069_v61 }
 0xdd5   :  { %v1083_v19 = vor.u32 1.1754944e-38, %v1082_v11  ;;  %vm1081_vm14 = vcmp.eq.f32.partialorder %v1080_v15, 8.507059e+37 }
 0xdd8   :  { %v3167_v62 = vpop.eup %3166 }
 0xdd9   :  { %v3169_v63 = vpop.eup %3168  ;;  %v1070_v0 = vadd.f32 1.0, %v3167_v62 }
 0xdda   :  { %v1072_v1 = vmul.f32 %v3169_v63, %v1069_v61  ;;  %vm1077_vm2 = vweird.f32 %v3169_v63 }
 0xddb   :  { %3170 = vrcp.f32 %v1070_v0  ;;  %v1097_v9 = vand.u32 2147483648, %v1070_v0  ;;  %v1095_v14 = vand.u32 2147483647, %v1070_v0  ;;  %vm1078_vm10 = vmor %vm1076_vm4, %vm1077_vm2  ;;  %vm1091_vm11 = vweird.f32 %v1070_v0 }
 0xddc   :  { %v1073_v2 = vsub.f32 1.0, %v1072_v1 }
 0xddd   :  { %v1098_v13 = vor.u32 1.1754944e-38, %v1097_v9  ;;  %vm1096_vm13 = vcmp.eq.f32.partialorder %v1095_v14, 8.507059e+37 }
 0xdde   :  { %v1074_v3 = vmul.f32 %v3169_v63, %v1073_v2 }
 0xde0   :  { %v1075_v8 = vadd.f32 %v3169_v63, %v1074_v3 }
 0xde1   :  { %v3171_v4 = vpop.eup %3170 }
 0xde2   :  { %v1087_v6 = vmul.f32 %v3171_v4, %v1070_v0  ;;  %vm1092_vm5 = vweird.f32 %v3171_v4  ;;  %v1079_v17 = vsel %vm1078_vm10, %v3169_v63, %v1075_v8 }
 0xde3   :  { %vm1093_vm12 = vmor %vm1091_vm11, %vm1092_vm5  ;;  %v1084_v23 = vsel %vm1081_vm14, %v1083_v19, %v1079_v17 }
 0xde4   :  { %v1088_v7 = vsub.f32 1.0, %v1087_v6  ;;  %v1109_v39 = vmul.f32 %v1104_v22, %v1084_v23  ;;  %v1228_v8 = vsub.f32 1.0, %v1084_v23  ;;  %v1226_v11 = vmul.f32 %v1084_v23, %v4779_v40  ;;  %v4072_v22 = vld [vmem:[%s4767_s5 + $0x178] sm:$0xff]  ;;  %v4077_v23 = vld [vmem:[%s4767_s5 + $0x170] sm:$0xff] }
 0xde5   :  { %1346 = vmatpush.msrb.mxu1 %v4072_v22 }
 0xde6   :  { %v1089_v12 = vmul.f32 %v3171_v4, %v1088_v7 }
 0xde7   :  { %1347 = vmatpush.msrb.mxu1 %v4077_v23 }
 0xde8   :  { %v1090_v16 = vadd.f32 %v3171_v4, %v1089_v12 }
 0xdea   :  { %v1094_v20 = vsel %vm1093_vm12, %v3171_v4, %v1090_v16 }
 0xdeb   :  { %v3972_v21 = vsel %vm1096_vm13, %v1098_v13, %v1094_v20 }
 0xdec   :  { %v1110_v27 = vmul.f32 %v1106_v5, %v3972_v21 }
 0xdee   :  { %1125 = vmatpush.msra.mxu3 %v1110_v27 }
 0xdf0   :  { %1126 = vmatpush.msra.mxu3 %v1109_v39 }
 0xdf1   :  { %2943 = vmatmul.msk.f32.vlgmr.msra.gmra.mxu3 %vm331_vm6, %v3548_v49 }
 0xdf9   :  { %2944 = vmatmul.msk.f32.gmra.mxu3 %vm331_vm6, %v3551_v37 }
 0xe74   :  { %v1128_v34 = vpop.f32.mrf.mxu3 }
 0xe75   :  { %1159 = vrot.lane.b32.xlu0 %v1128_v34, %s3368_s21 }
 0xe7c   :  { %v1131_v41 = vpop.f32.mrf.mxu3 }
 0xe7d   :  { %1161 = vrot.lane.b32.xlu2 %v1131_v41, %s3368_s21  ;;  %1148 = vmatpush.msrb.mxu0 %v1131_v41  ;;  %v4101_v41 = vld [vmem:[%s4767_s5 + $0x150] sm:$0xff] }
 0xe7f   :  { %1149 = vmatpush.msrb.mxu0 %v1128_v34  ;;  %v4095_v34 = vld [vmem:[%s4767_s5 + $0x158] sm:$0xff] }
 0xe80   :  { %2945 = vmatmul.msk.f32.vlgmr.msrb.gmra.mxu0 %vm331_vm6, %v3548_v49 }
 0xe88   :  { %2946 = vmatmul.msk.f32.gmra.mxu0 %vm331_vm6, %v3551_v37 }
 0xed7   :  { %v1162_v60 = vpop.permute.xlu2 %1161 }
 0xed8   :  { %v1174_v61 = vsel %vm331_vm6, %v1110_v27, %v1162_v60  ;;  %v4083_v27 = vld [vmem:[%s4767_s5 + $0x168] sm:$0xff] }
 0xed9   :  { %1348 = vmatpush.msrb.mxu1 %v4083_v27 }
 0xee7   :  { %v1160_v50 = vpop.permute.xlu0 %1159 }
 0xee8   :  { %v1173_v55 = vsel %vm331_vm6, %v1109_v39, %v1160_v50  ;;  %v4089_v39 = vld [vmem:[%s4767_s5 + $0x160] sm:$0xff]  ;;  %v4119_v50 = vld [vmem:[%s4767_s5 + $0x138] sm:$0xff] }
 0xee9   :  { %1349 = vmatpush.msrb.mxu1 %v4089_v39 }
 0xeeb   :  { %1350 = vmatpush.msrb.mxu1 %v4095_v34 }
 0xeed   :  { %1351 = vmatpush.msrb.mxu1 %v4101_v41 }
 0xefd   :  { %v1151_v45 = vpop.f32.mrf.mxu0 }
 0xefe   :  { %1167 = vrot.lane.b32.xlu1 %v1151_v45, %s3365_s14  ;;  %v4107_v45 = vld [vmem:[%s4767_s5 + $0x148] sm:$0xff] }
 0xeff   :  { %1352 = vmatpush.msrb.mxu1 %v4107_v45 }
 0xf05   :  { %v1154_v46 = vpop.f32.mrf.mxu0 }
 0xf06   :  { %1169 = vrot.lane.b32.xlu0 %v1154_v46, %s3365_s14  ;;  %v4113_v46 = vld [vmem:[%s4767_s5 + $0x140] sm:$0xff] }
 0xf07   :  { %1353 = vmatpush.msrb.mxu1 %v4113_v46 }
 0xf09   :  { %1354 = vmatpush.msrb.mxu1 %v4119_v50 }
 0xf70   :  { %v1168_v56 = vpop.permute.xlu1 %1167 }
 0xf71   :  { %v1175_v59 = vsel %vm402_vm7, %v1173_v55, %v1168_v56  ;;  %v4125_v55 = vld [vmem:[%s4767_s5 + $0x130] sm:$0xff]  ;;  %v4131_v56 = vld [vmem:[%s4767_s5 + $0x128] sm:$0xff] }
 0xf72   :  { %2953 = vmatmul.msk.f32.vlgmr.msra.gmra.mxu1 %vm574_vm3, %v1175_v59 }
 0xf73   :  { %1355 = vmatpush.msrb.mxu1 %v4125_v55 }
 0xf75   :  { %1356 = vmatpush.msrb.mxu1 %v4131_v56 }
 0xf78   :  { %v1170_v62 = vpop.permute.xlu0 %1169 }
 0xf79   :  { %v1176_v63 = vsel %vm402_vm7, %v1174_v61, %v1170_v62  ;;  %v4142_v61 = vld [vmem:[%s4767_s5 + $0x120] sm:$0xff] }
 0xf7a   :  { %2954 = vmatmul.msk.f32.gmra.mxu1 %vm574_vm3, %v1176_v63 }
 0xf7b   :  { %1357 = vmatpush.msrb.mxu1 %v4142_v61 }
 0xfef   :  { %v1208_v0 = vpop.f32.mrf.mxu1 }
 0xff0   :  { %1216 = vrot.lane.b32.xlu2 %v1208_v0, %s3365_s14 }
 0xff7   :  { %v1211_v1 = vpop.f32.mrf.mxu1 }
 0xff8   :  { %1218 = vrot.lane.b32.xlu1 %v1211_v1, %s3365_s14 }
0x104a   :  { %v1217_v2 = vpop.permute.xlu2 %1216 }
0x104b   :  { %v1222_v3 = vadd.f32 %v1217_v2, %v3965_v54  ;;  %v1229_v54 = vsub.f32 1.0, %v3972_v21 }
0x104d   :  { %3172 = vtanh.f32 %v1222_v3 }
0x1053   :  { %v3173_v4 = vpop.eup %3172 }
0x1054   :  { %1232 = vrot.lane.b32.xlu1 %v3173_v4, %s3366_s25 }
0x106a   :  { %v1219_v5 = vpop.permute.xlu1 %1218 }
0x106b   :  { %v1223_v6 = vadd.f32 %v1219_v5, %v3969_v57  ;;  %v1227_v57 = vmul.f32 %v3972_v21, %v4778_v36 }
0x106d   :  { %3174 = vtanh.f32 %v1223_v6  ;;  %v4154_v6 = vld [vmem:[%s4769_s7 + $0x3] ss:$0 sm:$0xff] }
0x1073   :  { %v3175_v7 = vpop.eup %3174 }
0x1074   :  { %1234 = vrot.lane.b32.xlu0 %v3175_v7, %s3366_s25 }
0x10c6   :  { %v1233_v9 = vpop.permute.xlu1 %1232 }
0x10c7   :  { %v1238_v12 = vmul.f32 %v1233_v9, %v1228_v8 }
0x10c9   :  { %v4036_v14 = vadd.f32 %v1238_v12, %v1226_v11 }
0x10cb   :  { %1244 = vrot.lane.b32.xlu0 %v4036_v14, %s3366_s25 }
0x10e6   :  { %v1235_v15 = vpop.permute.xlu0 %1234 }
0x10e7   :  { %v1239_v16 = vmul.f32 %v1235_v15, %v1229_v54 }
0x10e9   :  { %v4043_v17 = vadd.f32 %v1239_v16, %v1227_v57 }
0x10eb   :  { %1246 = vrot.lane.b32.xlu2 %v4043_v17, %s3366_s25 }
0x113d   :  { %v4047_v13 = vpop.permute.xlu0 %1244 }
0x113e   :  { %v1250_v20 = vsel %vm331_vm6, %v4047_v13, %v4781_v10 }
0x1145   :  { %v4049_v40 = vpop.permute.xlu2 %1246 }
0x1146   :  { %v1251_v19 = vsel %vm331_vm6, %v4049_v40, %v4780_v18 }
0x1147   :  { %1266 = vmatpush.msrb.mxu3 %v1251_v19 }
0x1149   :  { %1267 = vmatpush.msrb.mxu3 %v1250_v20 }
0x114a   :  { %2955 = vmatmul.msk.f32.vlgmr.msrb.gmra.mxu3 %vm331_vm6, %v3548_v49 }
0x1152   :  { %2956 = vmatmul.msk.f32.gmra.mxu3 %vm331_vm6, %v3551_v37 }
0x11cd   :  { %v1269_v36 = vpop.f32.mrf.mxu3 }
0x11ce   :  { %1300 = vrot.lane.b32.xlu1 %v1269_v36, %s3365_s14 }
0x11d5   :  { %v1272_v21 = vpop.f32.mrf.mxu3 }
0x11d6   :  { %1302 = vrot.lane.b32.xlu0 %v1272_v21, %s3365_s14  ;;  %1289 = vmatpush.msra.mxu0 %v1272_v21 }
0x11d8   :  { %1290 = vmatpush.msra.mxu0 %v1269_v36 }
0x11d9   :  { %2957 = vmatmul.msk.f32.vlgmr.msra.gmra.mxu0 %vm331_vm6, %v3548_v49 }
0x11de   :  { %1405 = vrot.lane.b32.xlu0 %v4781_v10, %s3366_s25 }
0x11e1   :  { %2958 = vmatmul.msk.f32.gmra.mxu0 %vm331_vm6, %v3551_v37 }
0x1240   :  { %v1301_v62 = vpop.permute.xlu1 %1300 }
0x1241   :  { %v1314_v63 = vsel %vm402_vm7, %v1250_v20, %v1301_v62 }
0x1248   :  { %v1303_v2 = vpop.permute.xlu0 %1302 }
0x1249   :  { %v1315_v3 = vsel %vm402_vm7, %v1251_v19, %v1303_v2 }
0x1256   :  { %v1292_v59 = vpop.f32.mrf.mxu0 }
0x1257   :  { %1308 = vrot.lane.b32.xlu2 %v1292_v59, %s3367_s17 }
0x125e   :  { %v1295_v60 = vpop.f32.mrf.mxu0 }
0x125f   :  { %1310 = vrot.lane.b32.xlu1 %v1295_v60, %s3367_s17  ;;  %1407 = vrot.lane.b32.xlu2 %v4780_v18, %s3366_s25 }
0x12b1   :  { %v1309_v0 = vpop.permute.xlu2 %1308 }
0x12b2   :  { %v1316_v1 = vsel %vm405_vm9, %v1314_v63, %v1309_v0 }
0x12b3   :  { %2972 = vmatmul.msk.f32.vlgmr.msrb.gmra.mxu1 %vm424_vm8, %v1316_v1 }
0x12d1   :  { %v1311_v4 = vpop.permute.xlu1 %1310 }
0x12d2   :  { %v1317_v5 = vsel %vm405_vm9, %v1315_v3, %v1311_v4 }
0x12d3   :  { %2973 = vmatmul.msk.f32.gmra.mxu1 %vm424_vm8, %v1317_v5 }
0x1330   :  { %v1359_v7 = vpop.f32.mrf.mxu1 }
0x1331   :  { %v4157_v8 = vadd.f32 %v4154_v6, %v1359_v7 }
0x1333   :  { %v2974_v9 = vmul.f32 -1.442695, %v4157_v8 }
0x1335   :  { %3176 = vpow2.f32 %v2974_v9 }
0x133b   :  { %v3177_v11 = vpop.eup %3176 }
0x133c   :  { %v1371_v12 = vadd.f32 1.0, %v3177_v11 }
0x133e   :  { %3178 = vrcp.f32 %v1371_v12  ;;  %vm1378_vm1 = vweird.f32 %v1371_v12  ;;  %v1384_v1 = vand.u32 2147483648, %v1371_v12  ;;  %v1382_v3 = vand.u32 2147483647, %v1371_v12 }
0x1340   :  { %v1385_v11 = vor.u32 1.1754944e-38, %v1384_v1  ;;  %vm1383_vm11 = vcmp.eq.f32.partialorder %v1382_v3, 8.507059e+37  ;;  %v4200_v1 = vld [vmem:[%s4768_s6 + $0xa0] sm:$0xff] }
0x1344   :  { %v3179_v16 = vpop.eup %3178 }
0x1345   :  { %v1374_v20 = vmul.f32 %v3179_v16, %v1371_v12  ;;  %vm1379_vm15 = vweird.f32 %v3179_v16 }
0x1346   :  { %vm1380_vm4 = vmor %vm1378_vm1, %vm1379_vm15 }
0x1347   :  { %v1375_v21 = vsub.f32 1.0, %v1374_v20  ;;  %v1406_v20 = vpop.permute.xlu0 %1405 }
0x1349   :  { %v1376_v59 = vmul.f32 %v3179_v16, %v1375_v21 }
0x134b   :  { %v1377_v63 = vadd.f32 %v3179_v16, %v1376_v59 }
0x134d   :  { %v1381_v7 = vsel %vm1380_vm4, %v3179_v16, %v1377_v63  ;;  %v4188_v63 = vld [vmem:[%s4768_s6 + $0xb0] sm:$0xff] }
0x134e   :  { %v4164_v21 = vsel %vm1383_vm11, %v1385_v11, %v1381_v7 }
0x1350   :  { %v1362_v54 = vpop.f32.mrf.mxu1 }
0x1351   :  { %v4161_v15 = vadd.f32 %v4154_v6, %v1362_v54  ;;  %v1408_v54 = vpop.permute.xlu2 %1407 }
0x1353   :  { %v2975_v57 = vmul.f32 -1.442695, %v4161_v15 }
0x1355   :  { %3180 = vpow2.f32 %v2975_v57 }
0x135b   :  { %v3181_v19 = vpop.eup %3180 }
0x135c   :  { %v1372_v36 = vadd.f32 1.0, %v3181_v19 }
0x135e   :  { %3182 = vrcp.f32 %v1372_v36  ;;  %v1399_v2 = vand.u32 2147483648, %v1372_v36  ;;  %v1397_v5 = vand.u32 2147483647, %v1372_v36  ;;  %vm1393_vm5 = vweird.f32 %v1372_v36 }
0x1360   :  { %v1400_v57 = vor.u32 1.1754944e-38, %v1399_v2  ;;  %vm1398_vm12 = vcmp.eq.f32.partialorder %v1397_v5, 8.507059e+37  ;;  %v4206_v2 = vld [vmem:[%s4768_s6 + $0x98] sm:$0xff]  ;;  %v4215_v5 = vld [vmem:[%s4768_s6 + $0x90] sm:$0xff] }
0x1364   :  { %v3183_v60 = vpop.eup %3182 }
0x1365   :  { %v1389_v62 = vmul.f32 %v3183_v60, %v1372_v36  ;;  %vm1394_vm2 = vweird.f32 %v3183_v60 }
0x1366   :  { %vm1395_vm10 = vmor %vm1393_vm5, %vm1394_vm2 }
0x1367   :  { %v1390_v0 = vsub.f32 1.0, %v1389_v62  ;;  %v1411_v62 = vmul.f32 %v1406_v20, %v4164_v21 }
0x1369   :  { %v1391_v4 = vmul.f32 %v3183_v60, %v1390_v0  ;;  %v4194_v0 = vld [vmem:[%s4768_s6 + $0xa8] sm:$0xff] }
0x136b   :  { %v1392_v9 = vadd.f32 %v3183_v60, %v1391_v4 }
0x136d   :  { %v1396_v19 = vsel %vm1395_vm10, %v3183_v60, %v1392_v9  ;;  %v4183_v60 = vld [vmem:[%s4768_s6 + $0xb8] sm:$0xff]  ;;  %v4277_v9 = vld [vmem:[%s4770_s8] sm:$0xff] }
0x136e   :  { %v4166_v59 = vsel %vm1398_vm12, %v1400_v57, %v1396_v19  ;;  %1502 = vmatpush.msrb.mxu0 %v4183_v60  ;;  %v4288_v57 = vld [vmem:[#allocation2] ss:$0 sm:$0xff] }
0x136f   :  { %v1412_v12 = vmul.f32 %v1408_v54, %v4166_v59 }
0x1370   :  { %1503 = vmatpush.msrb.mxu0 %v4188_v63 }
0x1371   :  { %1427 = vmatpush.msra.mxu3 %v1412_v12 }
0x1372   :  { %1504 = vmatpush.msrb.mxu0 %v4194_v0 }
0x1373   :  { %1428 = vmatpush.msra.mxu3 %v1411_v62 }
0x1374   :  { %2976 = vmatmul.msk.f32.vlgmr.msra.gmra.mxu3 %vm331_vm6, %v3548_v49  ;;  %1505 = vmatpush.msrb.mxu0 %v4200_v1 }
0x1376   :  { %1506 = vmatpush.msrb.mxu0 %v4206_v2 }
0x1378   :  { %1507 = vmatpush.msrb.mxu0 %v4215_v5 }
0x137a   :  { %1673 = vmatpush.msra.mxu0 %v3874_v38 }
0x137c   :  { %2977 = vmatmul.msk.f32.gmra.mxu3 %vm331_vm6, %v3551_v37  ;;  %1674 = vmatpush.msra.mxu0 %v3879_v51 }
0x137e   :  { %1675 = vmatpush.msra.mxu0 %v3885_v24 }
0x1380   :  { %1676 = vmatpush.msra.mxu0 %v3891_v25 }
0x1382   :  { %1677 = vmatpush.msra.mxu0 %v3897_v26 }
0x1384   :  { %1678 = vmatpush.msra.mxu0 %v3903_v28 }
0x1386   :  { %1679 = vmatpush.msra.mxu0 %v3909_v29 }
0x1388   :  { %1680 = vmatpush.msra.mxu0 %v3915_v31 }
0x138a   :  { %1681 = vmatpush.msra.mxu0 %v3921_v32 }
0x138c   :  { %1682 = vmatpush.msra.mxu0 %v3927_v33 }
0x138e   :  { %1683 = vmatpush.msra.mxu0 %v3933_v35 }
0x1390   :  { %1684 = vmatpush.msra.mxu0 %v3946_v30 }
0x13f7   :  { %v1430_v16 = vpop.f32.mrf.mxu3 }
0x13f8   :  { %1461 = vrot.lane.b32.xlu1 %v1430_v16, %s3368_s21 }
0x13ff   :  { %v1433_v36 = vpop.f32.mrf.mxu3 }
0x1400   :  { %1463 = vrot.lane.b32.xlu0 %v1433_v36, %s3368_s21  ;;  %1450 = vmatpush.msrb.mxu2 %v1433_v36 }
0x1402   :  { %1451 = vmatpush.msrb.mxu2 %v1430_v16 }
0x1403   :  { %2978 = vmatmul.msk.f32.vlgmr.msrb.gmra.mxu2 %vm331_vm6, %v3548_v49 }
0x140b   :  { %2979 = vmatmul.msk.f32.gmra.mxu2 %vm331_vm6, %v3551_v37 }
0x146a   :  { %v1462_v38 = vpop.permute.xlu1 %1461 }
0x146b   :  { %v1475_v51 = vsel %vm331_vm6, %v1411_v62, %v1462_v38 }
0x1472   :  { %v1464_v26 = vpop.permute.xlu0 %1463 }
0x1473   :  { %v1476_v28 = vsel %vm331_vm6, %v1412_v12, %v1464_v26 }
0x1486   :  { %v1453_v3 = vpop.f32.mrf.mxu2 }
0x1487   :  { %1469 = vrot.lane.b32.xlu2 %v1453_v3, %s3365_s14 }
0x148e   :  { %v1456_v4 = vpop.f32.mrf.mxu2 }
0x148f   :  { %1471 = vrot.lane.b32.xlu1 %v1456_v4, %s3365_s14 }
0x14e1   :  { %v1470_v24 = vpop.permute.xlu2 %1469 }
0x14e2   :  { %v1477_v25 = vsel %vm402_vm7, %v1475_v51, %v1470_v24 }
0x14e3   :  { %2986 = vmatmul.msk.f32.vlgmr.msrb.gmra.mxu0 %vm574_vm3, %v1477_v25 }
0x14e4   :  { %1941 = vmatpush.msrb.mxu0 %v4072_v22 }
0x14e6   :  { %1942 = vmatpush.msrb.mxu0 %v4077_v23 }
0x14e8   :  { %1943 = vmatpush.msrb.mxu0 %v4083_v27 }
0x14ea   :  { %1944 = vmatpush.msrb.mxu0 %v4089_v39 }
0x14ec   :  { %1945 = vmatpush.msrb.mxu0 %v4095_v34 }
0x14ee   :  { %1946 = vmatpush.msrb.mxu0 %v4101_v41  ;;  %v1529_v41 = vsub.f32 1.0, %v4164_v21 }
0x14f0   :  { %1947 = vmatpush.msrb.mxu0 %v4107_v45 }
0x14f2   :  { %1948 = vmatpush.msrb.mxu0 %v4113_v46  ;;  %v1527_v46 = vmul.f32 %v4164_v21, %v4781_v10 }
0x14f4   :  { %1949 = vmatpush.msrb.mxu0 %v4119_v50 }
0x14f6   :  { %1950 = vmatpush.msrb.mxu0 %v4125_v55 }
0x14f8   :  { %1951 = vmatpush.msrb.mxu0 %v4131_v56  ;;  %v4264_v56 = vld [vmem:[%s4770_s8 + $0x8] sm:$0xff] }
0x14f9   :  { %1570 = vmatpush.msrb.mxu3 %v4264_v56 }
0x14fa   :  { %1952 = vmatpush.msrb.mxu0 %v4142_v61  ;;  %v1530_v61 = vsub.f32 1.0, %v4166_v59 }
0x14fb   :  { %1571 = vmatpush.msrb.mxu3 %v4277_v9 }
0x1501   :  { %v1472_v29 = vpop.permute.xlu1 %1471 }
0x1502   :  { %v1478_v31 = vsel %vm402_vm7, %v1476_v28, %v1472_v29 }
0x1503   :  { %2987 = vmatmul.msk.f32.gmra.mxu0 %vm574_vm3, %v1478_v31 }
0x1560   :  { %v1509_v32 = vpop.f32.mrf.mxu0 }
0x1561   :  { %1517 = vrot.lane.b32.xlu2 %v1509_v32, %s3365_s14 }
0x1580   :  { %v1512_v33 = vpop.f32.mrf.mxu0 }
0x1581   :  { %1519 = vrot.lane.b32.xlu0 %v1512_v33, %s3365_s14 }
0x15bb   :  { %v1518_v35 = vpop.permute.xlu2 %1517 }
0x15bc   :  { %v1523_v22 = vadd.f32 %v1518_v35, %v4157_v8 }
0x15be   :  { %3184 = vtanh.f32 %v1523_v22 }
0x15c4   :  { %v3185_v23 = vpop.eup %3184 }
0x15c5   :  { %1533 = vrot.lane.b32.xlu1 %v3185_v23, %s3366_s25 }
0x15f3   :  { %v1520_v27 = vpop.permute.xlu0 %1519 }
0x15f4   :  { %v1524_v39 = vadd.f32 %v1520_v27, %v4161_v15  ;;  %v1528_v15 = vmul.f32 %v4166_v59, %v4780_v18  ;;  %v3369_v18 = vmov 0  }
0x15f5   :  { %3158 = vset.pattern.permute.xlu0 %v3369_v18  ;;  %3157 = vset.pattern.permute.xlu2 %v3369_v18 }
0x15f6   :  { %3186 = vtanh.f32 %v1524_v39  ;;  %3159 = vset.pattern.permute.xlu1 %v3369_v18 }
0x15fc   :  { %v3187_v34 = vpop.eup %3186 }
0x15fd   :  { %1535 = vrot.lane.b32.xlu2 %v3187_v34, %s3366_s25 }
0x1637   :  { %v1534_v45 = vpop.permute.xlu1 %1533 }
0x1638   :  { %v1539_v50 = vmul.f32 %v1534_v45, %v1529_v41 }
0x163a   :  { %v4257_v55 = vadd.f32 %v1539_v50, %v1527_v46 }
0x163c   :  { %1548 = vrot.lane.b32.xlu0 %v4257_v55, %s3366_s25 }
0x1657   :  { %v1536_v8 = vpop.permute.xlu2 %1535 }
0x1658   :  { %v1540_v10 = vmul.f32 %v1536_v8, %v1530_v61 }
0x165a   :  { %v4270_v7 = vadd.f32 %v1540_v10, %v1528_v15 }
0x165c   :  { %1550 = vrot.lane.b32.xlu1 %v4270_v7, %s3366_s25 }
0x16ae   :  { %v4280_v11 = vpop.permute.xlu0 %1548 }
0x16af   :  { %2988 = vmatmul.msk.f32.vlgmr.msrb.gmra.mxu3 %vm331_vm6, %v4280_v11 }
0x16ce   :  { %v4284_v54 = vpop.permute.xlu1 %1550 }
0x16cf   :  { %2989 = vmatmul.msk.f32.gmra.mxu3 %vm331_vm6, %v4284_v54 }
0x1732   :  { %v1573_v19 = vpop.f32.mrf.mxu3 }
0x1733   :  { %v1574_v20 = vadd.f32 %v4288_v57, %v1573_v19 }
0x1735   :  { %1582 = vperm.xlu0 %3158, %v1574_v20  }
0x1752   :  { %v1576_v21 = vpop.f32.mrf.mxu3 }
0x1753   :  { %v1577_v59 = vadd.f32 %v4288_v57, %v1576_v21 }
0x1755   :  { %1587 = vperm.xlu2 %3157, %v1577_v59  }
0x17a7   :  { %v4292_v12 = vpop.permute.xlu0 %1582 }
0x17a8   :  { %v1593_v16 = vsel %vm318_vm0, %v4292_v12, 0.0 }
0x17a9   :  { %v1595_v4 = vsel %vm331_vm6, %v1593_v16, %v4036_v14 }
0x17af   :  { %v4294_v62 = vpop.permute.xlu2 %1587 }
0x17b0   :  { %v1594_v36 = vsel %vm318_vm0, %v4294_v62, 0.0 }
0x17b1   :  { %v1596_v3 = vsel %vm331_vm6, %v1594_v36, %v4043_v17 }
0x17b2   :  { %1611 = vmatpush.msra.mxu2 %v1596_v3 }
0x17b4   :  { %1612 = vmatpush.msra.mxu2 %v1595_v4 }
0x17b5   :  { %2990 = vmatmul.msk.f32.vlgmr.msra.gmra.mxu2 %vm331_vm6, %v3548_v49 }
0x17bd   :  { %2991 = vmatmul.msk.f32.gmra.mxu2 %vm331_vm6, %v3551_v37 }
0x1838   :  { %v1614_v38 = vpop.f32.mrf.mxu2 }
0x1839   :  { %1645 = vrot.lane.b32.xlu1 %v1614_v38, %s3365_s14 }
0x1840   :  { %v1617_v51 = vpop.f32.mrf.mxu2 }
0x1841   :  { %1647 = vrot.lane.b32.xlu1 %v1617_v51, %s3365_s14  ;;  %1634 = vmatpush.msra.mxu1 %v1617_v51 }
0x1843   :  { %1635 = vmatpush.msra.mxu1 %v1614_v38 }
0x1844   :  { %2992 = vmatmul.msk.f32.vlgmr.msra.gmra.mxu1 %vm331_vm6, %v3548_v49 }
0x1845   :  { %1814 = vmatpush.msrb.mxu1 %v3988_v42 }
0x1847   :  { %1815 = vmatpush.msrb.mxu1 %v3993_v52 }
0x1849   :  { %1816 = vmatpush.msrb.mxu1 %v3999_v43 }
0x184b   :  { %1817 = vmatpush.msrb.mxu1 %v4005_v53 }
0x184c   :  { %2993 = vmatmul.msk.f32.gmra.mxu1 %vm331_vm6, %v3551_v37 }
0x184d   :  { %1818 = vmatpush.msrb.mxu1 %v4011_v44 }
0x184f   :  { %1819 = vmatpush.msrb.mxu1 %v4020_v47 }
0x18ab   :  { %v1646_v42 = vpop.permute.xlu1 %1645 }
0x18ac   :  { %v1659_v52 = vsel %vm402_vm7, %v1595_v4, %v1646_v42 }
0x18b3   :  { %v1648_v53 = vpop.permute.xlu1 %1647 }
0x18b4   :  { %v1660_v28 = vsel %vm402_vm7, %v1596_v3, %v1648_v53 }
0x18c1   :  { %v1637_v24 = vpop.f32.mrf.mxu1 }
0x18c2   :  { %1653 = vrot.lane.b32.xlu2 %v1637_v24, %s3367_s17 }
0x18c9   :  { %v1640_v25 = vpop.f32.mrf.mxu1 }
0x18ca   :  { %1655 = vrot.lane.b32.xlu2 %v1640_v25, %s3367_s17 }
0x191c   :  { %v1654_v26 = vpop.permute.xlu2 %1653 }
0x191d   :  { %v1661_v43 = vsel %vm405_vm9, %v1659_v52, %v1654_v26 }
0x191e   :  { %2994 = vmatmul.msk.f32.vlgmr.msra.gmra.mxu0 %vm424_vm8, %v1661_v43 }
0x1924   :  { %v1656_v44 = vpop.permute.xlu2 %1655 }
0x1925   :  { %v1662_v47 = vsel %vm405_vm9, %v1660_v28, %v1656_v44 }
0x1926   :  { %2995 = vmatmul.msk.f32.gmra.mxu0 %vm424_vm8, %v1662_v47 }
0x199b   :  { %v1686_v29 = vpop.f32.mrf.mxu0 }
0x199c   :  { %v4331_v31 = vadd.f32 %v3962_v48, %v1686_v29 }
0x199e   :  { %v2996_v32 = vmul.f32 -1.442695, %v4331_v31 }
0x19a0   :  { %3188 = vpow2.f32 %v2996_v32 }
0x19a3   :  { %v1689_v33 = vpop.f32.mrf.mxu0 }
0x19a4   :  { %v4335_v35 = vadd.f32 %v3962_v48, %v1689_v33 }
0x19a6   :  { %v3189_v22 = vpop.eup %3188  ;;  %v2997_v23 = vmul.f32 -1.442695, %v4335_v35 }
0x19a7   :  { %v1698_v27 = vadd.f32 1.0, %v3189_v22 }
0x19a8   :  { %3190 = vpow2.f32 %v2997_v23 }
0x19a9   :  { %3192 = vrcp.f32 %v1698_v27  ;;  %vm1705_vm14 = vweird.f32 %v1698_v27  ;;  %v1711_v18 = vand.u32 2147483648, %v1698_v27  ;;  %v1709_v21 = vand.u32 2147483647, %v1698_v27 }
0x19ab   :  { %v1712_v3 = vor.u32 1.1754944e-38, %v1711_v18  ;;  %vm1710_vm10 = vcmp.eq.f32.partialorder %v1709_v21, 8.507059e+37 }
0x19ae   :  { %v3191_v39 = vpop.eup %3190 }
0x19af   :  { %v3193_v34 = vpop.eup %3192  ;;  %v1699_v41 = vadd.f32 1.0, %v3191_v39 }
0x19b0   :  { %v1701_v45 = vmul.f32 %v3193_v34, %v1698_v27  ;;  %vm1706_vm13 = vweird.f32 %v3193_v34 }
0x19b1   :  { %3194 = vrcp.f32 %v1699_v41  ;;  %v1726_v48 = vand.u32 2147483648, %v1699_v41  ;;  %v1724_v20 = vand.u32 2147483647, %v1699_v41  ;;  %vm1707_vm1 = vmor %vm1705_vm14, %vm1706_vm13  ;;  %vm1720_vm2 = vweird.f32 %v1699_v41 }
0x19b2   :  { %v1702_v46 = vsub.f32 1.0, %v1701_v45 }
0x19b3   :  { %v1727_v36 = vor.u32 1.1754944e-38, %v1726_v48  ;;  %vm1725_vm5 = vcmp.eq.f32.partialorder %v1724_v20, 8.507059e+37 }
0x19b4   :  { %v1703_v50 = vmul.f32 %v3193_v34, %v1702_v46 }
0x19b6   :  { %v1704_v10 = vadd.f32 %v3193_v34, %v1703_v50 }
0x19b7   :  { %v3195_v61 = vpop.eup %3194 }
0x19b8   :  { %v1716_v8 = vmul.f32 %v3195_v61, %v1699_v41  ;;  %vm1721_vm15 = vweird.f32 %v3195_v61  ;;  %v1708_v16 = vsel %vm1707_vm1, %v3193_v34, %v1704_v10 }
0x19b9   :  { %vm1722_vm4 = vmor %vm1720_vm2, %vm1721_vm15  ;;  %v1713_v51 = vsel %vm1710_vm10, %v1712_v3, %v1708_v16  ;;  %v3238_v16 = vld [vmem:[%s4767_s5 + $0x118] sm:$0xff] }
0x19ba   :  { %v1717_v15 = vsub.f32 1.0, %v1716_v8  ;;  %v1730_v25 = vmul.f32 %v1713_v51, %v4047_v13  ;;  %v1841_v46 = vsub.f32 1.0, %v1713_v51  ;;  %v3246_v3 = vld [vmem:[%s4767_s5 + $0xd8] sm:$0xff] }
0x19bc   :  { %v1718_v19 = vmul.f32 %v3195_v61, %v1717_v15 }
0x19be   :  { %v1719_v59 = vadd.f32 %v3195_v61, %v1718_v19 }
0x19c0   :  { %v1723_v4 = vsel %vm1722_vm4, %v3195_v61, %v1719_v59  ;;  %v1839_v61 = vmul.f32 %v1713_v51, %v4036_v14 }
0x19c1   :  { %v1728_v38 = vsel %vm1725_vm5, %v1727_v36, %v1723_v4  ;;  %v3245_v36 = vld [vmem:[%s4767_s5 + $0xe0] sm:$0xff]  ;;  %v3247_v4 = vld [vmem:[%s4767_s5 + $0xd0] sm:$0xff] }
0x19c2   :  { %v1731_v24 = vmul.f32 %v1728_v38, %v4049_v40  ;;  %v1840_v48 = vmul.f32 %v1728_v38, %v4043_v17 }
0x19c4   :  { %1746 = vmatpush.msra.mxu3 %v1731_v24 }
0x19c6   :  { %1747 = vmatpush.msra.mxu3 %v1730_v25 }
0x19c7   :  { %2998 = vmatmul.msk.f32.vlgmr.msra.gmra.mxu3 %vm331_vm6, %v3548_v49 }
0x19cf   :  { %2999 = vmatmul.msk.f32.gmra.mxu3 %vm331_vm6, %v3551_v37 }
0x1a4a   :  { %v1749_v42 = vpop.f32.mrf.mxu3 }
0x1a4b   :  { %1780 = vrot.lane.b32.xlu0 %v1749_v42, %s3368_s21 }
0x1a52   :  { %v1752_v52 = vpop.f32.mrf.mxu3 }
0x1a53   :  { %1782 = vrot.lane.b32.xlu2 %v1752_v52, %s3368_s21  ;;  %1769 = vmatpush.msrb.mxu2 %v1752_v52 }
0x1a55   :  { %1770 = vmatpush.msrb.mxu2 %v1749_v42 }
0x1a56   :  { %3000 = vmatmul.msk.f32.vlgmr.msrb.gmra.mxu2 %vm331_vm6, %v3548_v49 }
0x1a5e   :  { %3001 = vmatmul.msk.f32.gmra.mxu2 %vm331_vm6, %v3551_v37 }
0x1aad   :  { %v1783_v44 = vpop.permute.xlu2 %1782 }
0x1aae   :  { %v1795_v47 = vsel %vm331_vm6, %v1731_v24, %v1783_v44 }
0x1abd   :  { %v1781_v26 = vpop.permute.xlu0 %1780 }
0x1abe   :  { %v1794_v43 = vsel %vm331_vm6, %v1730_v25, %v1781_v26 }
0x1ad9   :  { %v1772_v13 = vpop.f32.mrf.mxu2 }
0x1ada   :  { %1788 = vrot.lane.b32.xlu1 %v1772_v13, %s3365_s14 }
0x1ae1   :  { %v1775_v40 = vpop.f32.mrf.mxu2 }
0x1ae2   :  { %1790 = vrot.lane.b32.xlu0 %v1775_v40, %s3365_s14 }
0x1b4c   :  { %v1789_v53 = vpop.permute.xlu1 %1788 }
0x1b4d   :  { %v1796_v28 = vsel %vm402_vm7, %v1794_v43, %v1789_v53 }
0x1b4e   :  { %3002 = vmatmul.msk.f32.vlgmr.msrb.gmra.mxu1 %vm574_vm3, %v1796_v28 }
0x1b54   :  { %v1791_v29 = vpop.permute.xlu0 %1790 }
0x1b55   :  { %v1797_v32 = vsel %vm402_vm7, %v1795_v47, %v1791_v29 }
0x1b56   :  { %3003 = vmatmul.msk.f32.gmra.mxu1 %vm574_vm3, %v1797_v32 }
0x1bcb   :  { %v1821_v33 = vpop.f32.mrf.mxu1 }
0x1bcc   :  { %1829 = vrot.lane.b32.xlu2 %v1821_v33, %s3365_s14 }
0x1bd3   :  { %v1824_v22 = vpop.f32.mrf.mxu1 }
0x1bd4   :  { %1831 = vrot.lane.b32.xlu1 %v1824_v22, %s3365_s14 }
0x1c26   :  { %v1830_v23 = vpop.permute.xlu2 %1829 }
0x1c27   :  { %v1835_v27 = vadd.f32 %v1830_v23, %v4331_v31  ;;  %v1842_v31 = vsub.f32 1.0, %v1728_v38  ;;  %v3248_v38 = vld [vmem:[%s4767_s5 + $0xc8] sm:$0xff] }
0x1c29   :  { %3196 = vtanh.f32 %v1835_v27 }
0x1c2f   :  { %v3197_v39 = vpop.eup %3196 }
0x1c30   :  { %1845 = vrot.lane.b32.xlu1 %v3197_v39, %s3366_s25 }
0x1c46   :  { %v1832_v34 = vpop.permute.xlu1 %1831 }
0x1c47   :  { %v1836_v41 = vadd.f32 %v1832_v34, %v4335_v35 }
0x1c49   :  { %3198 = vtanh.f32 %v1836_v41 }
0x1c4f   :  { %v3199_v45 = vpop.eup %3198 }
0x1c50   :  { %1847 = vrot.lane.b32.xlu0 %v3199_v45, %s3366_s25 }
0x1ca2   :  { %v1846_v50 = vpop.permute.xlu1 %1845 }
0x1ca3   :  { %v1851_v8 = vmul.f32 %v1846_v50, %v1841_v46 }
0x1ca5   :  { %v4365_v15 = vadd.f32 %v1851_v8, %v1839_v61 }
0x1ca7   :  { %1857 = vrot.lane.b32.xlu0 %v4365_v15, %s3366_s25 }
0x1cc2   :  { %v1848_v10 = vpop.permute.xlu0 %1847 }
0x1cc3   :  { %v1852_v18 = vmul.f32 %v1848_v10, %v1842_v31 }
0x1cc5   :  { %v4370_v35 = vadd.f32 %v1852_v18, %v1840_v48 }
0x1cc7   :  { %1859 = vrot.lane.b32.xlu2 %v4370_v35, %s3366_s25 }
0x1d19   :  { %v4374_v19 = vpop.permute.xlu0 %1857 }
0x1d1a   :  { %v1863_v21 = vsel %vm331_vm6, %v4374_v19, %v4257_v55 }
0x1d21   :  { %v4376_v20 = vpop.permute.xlu2 %1859 }
0x1d22   :  { %v1864_v14 = vsel %vm331_vm6, %v4376_v20, %v4270_v7 }
0x1d23   :  { %1879 = vmatpush.msrb.mxu3 %v1864_v14 }
0x1d25   :  { %1880 = vmatpush.msrb.mxu3 %v1863_v21 }
0x1d26   :  { %3004 = vmatmul.msk.f32.vlgmr.msrb.gmra.mxu3 %vm331_vm6, %v3548_v49 }
0x1d2e   :  { %3005 = vmatmul.msk.f32.gmra.mxu3 %vm331_vm6, %v3551_v37 }
0x1da9   :  { %v1882_v17 = vpop.f32.mrf.mxu3 }
0x1daa   :  { %1913 = vrot.lane.b32.xlu1 %v1882_v17, %s3365_s14 }
0x1db1   :  { %v1885_v59 = vpop.f32.mrf.mxu3 }
0x1db2   :  { %1915 = vrot.lane.b32.xlu0 %v1885_v59, %s3365_s14  ;;  %1902 = vmatpush.msra.mxu2 %v1885_v59 }
0x1db4   :  { %1903 = vmatpush.msra.mxu2 %v1882_v17 }
0x1db5   :  { %3006 = vmatmul.msk.f32.vlgmr.msra.gmra.mxu2 %vm331_vm6, %v3548_v49 }
0x1db6   :  { %2084 = vmatpush.msrb.mxu2 %v4183_v60  ;;  %v3239_v60 = vld [vmem:[%s4767_s5 + $0x110] sm:$0xff] }
0x1db8   :  { %2085 = vmatpush.msrb.mxu2 %v4188_v63  ;;  %v3240_v63 = vld [vmem:[%s4767_s5 + $0x108] sm:$0xff] }
0x1dba   :  { %2086 = vmatpush.msrb.mxu2 %v4194_v0  ;;  %v3241_v0 = vld [vmem:[%s4767_s5 + $0x100] sm:$0xff] }
0x1dbc   :  { %2087 = vmatpush.msrb.mxu2 %v4200_v1  ;;  %v3242_v1 = vld [vmem:[%s4767_s5 + $0xf8] sm:$0xff] }
0x1dbd   :  { %3007 = vmatmul.msk.f32.gmra.mxu2 %vm331_vm6, %v3551_v37 }
0x1dbe   :  { %2088 = vmatpush.msrb.mxu2 %v4206_v2  ;;  %v3243_v2 = vld [vmem:[%s4767_s5 + $0xf0] sm:$0xff] }
0x1dc0   :  { %2089 = vmatpush.msrb.mxu2 %v4215_v5  ;;  %v3244_v5 = vld [vmem:[%s4767_s5 + $0xe8] sm:$0xff] }
0x1dc2   :  { %2251 = vmatpush.msra.mxu2 %v3238_v16 }
0x1dc4   :  { %2252 = vmatpush.msra.mxu2 %v3239_v60 }
0x1dc6   :  { %2253 = vmatpush.msra.mxu2 %v3240_v63 }
0x1dc8   :  { %2254 = vmatpush.msra.mxu2 %v3241_v0 }
0x1dca   :  { %2255 = vmatpush.msra.mxu2 %v3242_v1 }
0x1dcc   :  { %2256 = vmatpush.msra.mxu2 %v3243_v2 }
0x1dce   :  { %2257 = vmatpush.msra.mxu2 %v3244_v5 }
0x1dd0   :  { %2258 = vmatpush.msra.mxu2 %v3245_v36 }
0x1dd2   :  { %2259 = vmatpush.msra.mxu2 %v3246_v3 }
0x1dd4   :  { %2260 = vmatpush.msra.mxu2 %v3247_v4 }
0x1dd6   :  { %2261 = vmatpush.msra.mxu2 %v3248_v38 }
0x1dd8   :  { %2262 = vmatpush.msra.mxu2 %v3946_v30 }
0x1e1c   :  { %v1914_v25 = vpop.permute.xlu1 %1913 }
0x1e1d   :  { %v1927_v42 = vsel %vm402_vm7, %v1863_v21, %v1914_v25 }
0x1e24   :  { %v1916_v40 = vpop.permute.xlu0 %1915 }
0x1e25   :  { %v1928_v26 = vsel %vm402_vm7, %v1864_v14, %v1916_v40 }
0x1e38   :  { %v1905_v51 = vpop.f32.mrf.mxu2 }
0x1e39   :  { %1921 = vrot.lane.b32.xlu2 %v1905_v51, %s3367_s17 }
0x1e40   :  { %v1908_v24 = vpop.f32.mrf.mxu2 }
0x1e41   :  { %1923 = vrot.lane.b32.xlu1 %v1908_v24, %s3367_s17 }
0x1e93   :  { %v1922_v52 = vpop.permute.xlu2 %1921 }
0x1e94   :  { %v1929_v13 = vsel %vm405_vm9, %v1927_v42, %v1922_v52 }
0x1e95   :  { %3008 = vmatmul.msk.f32.vlgmr.msrb.gmra.mxu0 %vm424_vm8, %v1929_v13 }
0x1eb3   :  { %v1924_v43 = vpop.permute.xlu1 %1923 }
0x1eb4   :  { %v1930_v30 = vsel %vm405_vm9, %v1928_v26, %v1924_v43 }
0x1eb5   :  { %3009 = vmatmul.msk.f32.gmra.mxu0 %vm424_vm8, %v1930_v30 }
0x1f12   :  { %v1954_v53 = vpop.f32.mrf.mxu0 }
0x1f13   :  { %v4443_v28 = vadd.f32 %v4154_v6, %v1954_v53 }
0x1f15   :  { %v3010_v44 = vmul.f32 -1.442695, %v4443_v28 }
0x1f17   :  { %3200 = vpow2.f32 %v3010_v44 }
0x1f1d   :  { %v3201_v47 = vpop.eup %3200 }
0x1f1e   :  { %v1966_v29 = vadd.f32 1.0, %v3201_v47 }
0x1f20   :  { %3202 = vrcp.f32 %v1966_v29  ;;  %vm1973_vm12 = vweird.f32 %v1966_v29  ;;  %v1977_v18 = vand.u32 2147483647, %v1966_v29 }
0x1f22   :  { %vm1978_vm4 = vcmp.eq.f32.partialorder %v1977_v18, 8.507059e+37  ;;  %v3250_v18 = vld [vmem:[%s4768_s6 + $0x80] sm:$0xff] }
0x1f26   :  { %v3203_v23 = vpop.eup %3202 }
0x1f27   :  { %v1969_v39 = vmul.f32 %v3203_v23, %v1966_v29  ;;  %vm1974_vm11 = vweird.f32 %v3203_v23 }
0x1f28   :  { %vm1975_vm14 = vmor %vm1973_vm12, %vm1974_vm11 }
0x1f29   :  { %v1970_v41 = vsub.f32 1.0, %v1969_v39 }
0x1f2b   :  { %v1971_v45 = vmul.f32 %v3203_v23, %v1970_v41 }
0x1f2d   :  { %v1972_v8 = vadd.f32 %v3203_v23, %v1971_v45 }
0x1f2f   :  { %v1976_v21 = vsel %vm1975_vm14, %v3203_v23, %v1972_v8 }
0x1f32   :  { %v1957_v32 = vpop.f32.mrf.mxu0 }
0x1f33   :  { %v4447_v33 = vadd.f32 %v4154_v6, %v1957_v32  ;;  %v1979_v6 = vand.u32 2147483648, %v1966_v29 }
0x1f35   :  { %v3011_v22 = vmul.f32 -1.442695, %v4447_v33  ;;  %v1980_v59 = vor.u32 1.1754944e-38, %v1979_v6 }
0x1f37   :  { %3204 = vpow2.f32 %v3011_v22  ;;  %v1981_v63 = vsel %vm1978_vm4, %v1980_v59, %v1976_v21  ;;  %v3252_v21 = vld [vmem:[%s4768_s6 + $0x70] sm:$0xff]  ;;  %v3254_v59 = vld [vmem:[%s4768_s6 + $0x60] sm:$0xff] }
0x1f38   :  { %v2000_v1 = vmul.f32 %v1981_v63, %v4280_v11  ;;  %v2111_v53 = vsub.f32 1.0, %v1981_v63  ;;  %v2109_v47 = vmul.f32 %v1981_v63, %v4257_v55 }
0x1f3d   :  { %v3205_v27 = vpop.eup %3204 }
0x1f3e   :  { %v1967_v34 = vadd.f32 1.0, %v3205_v27 }
0x1f40   :  { %3206 = vrcp.f32 %v1967_v34  ;;  %v1994_v31 = vand.u32 2147483648, %v1967_v34  ;;  %v1992_v48 = vand.u32 2147483647, %v1967_v34  ;;  %vm1988_vm15 = vweird.f32 %v1967_v34 }
0x1f42   :  { %v1995_v17 = vor.u32 1.1754944e-38, %v1994_v31  ;;  %vm1993_vm2 = vcmp.eq.f32.partialorder %v1992_v48, 8.507059e+37  ;;  %v3249_v48 = vld [vmem:[%s4768_s6 + $0x88] sm:$0xff] }
0x1f46   :  { %v3207_v46 = vpop.eup %3206 }
0x1f47   :  { %v1984_v50 = vmul.f32 %v3207_v46, %v1967_v34  ;;  %vm1989_vm13 = vweird.f32 %v3207_v46 }
0x1f48   :  { %vm1990_vm1 = vmor %vm1988_vm15, %vm1989_vm13 }
0x1f49   :  { %v1985_v61 = vsub.f32 1.0, %v1984_v50 }
0x1f4b   :  { %v1986_v10 = vmul.f32 %v3207_v46, %v1985_v61 }
0x1f4d   :  { %v1987_v14 = vadd.f32 %v3207_v46, %v1986_v10 }
0x1f4f   :  { %v1991_v16 = vsel %vm1990_vm1, %v3207_v46, %v1987_v14  ;;  %v3251_v14 = vld [vmem:[%s4768_s6 + $0x78] sm:$0xff] }
0x1f50   :  { %v1996_v60 = vsel %vm1993_vm2, %v1995_v17, %v1991_v16  ;;  %v3253_v17 = vld [vmem:[%s4768_s6 + $0x68] sm:$0xff] }
0x1f51   :  { %v2001_v0 = vmul.f32 %v1996_v60, %v4284_v54 }
0x1f53   :  { %2016 = vmatpush.msra.mxu1 %v2001_v0 }
0x1f55   :  { %2017 = vmatpush.msra.mxu1 %v2000_v1 }
0x1f56   :  { %3012 = vmatmul.msk.f32.vlgmr.msra.gmra.mxu1 %vm331_vm6, %v3548_v49 }
0x1f57   :  { %2149 = vmatpush.msrb.mxu1 %v4264_v56 }
0x1f59   :  { %2150 = vmatpush.msrb.mxu1 %v4277_v9 }
0x1f5e   :  { %3013 = vmatmul.msk.f32.gmra.mxu1 %vm331_vm6, %v3551_v37 }
0x1fd3   :  { %v2019_v2 = vpop.f32.mrf.mxu1 }
0x1fd4   :  { %2050 = vrot.lane.b32.xlu2 %v2019_v2, %s3368_s21 }
0x1fdb   :  { %v2022_v5 = vpop.f32.mrf.mxu1 }
0x1fdc   :  { %2052 = vrot.lane.b32.xlu1 %v2022_v5, %s3368_s21  ;;  %2039 = vmatpush.msra.mxu3 %v2022_v5 }
0x1fde   :  { %2040 = vmatpush.msra.mxu3 %v2019_v2 }
0x1fdf   :  { %3014 = vmatmul.msk.f32.vlgmr.msra.gmra.mxu3 %vm331_vm6, %v3548_v49 }
0x1fe7   :  { %3015 = vmatmul.msk.f32.gmra.mxu3 %vm331_vm6, %v3551_v37 }
0x202e   :  { %v2051_v11 = vpop.permute.xlu2 %2050 }
0x202f   :  { %v2064_v54 = vsel %vm331_vm6, %v2000_v1, %v2051_v11 }
0x204e   :  { %v2053_v4 = vpop.permute.xlu1 %2052 }
0x204f   :  { %v2065_v51 = vsel %vm331_vm6, %v2001_v0, %v2053_v4 }
0x2062   :  { %v2042_v56 = vpop.f32.mrf.mxu3 }
0x2063   :  { %2058 = vrot.lane.b32.xlu0 %v2042_v56, %s3365_s14 }
0x206a   :  { %v2045_v9 = vpop.f32.mrf.mxu3 }
0x206b   :  { %2060 = vrot.lane.b32.xlu2 %v2045_v9, %s3365_s14 }
0x20c5   :  { %v2061_v38 = vpop.permute.xlu2 %2060 }
0x20c6   :  { %v2067_v24 = vsel %vm402_vm7, %v2065_v51, %v2061_v38 }
0x20d5   :  { %v2059_v36 = vpop.permute.xlu0 %2058 }
0x20d6   :  { %v2066_v3 = vsel %vm402_vm7, %v2064_v54, %v2059_v36  ;;  %v3255_v36 = vld [vmem:[%s4769_s7 + $0x2] ss:$0 sm:$0xff] }
0x20d7   :  { %3016 = vmatmul.msk.f32.vlgmr.msrb.gmra.mxu2 %vm574_vm3, %v2066_v3 }
0x20df   :  { %3017 = vmatmul.msk.f32.gmra.mxu2 %vm574_vm3, %v2067_v24 }
0x215a   :  { %v2091_v25 = vpop.f32.mrf.mxu2 }
0x215b   :  { %2099 = vrot.lane.b32.xlu0 %v2091_v25, %s3365_s14 }
0x2162   :  { %v2094_v42 = vpop.f32.mrf.mxu2 }
0x2163   :  { %2101 = vrot.lane.b32.xlu1 %v2094_v42, %s3365_s14 }
0x21cd   :  { %v2100_v52 = vpop.permute.xlu0 %2099 }
0x21ce   :  { %v2105_v13 = vadd.f32 %v2100_v52, %v4443_v28  ;;  %v2112_v28 = vsub.f32 1.0, %v1996_v60 }
0x21d0   :  { %3208 = vtanh.f32 %v2105_v13 }
0x21d5   :  { %v2102_v40 = vpop.permute.xlu1 %2101 }
0x21d6   :  { %v3209_v26 = vpop.eup %3208  ;;  %v2106_v43 = vadd.f32 %v2102_v40, %v4447_v33  ;;  %v2110_v33 = vmul.f32 %v1996_v60, %v4270_v7 }
0x21d7   :  { %2115 = vrot.lane.b32.xlu2 %v3209_v26, %s3366_s25 }
0x21d8   :  { %3210 = vtanh.f32 %v2106_v43 }
0x21de   :  { %v3211_v30 = vpop.eup %3210 }
0x21df   :  { %2117 = vrot.lane.b32.xlu0 %v3211_v30, %s3366_s25 }
0x2231   :  { %v2116_v44 = vpop.permute.xlu2 %2115 }
0x2232   :  { %v2121_v29 = vmul.f32 %v2116_v44, %v2111_v53 }
0x2234   :  { %v4479_v32 = vadd.f32 %v2121_v29, %v2109_v47 }
0x2236   :  { %2127 = vrot.lane.b32.xlu1 %v4479_v32, %s3366_s25 }
0x2251   :  { %v2118_v22 = vpop.permute.xlu0 %2117 }
0x2252   :  { %v2122_v23 = vmul.f32 %v2118_v22, %v2112_v28 }
0x2254   :  { %v4484_v27 = vadd.f32 %v2122_v23, %v2110_v33 }
0x2256   :  { %2129 = vrot.lane.b32.xlu2 %v4484_v27, %s3366_s25 }
0x22a8   :  { %v4488_v39 = vpop.permute.xlu1 %2127 }
0x22a9   :  { %3018 = vmatmul.msk.f32.vlgmr.msrb.gmra.mxu1 %vm331_vm6, %v4488_v39 }
0x22b0   :  { %v4492_v55 = vpop.permute.xlu2 %2129 }
0x22b1   :  { %3019 = vmatmul.msk.f32.gmra.mxu1 %vm331_vm6, %v4492_v55 }
0x2326   :  { %v2152_v34 = vpop.f32.mrf.mxu1 }
0x2327   :  { %v2153_v41 = vadd.f32 %v4288_v57, %v2152_v34 }
0x2329   :  { %2161 = vperm.xlu1 %3159, %v2153_v41  }
0x232e   :  { %v2155_v7 = vpop.f32.mrf.mxu1 }
0x232f   :  { %v2156_v45 = vadd.f32 %v4288_v57, %v2155_v7 }
0x2331   :  { %2166 = vperm.xlu0 %3158, %v2156_v45  }
0x239b   :  { %v4498_v46 = vpop.permute.xlu1 %2161 }
0x239c   :  { %v2171_v61 = vsel %vm318_vm0, %v4498_v46, 0.0 }
0x239d   :  { %v2173_v57 = vsel %vm331_vm6, %v2171_v61, %v4365_v15 }
0x23a3   :  { %v4500_v50 = vpop.permute.xlu0 %2166 }
0x23a4   :  { %v2172_v8 = vsel %vm318_vm0, %v4500_v50, 0.0 }
0x23a5   :  { %v2174_v31 = vsel %vm331_vm6, %v2172_v8, %v4370_v35 }
0x23a6   :  { %2189 = vmatpush.msra.mxu0 %v2174_v31 }
0x23a8   :  { %2190 = vmatpush.msra.mxu0 %v2173_v57 }
0x23a9   :  { %3020 = vmatmul.msk.f32.vlgmr.msra.gmra.mxu0 %vm331_vm6, %v3548_v49 }
0x23b1   :  { %3021 = vmatmul.msk.f32.gmra.mxu0 %vm331_vm6, %v3551_v37 }
0x2426   :  { %v2192_v6 = vpop.f32.mrf.mxu0 }
0x2427   :  { %2223 = vrot.lane.b32.xlu2 %v2192_v6, %s3365_s14 }
0x242e   :  { %v2195_v10 = vpop.f32.mrf.mxu0 }
0x242f   :  { %2225 = vrot.lane.b32.xlu1 %v2195_v10, %s3365_s14  ;;  %2212 = vmatpush.msrb.mxu3 %v2195_v10 }
0x2431   :  { %2213 = vmatpush.msrb.mxu3 %v2192_v6 }
0x2432   :  { %3022 = vmatmul.msk.f32.vlgmr.msrb.gmra.mxu3 %vm331_vm6, %v3548_v49 }
0x2433   :  { %2392 = vmatpush.msra.mxu3 %v3249_v48 }
0x2435   :  { %2393 = vmatpush.msra.mxu3 %v3250_v18 }
0x2437   :  { %2394 = vmatpush.msra.mxu3 %v3251_v14  ;;  %v3258_v14 = vld [vmem:[%s4767_s5 + $0x168] sm:$0xff] }
0x2439   :  { %2395 = vmatpush.msra.mxu3 %v3252_v21  ;;  %v3259_v21 = vld [vmem:[%s4767_s5 + $0x160] sm:$0xff] }
0x243a   :  { %3023 = vmatmul.msk.f32.gmra.mxu3 %vm331_vm6, %v3551_v37 }
0x243b   :  { %2396 = vmatpush.msra.mxu3 %v3253_v17  ;;  %v3260_v17 = vld [vmem:[%s4767_s5 + $0x158] sm:$0xff] }
0x243d   :  { %2397 = vmatpush.msra.mxu3 %v3254_v59  ;;  %v3261_v59 = vld [vmem:[%s4767_s5 + $0x150] sm:$0xff] }
0x2481   :  { %v2224_v63 = vpop.permute.xlu2 %2223 }
0x2482   :  { %v2237_v0 = vsel %vm402_vm7, %v2173_v57, %v2224_v63  ;;  %v3264_v63 = vld [vmem:[%s4767_s5 + $0x138] sm:$0xff] }
0x24a1   :  { %v2226_v5 = vpop.permute.xlu1 %2225 }
0x24a2   :  { %v2238_v9 = vsel %vm402_vm7, %v2174_v31, %v2226_v5 }
0x24b5   :  { %v2215_v16 = vpop.f32.mrf.mxu3 }
0x24b6   :  { %2231 = vrot.lane.b32.xlu0 %v2215_v16, %s3367_s17  ;;  %v3262_v16 = vld [vmem:[%s4767_s5 + $0x148] sm:$0xff] }
0x24bd   :  { %v2218_v60 = vpop.f32.mrf.mxu3 }
0x24be   :  { %2233 = vrot.lane.b32.xlu2 %v2218_v60, %s3367_s17  ;;  %v3263_v60 = vld [vmem:[%s4767_s5 + $0x140] sm:$0xff] }
0x2518   :  { %v2234_v56 = vpop.permute.xlu2 %2233 }
0x2519   :  { %v2240_v11 = vsel %vm405_vm9, %v2238_v9, %v2234_v56 }
0x2528   :  { %v2232_v1 = vpop.permute.xlu0 %2231 }
0x2529   :  { %v2239_v2 = vsel %vm405_vm9, %v2237_v0, %v2232_v1  ;;  %v3265_v0 = vld [vmem:[%s4767_s5 + $0x130] sm:$0xff]  ;;  %v3266_v1 = vld [vmem:[%s4767_s5 + $0x128] sm:$0xff] }
0x252a   :  { %3024 = vmatmul.msk.f32.vlgmr.msra.gmra.mxu2 %vm424_vm8, %v2239_v2  ;;  %v3267_v2 = vld [vmem:[%s4767_s5 + $0x120] sm:$0xff] }
0x2532   :  { %3025 = vmatmul.msk.f32.gmra.mxu2 %vm424_vm8, %v2240_v11 }
0x25ad   :  { %v2264_v54 = vpop.f32.mrf.mxu2 }
0x25ae   :  { %v4551_v3 = vadd.f32 %v3255_v36, %v2264_v54 }
0x25b0   :  { %v3026_v4 = vmul.f32 -1.442695, %v4551_v3 }
0x25b2   :  { %3212 = vpow2.f32 %v3026_v4 }
0x25b5   :  { %v2267_v38 = vpop.f32.mrf.mxu2 }
0x25b6   :  { %v4554_v51 = vadd.f32 %v3255_v36, %v2267_v38 }
0x25b8   :  { %v3213_v24 = vpop.eup %3212  ;;  %v3027_v25 = vmul.f32 -1.442695, %v4554_v51 }
0x25b9   :  { %v2276_v42 = vadd.f32 1.0, %v3213_v24 }
0x25ba   :  { %3214 = vpow2.f32 %v3027_v25 }
0x25bb   :  { %3216 = vrcp.f32 %v2276_v42  ;;  %vm2283_vm5 = vweird.f32 %v2276_v42  ;;  %v2289_v22 = vand.u32 2147483648, %v2276_v42  ;;  %v2287_v34 = vand.u32 2147483647, %v2276_v42 }
0x25bd   :  { %v2290_v61 = vor.u32 1.1754944e-38, %v2289_v22  ;;  %vm2288_vm15 = vcmp.eq.f32.partialorder %v2287_v34, 8.507059e+37 }
0x25c0   :  { %v3215_v52 = vpop.eup %3214 }
0x25c1   :  { %v3217_v13 = vpop.eup %3216  ;;  %v2277_v40 = vadd.f32 1.0, %v3215_v52 }
0x25c2   :  { %v2279_v26 = vmul.f32 %v3217_v13, %v2276_v42  ;;  %vm2284_vm0 = vweird.f32 %v3217_v13 }
0x25c3   :  { %3218 = vrcp.f32 %v2277_v40  ;;  %v2304_v28 = vand.u32 2147483648, %v2277_v40  ;;  %v2302_v23 = vand.u32 2147483647, %v2277_v40  ;;  %vm2285_vm11 = vmor %vm2283_vm5, %vm2284_vm0  ;;  %vm2298_vm12 = vweird.f32 %v2277_v40 }
0x25c4   :  { %v2280_v43 = vsub.f32 1.0, %v2279_v26 }
0x25c5   :  { %v2305_v45 = vor.u32 1.1754944e-38, %v2304_v28  ;;  %vm2303_vm14 = vcmp.eq.f32.partialorder %v2302_v23, 8.507059e+37 }
0x25c6   :  { %v2281_v30 = vmul.f32 %v3217_v13, %v2280_v43 }
0x25c8   :  { %v2282_v29 = vadd.f32 %v3217_v13, %v2281_v30 }
0x25c9   :  { %v3219_v53 = vpop.eup %3218 }
0x25ca   :  { %v2294_v44 = vmul.f32 %v3219_v53, %v2277_v40  ;;  %vm2299_vm10 = vweird.f32 %v3219_v53  ;;  %v2286_v7 = vsel %vm2285_vm11, %v3217_v13, %v2282_v29 }
0x25cb   :  { %vm2300_vm13 = vmor %vm2298_vm12, %vm2299_vm10  ;;  %v4559_v57 = vsel %vm2288_vm15, %v2290_v61, %v2286_v7  ;;  %vm2158_vm15 = vcmp.eq.s32.totalorder %v3582_v58, 1 }
0x25cc   :  { %v2295_v47 = vsub.f32 1.0, %v2294_v44  ;;  %v2308_v10 = vmul.f32 %v4559_v57, %v4374_v19  ;;  %v3256_v19 = vld [vmem:[%s4767_s5 + $0x178] sm:$0xff]  ;;  %v2419_v44 = vsub.f32 1.0, %v4559_v57  ;;  %v2417_v29 = vmul.f32 %v4559_v57, %v4365_v15  ;;  %v3270_v57 = vld [vmem:[%s4768_s6 + $0xa8] sm:$0xff] }
0x25ce   :  { %v2296_v33 = vmul.f32 %v3219_v53, %v2295_v47 }
0x25d0   :  { %v2297_v41 = vadd.f32 %v3219_v53, %v2296_v33 }
0x25d2   :  { %v2301_v8 = vsel %vm2300_vm13, %v3219_v53, %v2297_v41 }
0x25d3   :  { %v4557_v31 = vsel %vm2303_vm14, %v2305_v45, %v2301_v8  ;;  %v3268_v8 = vld [vmem:[%s4768_s6 + $0xb8] sm:$0xff] }
0x25d4   :  { %v2309_v6 = vmul.f32 %v4557_v31, %v4376_v20  ;;  %v3257_v20 = vld [vmem:[%s4767_s5 + $0x170] sm:$0xff] }
0x25d6   :  { %2324 = vmatpush.msra.mxu1 %v2309_v6 }
0x25d8   :  { %2325 = vmatpush.msra.mxu1 %v2308_v10 }
0x25d9   :  { %3028 = vmatmul.msk.f32.vlgmr.msra.gmra.mxu1 %vm331_vm6, %v3548_v49 }
0x25e1   :  { %3029 = vmatmul.msk.f32.gmra.mxu1 %vm331_vm6, %v3551_v37 }
0x2656   :  { %v2327_v48 = vpop.f32.mrf.mxu1 }
0x2657   :  { %2358 = vrot.lane.b32.xlu0 %v2327_v48, %s3368_s21 }
0x265e   :  { %v2330_v18 = vpop.f32.mrf.mxu1 }
0x265f   :  { %2360 = vrot.lane.b32.xlu2 %v2330_v18, %s3368_s21  ;;  %2347 = vmatpush.msrb.mxu0 %v2330_v18 }
0x2661   :  { %2348 = vmatpush.msrb.mxu0 %v2327_v48  ;;  %v3273_v48 = vld [vmem:[%s4768_s6 + $0x90] sm:$0xff] }
0x2662   :  { %3030 = vmatmul.msk.f32.vlgmr.msrb.gmra.mxu0 %vm331_vm6, %v3548_v49 }
0x2663   :  { %2519 = vmatpush.msra.mxu0 %v3256_v19 }
0x2665   :  { %2520 = vmatpush.msra.mxu0 %v3257_v20 }
0x2667   :  { %2521 = vmatpush.msra.mxu0 %v3258_v14 }
0x2669   :  { %2522 = vmatpush.msra.mxu0 %v3259_v21 }
0x266a   :  { %3031 = vmatmul.msk.f32.gmra.mxu0 %vm331_vm6, %v3551_v37 }
0x266b   :  { %2523 = vmatpush.msra.mxu0 %v3260_v17 }
0x266d   :  { %2524 = vmatpush.msra.mxu0 %v3261_v59 }
0x266f   :  { %2525 = vmatpush.msra.mxu0 %v3262_v16 }
0x2671   :  { %2526 = vmatpush.msra.mxu0 %v3263_v60 }
0x2673   :  { %2527 = vmatpush.msra.mxu0 %v3264_v63 }
0x2675   :  { %2528 = vmatpush.msra.mxu0 %v3265_v0 }
0x2677   :  { %2529 = vmatpush.msra.mxu0 %v3266_v1  ;;  %v3274_v1 = vld [vmem:[%s4769_s7 + $0x3] ss:$0 sm:$0xff] }
0x2679   :  { %2530 = vmatpush.msra.mxu0 %v3267_v2 }
0x26b9   :  { %v2361_v4 = vpop.permute.xlu2 %2360 }
0x26ba   :  { %v2373_v38 = vsel %vm331_vm6, %v2309_v6, %v2361_v4  ;;  %v3271_v6 = vld [vmem:[%s4768_s6 + $0xa0] sm:$0xff] }
0x26c9   :  { %v2359_v9 = vpop.permute.xlu0 %2358 }
0x26ca   :  { %v2372_v11 = vsel %vm331_vm6, %v2308_v10, %v2359_v9  ;;  %v3272_v10 = vld [vmem:[%s4768_s6 + $0x98] sm:$0xff] }
0x26df   :  { %v2350_v5 = vpop.f32.mrf.mxu0 }
0x26e0   :  { %2366 = vrot.lane.b32.xlu1 %v2350_v5, %s3365_s14 }
0x26e7   :  { %v2353_v56 = vpop.f32.mrf.mxu0 }
0x26e8   :  { %2368 = vrot.lane.b32.xlu0 %v2353_v56, %s3365_s14 }
0x2752   :  { %v2367_v54 = vpop.permute.xlu1 %2366 }
0x2753   :  { %v2374_v36 = vsel %vm402_vm7, %v2372_v11, %v2367_v54 }
0x2754   :  { %3032 = vmatmul.msk.f32.vlgmr.msra.gmra.mxu3 %vm574_vm3, %v2374_v36 }
0x275a   :  { %v2369_v24 = vpop.permute.xlu0 %2368 }
0x275b   :  { %v2375_v25 = vsel %vm402_vm7, %v2373_v38, %v2369_v24 }
0x275c   :  { %3033 = vmatmul.msk.f32.gmra.mxu3 %vm574_vm3, %v2375_v25 }
0x27d7   :  { %v2399_v42 = vpop.f32.mrf.mxu3 }
0x27d8   :  { %2407 = vrot.lane.b32.xlu2 %v2399_v42, %s3365_s14 }
0x27df   :  { %v2402_v52 = vpop.f32.mrf.mxu3 }
0x27e0   :  { %2409 = vrot.lane.b32.xlu1 %v2402_v52, %s3365_s14 }
0x2832   :  { %v2408_v13 = vpop.permute.xlu2 %2407 }
0x2833   :  { %v2413_v40 = vadd.f32 %v2408_v13, %v4551_v3  ;;  %v2420_v3 = vsub.f32 1.0, %v4557_v31 }
0x2835   :  { %3220 = vtanh.f32 %v2413_v40 }
0x283b   :  { %v3221_v26 = vpop.eup %3220 }
0x283c   :  { %2423 = vrot.lane.b32.xlu1 %v3221_v26, %s3366_s25 }
0x2852   :  { %v2410_v43 = vpop.permute.xlu1 %2409 }
0x2853   :  { %v2414_v30 = vadd.f32 %v2410_v43, %v4554_v51  ;;  %v2418_v51 = vmul.f32 %v4557_v31, %v4370_v35  ;;  %v3269_v31 = vld [vmem:[%s4768_s6 + $0xb0] sm:$0xff] }
0x2855   :  { %3222 = vtanh.f32 %v2414_v30 }
0x285b   :  { %v3223_v53 = vpop.eup %3222 }
0x285c   :  { %2425 = vrot.lane.b32.xlu0 %v3223_v53, %s3366_s25 }
0x28ae   :  { %v2424_v47 = vpop.permute.xlu1 %2423 }
0x28af   :  { %v2429_v28 = vmul.f32 %v2424_v47, %v2419_v44 }
0x28b1   :  { %v2431_v22 = vadd.f32 %v2429_v28, %v2417_v29 }
0x28b3   :  { %2435 = vrot.lane.b32.xlu0 %v2431_v22, %s3366_s25 }
0x28ce   :  { %v2426_v33 = vpop.permute.xlu0 %2425 }
0x28cf   :  { %v2430_v23 = vmul.f32 %v2426_v33, %v2420_v3 }
0x28d1   :  { %v2432_v34 = vadd.f32 %v2430_v23, %v2418_v51 }
0x28d3   :  { %2437 = vrot.lane.b32.xlu2 %v2432_v34, %s3366_s25 }
0x2925   :  { %v2436_v41 = vpop.permute.xlu0 %2435 }
0x2926   :  { %v2441_v15 = vsel %vm331_vm6, %v2436_v41, %v4479_v32 }
0x292d   :  { %v2438_v7 = vpop.permute.xlu2 %2437 }
0x292e   :  { %v2442_v45 = vsel %vm331_vm6, %v2438_v7, %v4484_v27 }
0x292f   :  { %2457 = vmatpush.msrb.mxu1 %v2442_v45 }
0x2931   :  { %2458 = vmatpush.msrb.mxu1 %v2441_v15 }
0x2932   :  { %3034 = vmatmul.msk.f32.vlgmr.msrb.gmra.mxu1 %vm331_vm6, %v3548_v49 }
0x293a   :  { %3035 = vmatmul.msk.f32.gmra.mxu1 %vm331_vm6, %v3551_v37 }
0x29af   :  { %v2460_v35 = vpop.f32.mrf.mxu1 }
0x29b0   :  { %2491 = vrot.lane.b32.xlu1 %v2460_v35, %s3365_s14 }
0x29b7   :  { %v2463_v61 = vpop.f32.mrf.mxu1 }
0x29b8   :  { %2493 = vrot.lane.b32.xlu0 %v2463_v61, %s3365_s14  ;;  %2480 = vmatpush.msrb.mxu2 %v2463_v61 }
0x29ba   :  { %2481 = vmatpush.msrb.mxu2 %v2460_v35 }
0x29bb   :  { %3036 = vmatmul.msk.f32.vlgmr.msrb.gmra.mxu2 %vm331_vm6, %v3548_v49 }
0x29bc   :  { %2662 = vmatpush.msra.mxu2 %v3268_v8 }
0x29be   :  { %2663 = vmatpush.msra.mxu2 %v3269_v31 }
0x29c0   :  { %2664 = vmatpush.msra.mxu2 %v3270_v57 }
0x29c2   :  { %2665 = vmatpush.msra.mxu2 %v3271_v6 }
0x29c3   :  { %3037 = vmatmul.msk.f32.gmra.mxu2 %vm331_vm6, %v3551_v37 }
0x29c4   :  { %2666 = vmatpush.msra.mxu2 %v3272_v10 }
0x29c6   :  { %2667 = vmatpush.msra.mxu2 %v3273_v48 }
0x2a22   :  { %v2492_v20 = vpop.permute.xlu1 %2491 }
0x2a23   :  { %v2505_v14 = vsel %vm402_vm7, %v2441_v15, %v2492_v20  ;;  %v3276_v15 = vld [vmem:[%s4770_s8] sm:$0xff] }
0x2a2a   :  { %v2494_v59 = vpop.permute.xlu0 %2493 }
0x2a2b   :  { %v2506_v16 = vsel %vm402_vm7, %v2442_v45, %v2494_v59  ;;  %v3275_v45 = vld [vmem:[%s4770_s8 + $0x8] sm:$0xff] }
0x2a3e   :  { %v2483_v18 = vpop.f32.mrf.mxu2 }
0x2a3f   :  { %2499 = vrot.lane.b32.xlu2 %v2483_v18, %s3367_s17 }
0x2a46   :  { %v2486_v19 = vpop.f32.mrf.mxu2 }
0x2a47   :  { %2501 = vrot.lane.b32.xlu1 %v2486_v19, %s3367_s17 }
0x2a99   :  { %v2500_v21 = vpop.permute.xlu2 %2499 }
0x2a9a   :  { %v2507_v17 = vsel %vm405_vm9, %v2505_v14, %v2500_v21 }
0x2a9b   :  { %3038 = vmatmul.msk.f32.vlgmr.msra.gmra.mxu0 %vm424_vm8, %v2507_v17 }
0x2ab9   :  { %v2502_v60 = vpop.permute.xlu1 %2501 }
0x2aba   :  { %v2508_v63 = vsel %vm405_vm9, %v2506_v16, %v2502_v60 }
0x2abb   :  { %3039 = vmatmul.msk.f32.gmra.mxu0 %vm424_vm8, %v2508_v63 }
0x2b18   :  { %v2532_v0 = vpop.f32.mrf.mxu0 }
0x2b19   :  { %v4676_v2 = vadd.f32 %v3274_v1, %v2532_v0 }
0x2b1b   :  { %v3040_v5 = vmul.f32 -1.442695, %v4676_v2 }
0x2b1d   :  { %3224 = vpow2.f32 %v3040_v5 }
0x2b23   :  { %v3225_v56 = vpop.eup %3224 }
0x2b24   :  { %v2544_v9 = vadd.f32 1.0, %v3225_v56 }
0x2b26   :  { %3226 = vrcp.f32 %v2544_v9  ;;  %vm2551_vm9 = vweird.f32 %v2544_v9  ;;  %v2557_v53 = vand.u32 2147483648, %v2544_v9  ;;  %v2555_v29 = vand.u32 2147483647, %v2544_v9 }
0x2b28   :  { %v2558_v33 = vor.u32 1.1754944e-38, %v2557_v53  ;;  %vm2556_vm10 = vcmp.eq.f32.partialorder %v2555_v29, 8.507059e+37  ;;  %v3277_v29 = vld [vmem:[#allocation2] ss:$0 sm:$0xff] }
0x2b2c   :  { %v3227_v4 = vpop.eup %3226 }
0x2b2d   :  { %v2547_v24 = vmul.f32 %v3227_v4, %v2544_v9  ;;  %vm2552_vm8 = vweird.f32 %v3227_v4 }
0x2b2e   :  { %vm2553_vm2 = vmor %vm2551_vm9, %vm2552_vm8  ;;  %vm2736_vm8 = vcmp.eq.s32.totalorder %v3582_v58, 2  ;;  %vm2815_vm9 = vcmask 23552  }
0x2b2f   :  { %v2548_v42 = vsub.f32 1.0, %v2547_v24 }
0x2b31   :  { %v2549_v52 = vmul.f32 %v3227_v4, %v2548_v42 }
0x2b33   :  { %v2550_v43 = vadd.f32 %v3227_v4, %v2549_v52 }
0x2b35   :  { %v2554_v22 = vsel %vm2553_vm2, %v3227_v4, %v2550_v43 }
0x2b36   :  { %v2559_v34 = vsel %vm2556_vm10, %v2558_v33, %v2554_v22 }
0x2b37   :  { %v2578_v7 = vmul.f32 %v2559_v34, %v4488_v39  ;;  %v2689_v60 = vsub.f32 1.0, %v2559_v34  ;;  %v2687_v0 = vmul.f32 %v2559_v34, %v4479_v32  ;;  %v2749_v32 = vld [vmem:[%s4764_s2] sm:$0xff]  ;;  %v2790_v34 = vstv %s3456_s0 }
0x2b38   :  { %v2535_v11 = vpop.f32.mrf.mxu0 }
0x2b39   :  { %v4679_v54 = vadd.f32 %v3274_v1, %v2535_v11 }
0x2b3b   :  { %v3041_v36 = vmul.f32 -1.442695, %v4679_v54 }
0x2b3d   :  { %3228 = vpow2.f32 %v3041_v36  ;;  %v2751_v36 = vld [vmem:[%s4772_s10] sm:$0xf]  ;;  %s2795_s10 = sadd.f32 1.0, %s3456_s0 }
0x2b3f   :  { %v2796_v24 = vstv %s2795_s10 }
0x2b40   :  { %v2808_v52 = vand.u32 2147483648, %v2796_v24  ;;  %vm2802_vm11 = vweird.f32 %v2796_v24 }
0x2b42   :  { %v2809_v43 = vor.u32 1.1754944e-38, %v2808_v52 }
0x2b43   :  { %v3229_v38 = vpop.eup %3228 }
0x2b44   :  { %v2545_v25 = vadd.f32 1.0, %v3229_v38 }
0x2b46   :  { %3230 = vrcp.f32 %v2545_v25  ;;  %v2572_v30 = vand.u32 2147483648, %v2545_v25  ;;  %v2570_v47 = vand.u32 2147483647, %v2545_v25  ;;  %vm2566_vm4 = vweird.f32 %v2545_v25 }
0x2b48   :  { %v2573_v3 = vor.u32 1.1754944e-38, %v2572_v30  ;;  %vm2571_vm5 = vcmp.eq.f32.partialorder %v2570_v47, 8.507059e+37 }
0x2b4c   :  { %v3231_v13 = vpop.eup %3230 }
0x2b4d   :  { %v2562_v40 = vmul.f32 %v3231_v13, %v2545_v25  ;;  %vm2567_vm1 = vweird.f32 %v3231_v13 }
0x2b4e   :  { %vm2568_vm0 = vmor %vm2566_vm4, %vm2567_vm1 }
0x2b4f   :  { %v2563_v26 = vsub.f32 1.0, %v2562_v40  ;;  %v2806_v40 = vand.u32 2147483647, %v2796_v24 }
0x2b51   :  { %v2564_v44 = vmul.f32 %v3231_v13, %v2563_v26  ;;  %vm2807_vm14 = vcmp.eq.f32.partialorder %v2806_v40, 8.507059e+37 }
0x2b53   :  { %v2565_v28 = vadd.f32 %v3231_v13, %v2564_v44 }
0x2b55   :  { %v2569_v51 = vsel %vm2568_vm0, %v3231_v13, %v2565_v28 }
0x2b56   :  { %v2574_v23 = vsel %vm2571_vm5, %v2573_v3, %v2569_v51  ;;  %v3163_v51 = vld [vmem:[%s4773_s11] ss:$0 sm:$0xff] }
0x2b57   :  { %v2579_v41 = vmul.f32 %v2574_v23, %v4492_v55  ;;  %v2688_v9 = vmul.f32 %v2574_v23, %v4484_v27  ;;  %v2750_v27 = vld [vmem:[%s4764_s2 + $0x8] sm:$0xff]  ;;  %s3370_s2 = smov [#allocation6]  }
0x2b59   :  { %2594 = vmatpush.msrb.mxu3 %v2579_v41 }
0x2b5b   :  { %2595 = vmatpush.msrb.mxu3 %v2578_v7 }
0x2b5c   :  { %3042 = vmatmul.msk.f32.vlgmr.msrb.gmra.mxu3 %vm331_vm6, %v3548_v49 }
0x2b5d   :  { %2727 = vmatpush.msra.mxu3 %v3275_v45 }
0x2b5f   :  { %2728 = vmatpush.msra.mxu3 %v3276_v15 }
0x2b64   :  { %3043 = vmatmul.msk.f32.gmra.mxu3 %vm331_vm6, %v3551_v37 }
0x2bdf   :  { %v2597_v55 = vpop.f32.mrf.mxu3 }
0x2be0   :  { %2628 = vrot.lane.b32.xlu2 %v2597_v55, %s3368_s21 }
0x2be7   :  { %v2600_v39 = vpop.f32.mrf.mxu3 }
0x2be8   :  { %2630 = vrot.lane.b32.xlu1 %v2600_v39, %s3368_s21  ;;  %2617 = vmatpush.msra.mxu1 %v2600_v39 }
0x2bea   :  { %2618 = vmatpush.msra.mxu1 %v2597_v55 }
0x2beb   :  { %3044 = vmatmul.msk.f32.vlgmr.msra.gmra.mxu1 %vm331_vm6, %v3548_v49 }
0x2bf3   :  { %3045 = vmatmul.msk.f32.gmra.mxu1 %vm331_vm6, %v3551_v37 }
0x2c3a   :  { %v2629_v8 = vpop.permute.xlu2 %2628 }
0x2c3b   :  { %v2642_v31 = vsel %vm331_vm6, %v2578_v7, %v2629_v8 }
0x2c5a   :  { %v2631_v10 = vpop.permute.xlu1 %2630 }
0x2c5b   :  { %v2643_v49 = vsel %vm331_vm6, %v2579_v41, %v2631_v10 }
0x2c68   :  { %v2620_v35 = vpop.f32.mrf.mxu1 }
0x2c69   :  { %2636 = vrot.lane.b32.xlu0 %v2620_v35, %s3365_s14 }
0x2c70   :  { %v2623_v61 = vpop.f32.mrf.mxu1 }
0x2c71   :  { %2638 = vrot.lane.b32.xlu2 %v2623_v61, %s3365_s14 }
0x2ccb   :  { %v2639_v48 = vpop.permute.xlu2 %2638 }
0x2ccc   :  { %v2645_v37 = vsel %vm402_vm7, %v2643_v49, %v2639_v48 }
0x2cdb   :  { %v2637_v57 = vpop.permute.xlu0 %2636 }
0x2cdc   :  { %v2644_v6 = vsel %vm402_vm7, %v2642_v31, %v2637_v57  ;;  %vm2763_vm7 = vcmask 1043456  }
0x2cdd   :  { %3046 = vmatmul.msk.f32.vlgmr.msra.gmra.mxu2 %vm574_vm3, %v2644_v6  ;;  %3050 = vmatpush.msk.msrb.mxu0 %vm2763_vm7, %v2751_v36 }
0x2ce5   :  { %3047 = vmatmul.msk.f32.gmra.mxu2 %vm574_vm3, %v2645_v37  ;;  %vm2756_vm3 = vcmask 31744  }
0x2ce6   :  { %3051 = vmatmul.msk.f32.vlgmr.msrb.gmra.mxu0 %vm2756_vm3, %v2749_v32 }
0x2cee   :  { %3052 = vmatmul.msk.f32.gmra.mxu0 %vm2756_vm3, %v2750_v27 }
0x2d60   :  { %v2669_v18 = vpop.f32.mrf.mxu2 }
0x2d61   :  { %2677 = vrot.lane.b32.xlu0 %v2669_v18, %s3365_s14 }
0x2d63   :  { %v2784_v33 = vpop.f32.mrf.mxu0 }
0x2d68   :  { %v2672_v19 = vpop.f32.mrf.mxu2 }
0x2d69   :  { %2679 = vrot.lane.b32.xlu1 %v2672_v19, %s3365_s14 }
0x2d6b   :  { %v2787_v45 = vpop.f32.mrf.mxu0 }
0x2d6c   :  { %v2788_v8 = vadd.f32 %v3163_v51, %v2787_v45 }
0x2d6e   :  { %v2792_v57 = vmul.f32 %v2790_v34, %v2788_v8 }
0x2dd3   :  { %v2678_v20 = vpop.permute.xlu0 %2677 }
0x2dd4   :  { %v2683_v14 = vadd.f32 %v2678_v20, %v4676_v2  ;;  %v2690_v2 = vsub.f32 1.0, %v2574_v23  ;;  %v2785_v23 = vadd.f32 %v3163_v51, %v2784_v33 }
0x2dd6   :  { %3232 = vtanh.f32 %v2683_v14  ;;  %v2791_v41 = vmul.f32 %v2790_v34, %v2785_v23 }
0x2ddb   :  { %v2680_v21 = vpop.permute.xlu1 %2679 }
0x2ddc   :  { %v3233_v17 = vpop.eup %3232  ;;  %v2684_v59 = vadd.f32 %v2680_v21, %v4679_v54 }
0x2ddd   :  { %2693 = vrot.lane.b32.xlu2 %v3233_v17, %s3366_s25 }
0x2dde   :  { %3234 = vtanh.f32 %v2684_v59 }
0x2ddf   :  { %3236 = vrcp.f32 %v2796_v24 }
0x2de4   :  { %v3235_v16 = vpop.eup %3234 }
0x2de5   :  { %2695 = vrot.lane.b32.xlu0 %v3235_v16, %s3366_s25  ;;  %v3237_v25 = vpop.eup %3236 }
0x2de6   :  { %v2798_v42 = vmul.f32 %v3237_v25, %v2796_v24  ;;  %vm2803_vm12 = vweird.f32 %v3237_v25 }
0x2de7   :  { %vm2804_vm13 = vmor %vm2802_vm11, %vm2803_vm12 }
0x2de8   :  { %v2799_v13 = vsub.f32 1.0, %v2798_v42 }
0x2dea   :  { %v2800_v26 = vmul.f32 %v3237_v25, %v2799_v13 }
0x2dec   :  { %v2801_v30 = vadd.f32 %v3237_v25, %v2800_v26 }
0x2dee   :  { %v2805_v53 = vsel %vm2804_vm13, %v3237_v25, %v2801_v30 }
0x2def   :  { %v2810_v44 = vsel %vm2807_vm14, %v2809_v43, %v2805_v53 }
0x2df0   :  { %3057 = vpush %v2810_v44 }
0x2e21   :  { %s3058_s13 = spop %3057 }
0x2e22   :  { %v2812_v35 = vstv %s3058_s13 }
0x2e37   :  { %v2694_v63 = vpop.permute.xlu2 %2693 }
0x2e38   :  { %v2699_v1 = vmul.f32 %v2694_v63, %v2689_v60 }
0x2e3a   :  { %v2701_v5 = vadd.f32 %v2699_v1, %v2687_v0 }
0x2e3c   :  { %2705 = vrot.lane.b32.xlu1 %v2701_v5, %s3366_s25 }
0x2e57   :  { %v2696_v56 = vpop.permute.xlu0 %2695 }
0x2e58   :  { %v2700_v11 = vmul.f32 %v2696_v56, %v2690_v2 }
0x2e5a   :  { %v2702_v54 = vadd.f32 %v2700_v11, %v2688_v9 }
0x2e5c   :  { %2707 = vrot.lane.b32.xlu2 %v2702_v54, %s3366_s25  ;;  %s2825_s25 = sshll.u32 %s3370_s2, 4  ;;  %s2826_s25 = int_to_ptr.vmem [resolvable:$true] %s2825_s25 }
0x2e5d   :  { %2830 = dma.vmem_to_hbm [thread:$0]  %s2826_s25, 128, %s2828_s9, [#allocation4]  }
0x2eae   :  { %v2706_v4 = vpop.permute.xlu1 %2705 }
0x2eaf   :  { %3048 = vmatmul.msk.f32.vlgmr.msra.gmra.mxu3 %vm331_vm6, %v2706_v4 }
0x2eb6   :  { %v2708_v38 = vpop.permute.xlu2 %2707 }
0x2eb7   :  { %3049 = vmatmul.msk.f32.gmra.mxu3 %vm331_vm6, %v2708_v38  ;;  %vm1579_vm6 = vcmp.eq.s32.totalorder %v3582_v58, 0 }
0x2eb8   :  { %v1590_v7 = vsel %vm1579_vm6, %v4292_v12, 0.0  ;;  %v1591_v12 = vsel %vm1579_vm6, %v4294_v62, 0.0 }
0x2eb9   :  { %v2169_v15 = vsel %vm2158_vm15, %v4498_v46, %v1590_v7  ;;  %v2170_v46 = vsel %vm2158_vm15, %v4500_v50, %v1591_v12 }
0x2f32   :  { %v2730_v47 = vpop.f32.mrf.mxu3 }
0x2f33   :  { %v2731_v28 = vadd.f32 %v3277_v29, %v2730_v47 }
0x2f35   :  { %2739 = vperm.xlu0 %3158, %v2731_v28  }
0x2f3a   :  { %v2733_v22 = vpop.f32.mrf.mxu3 }
0x2f3b   :  { %v2734_v3 = vadd.f32 %v3277_v29, %v2733_v22 }
0x2f3d   :  { %2744 = vperm.xlu1 %3159, %v2734_v3  }
0x2fa7   :  { %v2740_v55 = vpop.permute.xlu0 %2739 }
0x2fa8   :  { %v2747_v39 = vsel %vm2736_vm8, %v2740_v55, %v2169_v15 }
0x2fa9   :  { %v2793_v61 = vadd.f32 %v2791_v41, %v2747_v39 }
0x2fab   :  { %v2813_v31 = vmul.f32 %v2812_v35, %v2793_v61 }
0x2fad   :  { %2816 = vst.msk [vmem:[%s4774_s12] sm:$0xff] %vm2815_vm9, %v2813_v31 }
0x2faf   :  { %v2745_v6 = vpop.permute.xlu1 %2744 }
0x2fb0   :  { %v2748_v10 = vsel %vm2736_vm8, %v2745_v6, %v2170_v46 }
0x2fb1   :  { %v2794_v48 = vadd.f32 %v2792_v57, %v2748_v10 }
0x2fb3   :  { %v2814_v49 = vmul.f32 %v2812_v35, %v2794_v48 }
0x2fb5   :  { %2817 = vst.msk [vmem:[%s4774_s12 + $0x8] sm:$0xff] %vm2815_vm9, %v2814_v49 }
0x2fb6   :  { %3336 = dma.done.wait [#allocation4], 128  }
0x2fb7   :  { %3337 = vsyncadd [#allocation4], 4294967168 }
0x2fb8   :  { %2837 = vsyncpa [#allocation4], 1 }
0x2fb9   :  { %2838 = vsyncpa [#allocation5], 1 }

</bundles_post_ra>
